<compile_context>
chip_gen: v7x
topology: tpu7x:2x2x1
jax: 0.10.0
libtpu: 0.0.40
codegen_flags: <defaults>
</compile_context>

<pallas_src>
import math
import functools

import jax
import jax.numpy as jnp
from jax.experimental import pallas as pl
from jax.experimental.pallas import tpu as pltpu


# ----------------------------------------------------------------------------
# Fused decoder-layer kernel: one batch block per grid step.
# ----------------------------------------------------------------------------
def decoder_layer_kernel(
        tgt_ref, mem_ref,
        # self-attention params (packed lane-dense, scale folded into Q)
        wqkv_s, bqkv_s, wo_s, bo_s, g_s, be_s,
        # cross-attention params
        wq_x, bq_x, wkv_x, bkv_x, wo_x, bo_x, g_x, be_x,
        # feed-forward params
        w1, b1, w2, b2, g_f, be_f,
        o_ref,
        # VMEM scratch
        qkv_buf, qx_buf, kvx_buf, ctx_buf,
        *, num_heads, dim_qkv):
    f32 = jnp.float32
    cdt = jnp.bfloat16                       # MXU operand dtype, accumulate f32
    H, dq = num_heads, dim_qkv
    Hdq = H * dq
    Bb, Lt, D = tgt_ref.shape
    Ls = mem_ref.shape[1]
    Mq = Bb * Lt

    def layer_norm(y, gamma, beta):          # y fp32, eps matches nn.LayerNorm
        mean = jnp.mean(y, axis=-1, keepdims=True)
        var = jnp.mean(jnp.square(y - mean), axis=-1, keepdims=True)
        return (y - mean) * jax.lax.rsqrt(var + 1e-5) * gamma + beta

    def project(x2d, w_ref, b_ref):
        # single lane-dense 2-D MXU matmul (M, D) @ (D, N), bf16 in / fp32 acc,
        # result cast to bf16 once (it is only consumed as a matmul operand).
        y = jnp.dot(x2d.astype(cdt), w_ref[...],
                    preferred_element_type=f32) + b_ref[...]
        return y.astype(cdt)

    def mha(x2d, q_buf, q_base, kv_buf, k_base, v_base,
            wo_ref, bo_ref, g_ref, b_ref):
        # Per-head attention core.  The python loop only covers the tiny
        # (L, dq)-sized score/context matmuls (identical MXU work to a
        # head-batched einsum); projections and the output projection are
        # fused lane-dense 2-D matmuls.
        for h in range(H):
            q_h = q_buf[:, :, q_base + h * dq: q_base + (h + 1) * dq]
            k_h = kv_buf[:, :, k_base + h * dq: k_base + (h + 1) * dq]
            v_h = kv_buf[:, :, v_base + h * dq: v_base + (h + 1) * dq]
            # 1/sqrt(dq) is folded into the Q weights/bias in the wrapper.
            s = jnp.einsum('bqd,bkd->bqk', q_h, k_h,
                           preferred_element_type=f32)
            # TODO(synk): optional attention mask (module default mask=None)
            # is not applied.
            s = s - jnp.max(s, axis=-1, keepdims=True)
            e = jnp.exp(s)
            p = e * pl.reciprocal(jnp.sum(e, axis=-1, keepdims=True),
                                  approx=True)
            ctx = jnp.einsum('bqk,bkd->bqd', p.astype(cdt), v_h,
                             preferred_element_type=f32)
            # pack head h's context at its lane offset (concat(heads) layout)
            ctx_buf[:, :, h * dq:(h + 1) * dq] = ctx.astype(cdt)
        # fused output projection over all heads: one matmul with K = H*dq
        attn = jnp.dot(ctx_buf[...].reshape(Mq, Hdq), wo_ref[...],
                       preferred_element_type=f32) + bo_ref[...]
        # Residual (dropout == identity in eval) + LayerNorm
        return layer_norm(x2d + attn, g_ref[...], b_ref[...])

    x = tgt_ref[...].astype(f32).reshape(Mq, D)      # fp32 residual stream
    m = mem_ref[...].reshape(Bb * Ls, D)             # bf16, matmul operand only

    # ---- self-attention: Q,K,V of all heads from ONE fused projection ------
    qkv_buf[...] = project(x, wqkv_s, bqkv_s).reshape(Bb, Lt, 3 * Hdq)
    x = mha(x, qkv_buf, 0, qkv_buf, Hdq, 2 * Hdq, wo_s, bo_s, g_s, be_s)

    # ---- cross-attention: Q from x, fused K/V from memory ------------------
    qx_buf[...] = project(x, wq_x, bq_x).reshape(Bb, Lt, Hdq)
    kvx_buf[...] = project(m, wkv_x, bkv_x).reshape(Bb, Ls, 2 * Hdq)
    x = mha(x, qx_buf, 0, kvx_buf, 0, Hdq, wo_x, bo_x, g_x, be_x)

    # ---- feed-forward: Linear -> ReLU -> Linear, residual + LayerNorm ------
    hdn = jnp.dot(x.astype(cdt), w1[...], preferred_element_type=f32) + b1[...]
    hdn = jnp.maximum(hdn, 0.0).astype(cdt)
    f = jnp.dot(hdn, w2[...], preferred_element_type=f32) + b2[...]
    x = layer_norm(x + f, g_f[...], be_f[...])

    o_ref[...] = x.reshape(Bb, Lt, D).astype(o_ref.dtype)


# ----------------------------------------------------------------------------
# Wrapper: lane-dense weight packing, scale folding, batch-row blocking.
# ----------------------------------------------------------------------------
def transformer_decoder_layer(tgt, memory, params, num_heads, dim_qkv):
    B, Lt, D = tgt.shape
    _, Ls, _ = memory.shape
    cdt = jnp.bfloat16
    H, dq = num_heads, dim_qkv
    Hdq = H * dq
    inv = 1.0 / math.sqrt(dq)
    ps, px, pf = params["self_attn"], params["cross_attn"], params["ffn"]

    # Lane-dense packing: wqkv (D, 3*H*dq), wkv (D, 2*H*dq), wo (H*dq, D);
    # the 1/sqrt(dq) attention scale is folded into the Q weights AND Q bias.
    # Matmul weights cast once to bf16; biases / LayerNorm params stay fp32.
    weights = (
        jnp.concatenate([ps["wq"] * inv, ps["wk"], ps["wv"]], axis=1).astype(cdt),
        jnp.concatenate([ps["bq"] * inv, ps["bk"], ps["bv"]], axis=1),
        ps["wo"].astype(cdt), ps["bo"], ps["gamma"], ps["beta"],
        (px["wq"] * inv).astype(cdt), px["bq"] * inv,
        jnp.concatenate([px["wk"], px["wv"]], axis=1).astype(cdt),
        jnp.concatenate([px["bk"], px["bv"]], axis=1),
        px["wo"].astype(cdt), px["bo"], px["gamma"], px["beta"],
        pf["w1"].astype(cdt), pf["b1"], pf["w2"].astype(cdt), pf["b2"],
        pf["gamma"], pf["beta"],
    )

    # Rows per grid step: target ~256 MXU rows (v6e/v7x MXU is 256x256) while
    # keeping >=2 grid steps when B allows so both v7x TensorCores get work.
    block_b = 1
    for cand in range(1, B + 1):
        if B % cand:
            continue
        if cand * Lt <= 256 and (B // cand >= 2 or B == 1):
            block_b = cand
    grid = (B // block_b,)

    def rep(shape):                          # whole-array block, grid-invariant
        n = len(shape)
        return pl.BlockSpec(shape, lambda b, _n=n: (0,) * _n)

    in_specs = [pl.BlockSpec((block_b, Lt, D), lambda b: (b, 0, 0)),
                pl.BlockSpec((block_b, Ls, D), lambda b: (b, 0, 0))]
    in_specs += [rep(w.shape) for w in weights]

    dff = pf["w1"].shape[1]
    flops = 2 * B * (Lt * D * 3 * Hdq
                     + 2 * H * Lt * Lt * dq
                     + Lt * Hdq * D
                     + Lt * D * Hdq + Ls * D * 2 * Hdq
                     + 2 * H * Lt * Ls * dq
                     + Lt * Hdq * D
                     + 2 * Lt * D * dff)
    transcendentals = B * H * (Lt * Lt + Lt * Ls)
    bytes_accessed = (B * Lt * D + B * Ls * D) * 2 + B * Lt * D * 4
    bytes_accessed += sum(int(w.size) * w.dtype.itemsize for w in weights)

    kern = functools.partial(decoder_layer_kernel,
                             num_heads=num_heads, dim_qkv=dim_qkv)
    # TODO(synk): for production sequence lengths add a q-tile grid axis with
    # online-softmax attention / K-tiled FFN and mark the grid-invariant weight
    # specs pipeline_mode=pl.Buffered(1) to fit v7x's 64 MiB VMEM.
    return pl.pallas_call(
        kern,
        out_shape=jax.ShapeDtypeStruct((B, Lt, D), jnp.float32),
        grid=grid,
        in_specs=in_specs,
        out_specs=pl.BlockSpec((block_b, Lt, D), lambda b: (b, 0, 0)),
        scratch_shapes=[
            pltpu.VMEM((block_b, Lt, 3 * Hdq), cdt),   # fused self-attn QKV
            pltpu.VMEM((block_b, Lt, Hdq), cdt),       # cross-attn Q
            pltpu.VMEM((block_b, Ls, 2 * Hdq), cdt),   # cross-attn K/V
            pltpu.VMEM((block_b, Lt, Hdq), cdt),       # packed per-head context
        ],
        compiler_params=pltpu.CompilerParams(
            dimension_semantics=("parallel",),
            vmem_limit_bytes=32 * 1024 * 1024),        # above v5e's 16 MiB default
        cost_estimate=pl.CostEstimate(
            flops=int(flops),
            transcendentals=int(transcendentals),
            bytes_accessed=int(bytes_accessed)),
    )(tgt.astype(cdt), memory.astype(cdt), *weights)


# ----------------------------------------------------------------------------
# Pure-JAX reference (same math; mirrors the kernel's bf16-operand / fp32-acc
# precision and bf16 activation quantization; dropout == identity in eval).
# Uses the unpacked fp32 params and an explicit score scale / exact softmax,
# so it independently checks the wrapper's scale folding and head packing.
# ----------------------------------------------------------------------------
def reference(tgt, memory, params, num_heads, dim_qkv):
    cdt, f32 = jnp.bfloat16, jnp.float32
    H, dq = num_heads, dim_qkv
    scale = 1.0 / math.sqrt(dq)

    tgt = tgt.astype(cdt).astype(f32)        # the wrapper feeds bf16 activations
    memory = memory.astype(cdt).astype(f32)

    def ln(y, g, b):
        mean = jnp.mean(y, axis=-1, keepdims=True)
        var = jnp.mean((y - mean) ** 2, axis=-1, keepdims=True)
        return (y - mean) / jnp.sqrt(var + 1e-5) * g + b

    def lin(x, w, b):
        return jnp.einsum('bld,de->ble', x.astype(cdt), w.astype(cdt),
                          preferred_element_type=f32) + b

    def split(y):                            # (B, L, H*dq) -> (B, H, L, dq)
        B_, L_, _ = y.shape
        return y.reshape(B_, L_, H, dq).transpose(0, 2, 1, 3)

    def mha(xq, xkv, p):
        q = split(lin(xq, p["wq"], p["bq"])).astype(cdt)
        k = split(lin(xkv, p["wk"], p["bk"])).astype(cdt)
        v = split(lin(xkv, p["wv"], p["bv"])).astype(cdt)
        s = jnp.einsum('bhqd,bhkd->bhqk', q, k,
                       preferred_element_type=f32) * scale
        pr = jax.nn.softmax(s, axis=-1)
        ctx = jnp.einsum('bhqk,bhkd->bhqd', pr.astype(cdt), v,
                         preferred_element_type=f32)
        B_, _, L_, _ = ctx.shape
        ctx = ctx.transpose(0, 2, 1, 3).reshape(B_, L_, H * dq)
        out = jnp.einsum('blc,cd->bld', ctx.astype(cdt), p["wo"].astype(cdt),
                         preferred_element_type=f32) + p["bo"]
        return ln(xq + out, p["gamma"], p["beta"])

    ps, px, pf = params["self_attn"], params["cross_attn"], params["ffn"]
    x = mha(tgt, tgt, ps)
    x = mha(x, memory, px)
    h = jnp.einsum('bld,df->blf', x.astype(cdt), pf["w1"].astype(cdt),
                   preferred_element_type=f32) + pf["b1"]
    h = jnp.maximum(h, 0.0)
    f = jnp.einsum('blf,fd->bld', h.astype(cdt), pf["w2"].astype(cdt),
                   preferred_element_type=f32) + pf["b2"]
    return ln(x + f, pf["gamma"], pf["beta"])


# ----------------------------------------------------------------------------
# Deterministic parameter init (fp32 master weights; head h of each projection
# occupies columns [h*dq, (h+1)*dq) == concatenated per-head nn.Linear weights,
# wo corresponds to nn.Linear(H*dq, D) applied to concat(heads)).
# ----------------------------------------------------------------------------
def init_params(key, dim_in, num_heads, dim_qkv, dim_ff):
    s = 0.05
    Hdq = num_heads * dim_qkv

    def mha_params(k):
        ks = jax.random.split(k, 8)
        return {
            "wq": jax.random.normal(ks[0], (dim_in, Hdq), jnp.float32) * s,
            "bq": jax.random.normal(ks[1], (1, Hdq), jnp.float32) * s,
            "wk": jax.random.normal(ks[2], (dim_in, Hdq), jnp.float32) * s,
            "bk": jax.random.normal(ks[3], (1, Hdq), jnp.float32) * s,
            "wv": jax.random.normal(ks[4], (dim_in, Hdq), jnp.float32) * s,
            "bv": jax.random.normal(ks[5], (1, Hdq), jnp.float32) * s,
            "wo": jax.random.normal(ks[6], (Hdq, dim_in), jnp.float32) * s,
            "bo": jax.random.normal(ks[7], (1, dim_in), jnp.float32) * s,
            "gamma": jnp.ones((1, dim_in), jnp.float32),
            "beta": jnp.zeros((1, dim_in), jnp.float32),
        }

    def ffn_params(k):
        ks = jax.random.split(k, 4)
        return {"w1": jax.random.normal(ks[0], (dim_in, dim_ff), jnp.float32) * s,
                "b1": jax.random.normal(ks[1], (1, dim_ff), jnp.float32) * s,
                "w2": jax.random.normal(ks[2], (dim_ff, dim_in), jnp.float32) * s,
                "b2": jax.random.normal(ks[3], (1, dim_in), jnp.float32) * s,
                "gamma": jnp.ones((1, dim_in), jnp.float32),
                "beta": jnp.zeros((1, dim_in), jnp.float32)}

    k1, k2, k3 = jax.random.split(key, 3)
    return {"self_attn": mha_params(k1),
            "cross_attn": mha_params(k2),
            "ffn": ffn_params(k3)}


if __name__ == "__main__":
    # Small shapes consistent with the module: (batch, seq, dim_in),
    # num_heads=6 -> dim_qkv = dim_in // num_heads.
    B, TGT_LEN, SRC_LEN = 2, 8, 12
    DIM_IN, NUM_HEADS, DIM_FF = 48, 6, 64
    DIM_QKV = max(DIM_IN // NUM_HEADS, 1)   # = 8

    key = jax.random.PRNGKey(0)
    k_tgt, k_mem, k_par = jax.random.split(key, 3)
    tgt = jax.random.normal(k_tgt, (B, TGT_LEN, DIM_IN), jnp.float32)
    memory = jax.random.normal(k_mem, (B, SRC_LEN, DIM_IN), jnp.float32)
    params = init_params(k_par, DIM_IN, NUM_HEADS, DIM_QKV, DIM_FF)

    out = transformer_decoder_layer(tgt, memory, params, NUM_HEADS, DIM_QKV)
    out = jax.block_until_ready(out)

    ref = reference(tgt, memory, params, NUM_HEADS, DIM_QKV)
    assert out.shape == (B, TGT_LEN, DIM_IN)
    max_err = float(jnp.max(jnp.abs(out - ref)))
    # Tolerance covers bf16 scale-folded weights + approx reciprocal softmax.
    assert max_err < 1e-2, f"mismatch vs reference (max abs err {max_err})"

    print("KERNEL_OK")
</pallas_src>

<mosaic_0001>
module attributes {stable_mosaic.version = 11 : i64} {
  func.func @decoder_layer_kernel(%arg0: i32, %arg1: memref<1x8x48xbf16, #tpu.memory_space<vmem>>, %arg2: memref<1x12x48xbf16, #tpu.memory_space<vmem>>, %arg3: memref<48x144xbf16, #tpu.memory_space<vmem>>, %arg4: memref<1x144xf32, #tpu.memory_space<vmem>>, %arg5: memref<48x48xbf16, #tpu.memory_space<vmem>>, %arg6: memref<1x48xf32, #tpu.memory_space<vmem>>, %arg7: memref<1x48xf32, #tpu.memory_space<vmem>>, %arg8: memref<1x48xf32, #tpu.memory_space<vmem>>, %arg9: memref<48x48xbf16, #tpu.memory_space<vmem>>, %arg10: memref<1x48xf32, #tpu.memory_space<vmem>>, %arg11: memref<48x96xbf16, #tpu.memory_space<vmem>>, %arg12: memref<1x96xf32, #tpu.memory_space<vmem>>, %arg13: memref<48x48xbf16, #tpu.memory_space<vmem>>, %arg14: memref<1x48xf32, #tpu.memory_space<vmem>>, %arg15: memref<1x48xf32, #tpu.memory_space<vmem>>, %arg16: memref<1x48xf32, #tpu.memory_space<vmem>>, %arg17: memref<48x64xbf16, #tpu.memory_space<vmem>>, %arg18: memref<1x64xf32, #tpu.memory_space<vmem>>, %arg19: memref<64x48xbf16, #tpu.memory_space<vmem>>, %arg20: memref<1x48xf32, #tpu.memory_space<vmem>>, %arg21: memref<1x48xf32, #tpu.memory_space<vmem>>, %arg22: memref<1x48xf32, #tpu.memory_space<vmem>>, %arg23: memref<1x8x48xf32, #tpu.memory_space<vmem>>, %arg24: memref<1x8x144xbf16, #tpu.memory_space<vmem>>, %arg25: memref<1x8x48xbf16, #tpu.memory_space<vmem>>, %arg26: memref<1x12x96xbf16, #tpu.memory_space<vmem>>, %arg27: memref<1x8x48xbf16, #tpu.memory_space<vmem>>) attributes {dimension_semantics = [#tpu.dimension_semantics<parallel>], iteration_bounds = array<i64: 2>, scalar_prefetch = 0 : i64, scratch_operands = 4 : i64, tpu.core_type = #tpu.core_type<tc>, window_params = [{transform_indices = @transform_0, window_bounds = array<i64: 1, 8, 48>}, {transform_indices = @transform_1, window_bounds = array<i64: 1, 12, 48>}, {pipeline_mode = #tpu.pipeline_mode<synchronous>, transform_indices = @transform_2, window_bounds = array<i64: 48, 144>}, {pipeline_mode = #tpu.pipeline_mode<synchronous>, transform_indices = @transform_3, window_bounds = array<i64: 1, 144>}, {pipeline_mode = #tpu.pipeline_mode<synchronous>, transform_indices = @transform_4, window_bounds = array<i64: 48, 48>}, {pipeline_mode = #tpu.pipeline_mode<synchronous>, transform_indices = @transform_5, window_bounds = array<i64: 1, 48>}, {pipeline_mode = #tpu.pipeline_mode<synchronous>, transform_indices = @transform_6, window_bounds = array<i64: 1, 48>}, {pipeline_mode = #tpu.pipeline_mode<synchronous>, transform_indices = @transform_7, window_bounds = array<i64: 1, 48>}, {pipeline_mode = #tpu.pipeline_mode<synchronous>, transform_indices = @transform_8, window_bounds = array<i64: 48, 48>}, {pipeline_mode = #tpu.pipeline_mode<synchronous>, transform_indices = @transform_9, window_bounds = array<i64: 1, 48>}, {pipeline_mode = #tpu.pipeline_mode<synchronous>, transform_indices = @transform_10, window_bounds = array<i64: 48, 96>}, {pipeline_mode = #tpu.pipeline_mode<synchronous>, transform_indices = @transform_11, window_bounds = array<i64: 1, 96>}, {pipeline_mode = #tpu.pipeline_mode<synchronous>, transform_indices = @transform_12, window_bounds = array<i64: 48, 48>}, {pipeline_mode = #tpu.pipeline_mode<synchronous>, transform_indices = @transform_13, window_bounds = array<i64: 1, 48>}, {pipeline_mode = #tpu.pipeline_mode<synchronous>, transform_indices = @transform_14, window_bounds = array<i64: 1, 48>}, {pipeline_mode = #tpu.pipeline_mode<synchronous>, transform_indices = @transform_15, window_bounds = array<i64: 1, 48>}, {pipeline_mode = #tpu.pipeline_mode<synchronous>, transform_indices = @transform_16, window_bounds = array<i64: 48, 64>}, {pipeline_mode = #tpu.pipeline_mode<synchronous>, transform_indices = @transform_17, window_bounds = array<i64: 1, 64>}, {pipeline_mode = #tpu.pipeline_mode<synchronous>, transform_indices = @transform_18, window_bounds = array<i64: 64, 48>}, {pipeline_mode = #tpu.pipeline_mode<synchronous>, transform_indices = @transform_19, window_bounds = array<i64: 1, 48>}, {pipeline_mode = #tpu.pipeline_mode<synchronous>, transform_indices = @transform_20, window_bounds = array<i64: 1, 48>}, {pipeline_mode = #tpu.pipeline_mode<synchronous>, transform_indices = @transform_21, window_bounds = array<i64: 1, 48>}, {transform_indices = @transform_22, window_bounds = array<i64: 1, 8, 48>}]} {
    %c0 = arith.constant 0 : index
    %c0_0 = arith.constant 0 : index
    %c0_1 = arith.constant 0 : index
    %0 = vector.load %arg1[%c0, %c0_0, %c0_1] : memref<1x8x48xbf16, #tpu.memory_space<vmem>>, vector<1x8x48xbf16>
    %1 = arith.extf %0 : vector<1x8x48xbf16> to vector<1x8x48xf32>
    %2 = vector.shape_cast %1 : vector<1x8x48xf32> to vector<8x48xf32>
    %c0_2 = arith.constant 0 : index
    %c0_3 = arith.constant 0 : index
    %c0_4 = arith.constant 0 : index
    %3 = vector.load %arg2[%c0_2, %c0_3, %c0_4] : memref<1x12x48xbf16, #tpu.memory_space<vmem>>, vector<1x12x48xbf16>
    %4 = vector.shape_cast %3 : vector<1x12x48xbf16> to vector<12x48xbf16>
    %5 = arith.truncf %2 : vector<8x48xf32> to vector<8x48xbf16>
    %c0_5 = arith.constant 0 : index
    %c0_6 = arith.constant 0 : index
    %6 = vector.load %arg3[%c0_5, %c0_6] : memref<48x144xbf16, #tpu.memory_space<vmem>>, vector<48x144xbf16>
    %cst = arith.constant dense<0.000000e+00> : vector<8x144xf32>
    %7 = tpu.matmul %5, %6, %cst {dimension_numbers = #tpu.dot_dimension_numbers<[1], [0], [0], [1], [0, 0, 1, 1], [], []>} : vector<8x48xbf16>, vector<48x144xbf16>, vector<8x144xf32> -> vector<8x144xf32>
    %c0_7 = arith.constant 0 : index
    %c0_8 = arith.constant 0 : index
    %8 = vector.load %arg4[%c0_7, %c0_8] : memref<1x144xf32, #tpu.memory_space<vmem>>, vector<1x144xf32>
    %9 = vector.broadcast %8 : vector<1x144xf32> to vector<8x144xf32>
    %10 = arith.addf %7, %9 : vector<8x144xf32>
    %11 = arith.truncf %10 : vector<8x144xf32> to vector<8x144xbf16>
    %12 = vector.shape_cast %11 : vector<8x144xbf16> to vector<1x8x144xbf16>
    %c0_9 = arith.constant 0 : index
    %c0_10 = arith.constant 0 : index
    %c0_11 = arith.constant 0 : index
    %13 = vector.load %arg24[%c0_9, %c0_10, %c0_11] : memref<1x8x144xbf16, #tpu.memory_space<vmem>>, vector<1x8x144xbf16>
    tpu.vector_store %arg24[%c0_9, %c0_10, %c0_11], %12 {strides = array<i32>} : memref<1x8x144xbf16, #tpu.memory_space<vmem>>, vector<1x8x144xbf16>,
    %c0_12 = arith.constant 0 : index
    %c0_13 = arith.constant 0 : index
    %c0_14 = arith.constant 0 : index
    %14 = vector.load %arg24[%c0_12, %c0_13, %c0_14] : memref<1x8x144xbf16, #tpu.memory_space<vmem>>, vector<1x8x8xbf16>
    %c0_15 = arith.constant 0 : index
    %c0_16 = arith.constant 0 : index
    %c48 = arith.constant 48 : index
    %15 = vector.load %arg24[%c0_15, %c0_16, %c48] : memref<1x8x144xbf16, #tpu.memory_space<vmem>>, vector<1x8x8xbf16>
    %c0_17 = arith.constant 0 : index
    %c0_18 = arith.constant 0 : index
    %c96 = arith.constant 96 : index
    %16 = vector.load %arg24[%c0_17, %c0_18, %c96] : memref<1x8x144xbf16, #tpu.memory_space<vmem>>, vector<1x8x8xbf16>
    "tpu.trace_start"() <{level = 10 : i32, message = "bqd,bkd->bqk"}> : () -> ()
    %cst_19 = arith.constant dense<0.000000e+00> : vector<1x8x8xf32>
    %17 = tpu.matmul %14, %15, %cst_19 {dimension_numbers = #tpu.dot_dimension_numbers<[2], [2], [1], [1], [0, 0, 0, 1, 1, 1], [0], [0]>} : vector<1x8x8xbf16>, vector<1x8x8xbf16>, vector<1x8x8xf32> -> vector<1x8x8xf32>
    "tpu.trace_stop"() : () -> ()
    %cst_20 = arith.constant dense<0xFF800000> : vector<1x8xf32>
    %18 = vector.multi_reduction <maximumf>, %17, %cst_20 [2] : vector<1x8x8xf32> to vector<1x8xf32>
    %19 = vector.shape_cast %18 : vector<1x8xf32> to vector<1x8x1xf32>
    %20 = vector.broadcast %19 : vector<1x8x1xf32> to vector<1x8x8xf32>
    %21 = arith.subf %17, %20 : vector<1x8x8xf32>
    %22 = math.exp %21 : vector<1x8x8xf32>
    %cst_21 = arith.constant dense<0.000000e+00> : vector<1x8xf32>
    %23 = vector.multi_reduction <add>, %22, %cst_21 [2] : vector<1x8x8xf32> to vector<1x8xf32>
    %24 = vector.shape_cast %23 : vector<1x8xf32> to vector<1x8x1xf32>
    %25 = tpu.reciprocal %24 {approx = true} : vector<1x8x1xf32> -> vector<1x8x1xf32>
    %26 = vector.broadcast %25 : vector<1x8x1xf32> to vector<1x8x8xf32>
    %27 = arith.mulf %22, %26 : vector<1x8x8xf32>
    %28 = arith.truncf %27 : vector<1x8x8xf32> to vector<1x8x8xbf16>
    "tpu.trace_start"() <{level = 10 : i32, message = "bqk,bkd->bqd"}> : () -> ()
    %cst_22 = arith.constant dense<0.000000e+00> : vector<1x8x8xf32>
    %29 = tpu.matmul %28, %16, %cst_22 {dimension_numbers = #tpu.dot_dimension_numbers<[2], [1], [1], [2], [0, 0, 0, 1, 1, 2], [0], [0]>} : vector<1x8x8xbf16>, vector<1x8x8xbf16>, vector<1x8x8xf32> -> vector<1x8x8xf32>
    "tpu.trace_stop"() : () -> ()
    %30 = arith.truncf %29 : vector<1x8x8xf32> to vector<1x8x8xbf16>
    %c0_23 = arith.constant 0 : index
    %c0_24 = arith.constant 0 : index
    %c0_25 = arith.constant 0 : index
    %31 = vector.load %arg27[%c0_23, %c0_24, %c0_25] : memref<1x8x48xbf16, #tpu.memory_space<vmem>>, vector<1x8x8xbf16>
    tpu.vector_store %arg27[%c0_23, %c0_24, %c0_25], %30 {strides = array<i32>} : memref<1x8x48xbf16, #tpu.memory_space<vmem>>, vector<1x8x8xbf16>,
    %c0_26 = arith.constant 0 : index
    %c0_27 = arith.constant 0 : index
    %c8 = arith.constant 8 : index
    %32 = vector.load %arg24[%c0_26, %c0_27, %c8] : memref<1x8x144xbf16, #tpu.memory_space<vmem>>, vector<1x8x8xbf16>
    %c0_28 = arith.constant 0 : index
    %c0_29 = arith.constant 0 : index
    %c56 = arith.constant 56 : index
    %33 = vector.load %arg24[%c0_28, %c0_29, %c56] : memref<1x8x144xbf16, #tpu.memory_space<vmem>>, vector<1x8x8xbf16>
    %c0_30 = arith.constant 0 : index
    %c0_31 = arith.constant 0 : index
    %c104 = arith.constant 104 : index
    %34 = vector.load %arg24[%c0_30, %c0_31, %c104] : memref<1x8x144xbf16, #tpu.memory_space<vmem>>, vector<1x8x8xbf16>
    "tpu.trace_start"() <{level = 10 : i32, message = "bqd,bkd->bqk"}> : () -> ()
    %cst_32 = arith.constant dense<0.000000e+00> : vector<1x8x8xf32>
    %35 = tpu.matmul %32, %33, %cst_32 {dimension_numbers = #tpu.dot_dimension_numbers<[2], [2], [1], [1], [0, 0, 0, 1, 1, 1], [0], [0]>} : vector<1x8x8xbf16>, vector<1x8x8xbf16>, vector<1x8x8xf32> -> vector<1x8x8xf32>
    "tpu.trace_stop"() : () -> ()
    %cst_33 = arith.constant dense<0xFF800000> : vector<1x8xf32>
    %36 = vector.multi_reduction <maximumf>, %35, %cst_33 [2] : vector<1x8x8xf32> to vector<1x8xf32>
    %37 = vector.shape_cast %36 : vector<1x8xf32> to vector<1x8x1xf32>
    %38 = vector.broadcast %37 : vector<1x8x1xf32> to vector<1x8x8xf32>
    %39 = arith.subf %35, %38 : vector<1x8x8xf32>
    %40 = math.exp %39 : vector<1x8x8xf32>
    %cst_34 = arith.constant dense<0.000000e+00> : vector<1x8xf32>
    %41 = vector.multi_reduction <add>, %40, %cst_34 [2] : vector<1x8x8xf32> to vector<1x8xf32>
    %42 = vector.shape_cast %41 : vector<1x8xf32> to vector<1x8x1xf32>
    %43 = tpu.reciprocal %42 {approx = true} : vector<1x8x1xf32> -> vector<1x8x1xf32>
    %44 = vector.broadcast %43 : vector<1x8x1xf32> to vector<1x8x8xf32>
    %45 = arith.mulf %40, %44 : vector<1x8x8xf32>
    %46 = arith.truncf %45 : vector<1x8x8xf32> to vector<1x8x8xbf16>
    "tpu.trace_start"() <{level = 10 : i32, message = "bqk,bkd->bqd"}> : () -> ()
    %cst_35 = arith.constant dense<0.000000e+00> : vector<1x8x8xf32>
    %47 = tpu.matmul %46, %34, %cst_35 {dimension_numbers = #tpu.dot_dimension_numbers<[2], [1], [1], [2], [0, 0, 0, 1, 1, 2], [0], [0]>} : vector<1x8x8xbf16>, vector<1x8x8xbf16>, vector<1x8x8xf32> -> vector<1x8x8xf32>
    "tpu.trace_stop"() : () -> ()
    %48 = arith.truncf %47 : vector<1x8x8xf32> to vector<1x8x8xbf16>
    %c0_36 = arith.constant 0 : index
    %c0_37 = arith.constant 0 : index
    %c8_38 = arith.constant 8 : index
    %49 = vector.load %arg27[%c0_36, %c0_37, %c8_38] : memref<1x8x48xbf16, #tpu.memory_space<vmem>>, vector<1x8x8xbf16>
    tpu.vector_store %arg27[%c0_36, %c0_37, %c8_38], %48 {strides = array<i32>} : memref<1x8x48xbf16, #tpu.memory_space<vmem>>, vector<1x8x8xbf16>,
    %c0_39 = arith.constant 0 : index
    %c0_40 = arith.constant 0 : index
    %c16 = arith.constant 16 : index
    %50 = vector.load %arg24[%c0_39, %c0_40, %c16] : memref<1x8x144xbf16, #tpu.memory_space<vmem>>, vector<1x8x8xbf16>
    %c0_41 = arith.constant 0 : index
    %c0_42 = arith.constant 0 : index
    %c64 = arith.constant 64 : index
    %51 = vector.load %arg24[%c0_41, %c0_42, %c64] : memref<1x8x144xbf16, #tpu.memory_space<vmem>>, vector<1x8x8xbf16>
    %c0_43 = arith.constant 0 : index
    %c0_44 = arith.constant 0 : index
    %c112 = arith.constant 112 : index
    %52 = vector.load %arg24[%c0_43, %c0_44, %c112] : memref<1x8x144xbf16, #tpu.memory_space<vmem>>, vector<1x8x8xbf16>
    "tpu.trace_start"() <{level = 10 : i32, message = "bqd,bkd->bqk"}> : () -> ()
    %cst_45 = arith.constant dense<0.000000e+00> : vector<1x8x8xf32>
    %53 = tpu.matmul %50, %51, %cst_45 {dimension_numbers = #tpu.dot_dimension_numbers<[2], [2], [1], [1], [0, 0, 0, 1, 1, 1], [0], [0]>} : vector<1x8x8xbf16>, vector<1x8x8xbf16>, vector<1x8x8xf32> -> vector<1x8x8xf32>
    "tpu.trace_stop"() : () -> ()
    %cst_46 = arith.constant dense<0xFF800000> : vector<1x8xf32>
    %54 = vector.multi_reduction <maximumf>, %53, %cst_46 [2] : vector<1x8x8xf32> to vector<1x8xf32>
    %55 = vector.shape_cast %54 : vector<1x8xf32> to vector<1x8x1xf32>
    %56 = vector.broadcast %55 : vector<1x8x1xf32> to vector<1x8x8xf32>
    %57 = arith.subf %53, %56 : vector<1x8x8xf32>
    %58 = math.exp %57 : vector<1x8x8xf32>
    %cst_47 = arith.constant dense<0.000000e+00> : vector<1x8xf32>
    %59 = vector.multi_reduction <add>, %58, %cst_47 [2] : vector<1x8x8xf32> to vector<1x8xf32>
    %60 = vector.shape_cast %59 : vector<1x8xf32> to vector<1x8x1xf32>
    %61 = tpu.reciprocal %60 {approx = true} : vector<1x8x1xf32> -> vector<1x8x1xf32>
    %62 = vector.broadcast %61 : vector<1x8x1xf32> to vector<1x8x8xf32>
    %63 = arith.mulf %58, %62 : vector<1x8x8xf32>
    %64 = arith.truncf %63 : vector<1x8x8xf32> to vector<1x8x8xbf16>
    "tpu.trace_start"() <{level = 10 : i32, message = "bqk,bkd->bqd"}> : () -> ()
    %cst_48 = arith.constant dense<0.000000e+00> : vector<1x8x8xf32>
    %65 = tpu.matmul %64, %52, %cst_48 {dimension_numbers = #tpu.dot_dimension_numbers<[2], [1], [1], [2], [0, 0, 0, 1, 1, 2], [0], [0]>} : vector<1x8x8xbf16>, vector<1x8x8xbf16>, vector<1x8x8xf32> -> vector<1x8x8xf32>
    "tpu.trace_stop"() : () -> ()
    %66 = arith.truncf %65 : vector<1x8x8xf32> to vector<1x8x8xbf16>
    %c0_49 = arith.constant 0 : index
    %c0_50 = arith.constant 0 : index
    %c16_51 = arith.constant 16 : index
    %67 = vector.load %arg27[%c0_49, %c0_50, %c16_51] : memref<1x8x48xbf16, #tpu.memory_space<vmem>>, vector<1x8x8xbf16>
    tpu.vector_store %arg27[%c0_49, %c0_50, %c16_51], %66 {strides = array<i32>} : memref<1x8x48xbf16, #tpu.memory_space<vmem>>, vector<1x8x8xbf16>,
    %c0_52 = arith.constant 0 : index
    %c0_53 = arith.constant 0 : index
    %c24 = arith.constant 24 : index
    %68 = vector.load %arg24[%c0_52, %c0_53, %c24] : memref<1x8x144xbf16, #tpu.memory_space<vmem>>, vector<1x8x8xbf16>
    %c0_54 = arith.constant 0 : index
    %c0_55 = arith.constant 0 : index
    %c72 = arith.constant 72 : index
    %69 = vector.load %arg24[%c0_54, %c0_55, %c72] : memref<1x8x144xbf16, #tpu.memory_space<vmem>>, vector<1x8x8xbf16>
    %c0_56 = arith.constant 0 : index
    %c0_57 = arith.constant 0 : index
    %c120 = arith.constant 120 : index
    %70 = vector.load %arg24[%c0_56, %c0_57, %c120] : memref<1x8x144xbf16, #tpu.memory_space<vmem>>, vector<1x8x8xbf16>
    "tpu.trace_start"() <{level = 10 : i32, message = "bqd,bkd->bqk"}> : () -> ()
    %cst_58 = arith.constant dense<0.000000e+00> : vector<1x8x8xf32>
    %71 = tpu.matmul %68, %69, %cst_58 {dimension_numbers = #tpu.dot_dimension_numbers<[2], [2], [1], [1], [0, 0, 0, 1, 1, 1], [0], [0]>} : vector<1x8x8xbf16>, vector<1x8x8xbf16>, vector<1x8x8xf32> -> vector<1x8x8xf32>
    "tpu.trace_stop"() : () -> ()
    %cst_59 = arith.constant dense<0xFF800000> : vector<1x8xf32>
    %72 = vector.multi_reduction <maximumf>, %71, %cst_59 [2] : vector<1x8x8xf32> to vector<1x8xf32>
    %73 = vector.shape_cast %72 : vector<1x8xf32> to vector<1x8x1xf32>
    %74 = vector.broadcast %73 : vector<1x8x1xf32> to vector<1x8x8xf32>
    %75 = arith.subf %71, %74 : vector<1x8x8xf32>
    %76 = math.exp %75 : vector<1x8x8xf32>
    %cst_60 = arith.constant dense<0.000000e+00> : vector<1x8xf32>
    %77 = vector.multi_reduction <add>, %76, %cst_60 [2] : vector<1x8x8xf32> to vector<1x8xf32>
    %78 = vector.shape_cast %77 : vector<1x8xf32> to vector<1x8x1xf32>
    %79 = tpu.reciprocal %78 {approx = true} : vector<1x8x1xf32> -> vector<1x8x1xf32>
    %80 = vector.broadcast %79 : vector<1x8x1xf32> to vector<1x8x8xf32>
    %81 = arith.mulf %76, %80 : vector<1x8x8xf32>
    %82 = arith.truncf %81 : vector<1x8x8xf32> to vector<1x8x8xbf16>
    "tpu.trace_start"() <{level = 10 : i32, message = "bqk,bkd->bqd"}> : () -> ()
    %cst_61 = arith.constant dense<0.000000e+00> : vector<1x8x8xf32>
    %83 = tpu.matmul %82, %70, %cst_61 {dimension_numbers = #tpu.dot_dimension_numbers<[2], [1], [1], [2], [0, 0, 0, 1, 1, 2], [0], [0]>} : vector<1x8x8xbf16>, vector<1x8x8xbf16>, vector<1x8x8xf32> -> vector<1x8x8xf32>
    "tpu.trace_stop"() : () -> ()
    %84 = arith.truncf %83 : vector<1x8x8xf32> to vector<1x8x8xbf16>
    %c0_62 = arith.constant 0 : index
    %c0_63 = arith.constant 0 : index
    %c24_64 = arith.constant 24 : index
    %85 = vector.load %arg27[%c0_62, %c0_63, %c24_64] : memref<1x8x48xbf16, #tpu.memory_space<vmem>>, vector<1x8x8xbf16>
    tpu.vector_store %arg27[%c0_62, %c0_63, %c24_64], %84 {strides = array<i32>} : memref<1x8x48xbf16, #tpu.memory_space<vmem>>, vector<1x8x8xbf16>,
    %c0_65 = arith.constant 0 : index
    %c0_66 = arith.constant 0 : index
    %c32 = arith.constant 32 : index
    %86 = vector.load %arg24[%c0_65, %c0_66, %c32] : memref<1x8x144xbf16, #tpu.memory_space<vmem>>, vector<1x8x8xbf16>
    %c0_67 = arith.constant 0 : index
    %c0_68 = arith.constant 0 : index
    %c80 = arith.constant 80 : index
    %87 = vector.load %arg24[%c0_67, %c0_68, %c80] : memref<1x8x144xbf16, #tpu.memory_space<vmem>>, vector<1x8x8xbf16>
    %c0_69 = arith.constant 0 : index
    %c0_70 = arith.constant 0 : index
    %c128 = arith.constant 128 : index
    %88 = vector.load %arg24[%c0_69, %c0_70, %c128] : memref<1x8x144xbf16, #tpu.memory_space<vmem>>, vector<1x8x8xbf16>
    "tpu.trace_start"() <{level = 10 : i32, message = "bqd,bkd->bqk"}> : () -> ()
    %cst_71 = arith.constant dense<0.000000e+00> : vector<1x8x8xf32>
    %89 = tpu.matmul %86, %87, %cst_71 {dimension_numbers = #tpu.dot_dimension_numbers<[2], [2], [1], [1], [0, 0, 0, 1, 1, 1], [0], [0]>} : vector<1x8x8xbf16>, vector<1x8x8xbf16>, vector<1x8x8xf32> -> vector<1x8x8xf32>
    "tpu.trace_stop"() : () -> ()
    %cst_72 = arith.constant dense<0xFF800000> : vector<1x8xf32>
    %90 = vector.multi_reduction <maximumf>, %89, %cst_72 [2] : vector<1x8x8xf32> to vector<1x8xf32>
    %91 = vector.shape_cast %90 : vector<1x8xf32> to vector<1x8x1xf32>
    %92 = vector.broadcast %91 : vector<1x8x1xf32> to vector<1x8x8xf32>
    %93 = arith.subf %89, %92 : vector<1x8x8xf32>
    %94 = math.exp %93 : vector<1x8x8xf32>
    %cst_73 = arith.constant dense<0.000000e+00> : vector<1x8xf32>
    %95 = vector.multi_reduction <add>, %94, %cst_73 [2] : vector<1x8x8xf32> to vector<1x8xf32>
    %96 = vector.shape_cast %95 : vector<1x8xf32> to vector<1x8x1xf32>
    %97 = tpu.reciprocal %96 {approx = true} : vector<1x8x1xf32> -> vector<1x8x1xf32>
    %98 = vector.broadcast %97 : vector<1x8x1xf32> to vector<1x8x8xf32>
    %99 = arith.mulf %94, %98 : vector<1x8x8xf32>
    %100 = arith.truncf %99 : vector<1x8x8xf32> to vector<1x8x8xbf16>
    "tpu.trace_start"() <{level = 10 : i32, message = "bqk,bkd->bqd"}> : () -> ()
    %cst_74 = arith.constant dense<0.000000e+00> : vector<1x8x8xf32>
    %101 = tpu.matmul %100, %88, %cst_74 {dimension_numbers = #tpu.dot_dimension_numbers<[2], [1], [1], [2], [0, 0, 0, 1, 1, 2], [0], [0]>} : vector<1x8x8xbf16>, vector<1x8x8xbf16>, vector<1x8x8xf32> -> vector<1x8x8xf32>
    "tpu.trace_stop"() : () -> ()
    %102 = arith.truncf %101 : vector<1x8x8xf32> to vector<1x8x8xbf16>
    %c0_75 = arith.constant 0 : index
    %c0_76 = arith.constant 0 : index
    %c32_77 = arith.constant 32 : index
    %103 = vector.load %arg27[%c0_75, %c0_76, %c32_77] : memref<1x8x48xbf16, #tpu.memory_space<vmem>>, vector<1x8x8xbf16>
    tpu.vector_store %arg27[%c0_75, %c0_76, %c32_77], %102 {strides = array<i32>} : memref<1x8x48xbf16, #tpu.memory_space<vmem>>, vector<1x8x8xbf16>,
    %c0_78 = arith.constant 0 : index
    %c0_79 = arith.constant 0 : index
    %c40 = arith.constant 40 : index
    %104 = vector.load %arg24[%c0_78, %c0_79, %c40] : memref<1x8x144xbf16, #tpu.memory_space<vmem>>, vector<1x8x8xbf16>
    %c0_80 = arith.constant 0 : index
    %c0_81 = arith.constant 0 : index
    %c88 = arith.constant 88 : index
    %105 = vector.load %arg24[%c0_80, %c0_81, %c88] : memref<1x8x144xbf16, #tpu.memory_space<vmem>>, vector<1x8x8xbf16>
    %c0_82 = arith.constant 0 : index
    %c0_83 = arith.constant 0 : index
    %c136 = arith.constant 136 : index
    %106 = vector.load %arg24[%c0_82, %c0_83, %c136] : memref<1x8x144xbf16, #tpu.memory_space<vmem>>, vector<1x8x8xbf16>
    "tpu.trace_start"() <{level = 10 : i32, message = "bqd,bkd->bqk"}> : () -> ()
    %cst_84 = arith.constant dense<0.000000e+00> : vector<1x8x8xf32>
    %107 = tpu.matmul %104, %105, %cst_84 {dimension_numbers = #tpu.dot_dimension_numbers<[2], [2], [1], [1], [0, 0, 0, 1, 1, 1], [0], [0]>} : vector<1x8x8xbf16>, vector<1x8x8xbf16>, vector<1x8x8xf32> -> vector<1x8x8xf32>
    "tpu.trace_stop"() : () -> ()
    %cst_85 = arith.constant dense<0xFF800000> : vector<1x8xf32>
    %108 = vector.multi_reduction <maximumf>, %107, %cst_85 [2] : vector<1x8x8xf32> to vector<1x8xf32>
    %109 = vector.shape_cast %108 : vector<1x8xf32> to vector<1x8x1xf32>
    %110 = vector.broadcast %109 : vector<1x8x1xf32> to vector<1x8x8xf32>
    %111 = arith.subf %107, %110 : vector<1x8x8xf32>
    %112 = math.exp %111 : vector<1x8x8xf32>
    %cst_86 = arith.constant dense<0.000000e+00> : vector<1x8xf32>
    %113 = vector.multi_reduction <add>, %112, %cst_86 [2] : vector<1x8x8xf32> to vector<1x8xf32>
    %114 = vector.shape_cast %113 : vector<1x8xf32> to vector<1x8x1xf32>
    %115 = tpu.reciprocal %114 {approx = true} : vector<1x8x1xf32> -> vector<1x8x1xf32>
    %116 = vector.broadcast %115 : vector<1x8x1xf32> to vector<1x8x8xf32>
    %117 = arith.mulf %112, %116 : vector<1x8x8xf32>
    %118 = arith.truncf %117 : vector<1x8x8xf32> to vector<1x8x8xbf16>
    "tpu.trace_start"() <{level = 10 : i32, message = "bqk,bkd->bqd"}> : () -> ()
    %cst_87 = arith.constant dense<0.000000e+00> : vector<1x8x8xf32>
    %119 = tpu.matmul %118, %106, %cst_87 {dimension_numbers = #tpu.dot_dimension_numbers<[2], [1], [1], [2], [0, 0, 0, 1, 1, 2], [0], [0]>} : vector<1x8x8xbf16>, vector<1x8x8xbf16>, vector<1x8x8xf32> -> vector<1x8x8xf32>
    "tpu.trace_stop"() : () -> ()
    %120 = arith.truncf %119 : vector<1x8x8xf32> to vector<1x8x8xbf16>
    %c0_88 = arith.constant 0 : index
    %c0_89 = arith.constant 0 : index
    %c40_90 = arith.constant 40 : index
    %121 = vector.load %arg27[%c0_88, %c0_89, %c40_90] : memref<1x8x48xbf16, #tpu.memory_space<vmem>>, vector<1x8x8xbf16>
    tpu.vector_store %arg27[%c0_88, %c0_89, %c40_90], %120 {strides = array<i32>} : memref<1x8x48xbf16, #tpu.memory_space<vmem>>, vector<1x8x8xbf16>,
    %c0_91 = arith.constant 0 : index
    %c0_92 = arith.constant 0 : index
    %c0_93 = arith.constant 0 : index
    %122 = vector.load %arg27[%c0_91, %c0_92, %c0_93] : memref<1x8x48xbf16, #tpu.memory_space<vmem>>, vector<1x8x48xbf16>
    %123 = vector.shape_cast %122 : vector<1x8x48xbf16> to vector<8x48xbf16>
    %c0_94 = arith.constant 0 : index
    %c0_95 = arith.constant 0 : index
    %124 = vector.load %arg5[%c0_94, %c0_95] : memref<48x48xbf16, #tpu.memory_space<vmem>>, vector<48x48xbf16>
    %cst_96 = arith.constant dense<0.000000e+00> : vector<8x48xf32>
    %125 = tpu.matmul %123, %124, %cst_96 {dimension_numbers = #tpu.dot_dimension_numbers<[1], [0], [0], [1], [0, 0, 1, 1], [], []>} : vector<8x48xbf16>, vector<48x48xbf16>, vector<8x48xf32> -> vector<8x48xf32>
    %c0_97 = arith.constant 0 : index
    %c0_98 = arith.constant 0 : index
    %126 = vector.load %arg6[%c0_97, %c0_98] : memref<1x48xf32, #tpu.memory_space<vmem>>, vector<1x48xf32>
    %127 = vector.broadcast %126 : vector<1x48xf32> to vector<8x48xf32>
    %128 = arith.addf %125, %127 : vector<8x48xf32>
    %129 = arith.addf %2, %128 : vector<8x48xf32>
    %c0_99 = arith.constant 0 : index
    %c0_100 = arith.constant 0 : index
    %130 = vector.load %arg7[%c0_99, %c0_100] : memref<1x48xf32, #tpu.memory_space<vmem>>, vector<1x48xf32>
    %c0_101 = arith.constant 0 : index
    %c0_102 = arith.constant 0 : index
    %131 = vector.load %arg8[%c0_101, %c0_102] : memref<1x48xf32, #tpu.memory_space<vmem>>, vector<1x48xf32>
    %cst_103 = arith.constant dense<0.000000e+00> : vector<8xf32>
    %132 = vector.multi_reduction <add>, %129, %cst_103 [1] : vector<8x48xf32> to vector<8xf32>
    %133 = vector.shape_cast %132 : vector<8xf32> to vector<8x1xf32>
    %cst_104 = arith.constant 4.800000e+01 : f32
    %134 = vector.broadcast %cst_104 : f32 to vector<8x1xf32>
    %135 = arith.divf %133, %134 : vector<8x1xf32>
    %136 = vector.broadcast %135 : vector<8x1xf32> to vector<8x48xf32>
    %137 = arith.subf %129, %136 : vector<8x48xf32>
    %138 = arith.mulf %137, %137 : vector<8x48xf32>
    %cst_105 = arith.constant dense<0.000000e+00> : vector<8xf32>
    %139 = vector.multi_reduction <add>, %138, %cst_105 [1] : vector<8x48xf32> to vector<8xf32>
    %140 = vector.shape_cast %139 : vector<8xf32> to vector<8x1xf32>
    %cst_106 = arith.constant 4.800000e+01 : f32
    %141 = vector.broadcast %cst_106 : f32 to vector<8x1xf32>
    %142 = arith.divf %140, %141 : vector<8x1xf32>
    %143 = vector.broadcast %135 : vector<8x1xf32> to vector<8x48xf32>
    %144 = arith.subf %129, %143 : vector<8x48xf32>
    %cst_107 = arith.constant 9.99999974E-6 : f32
    %145 = vector.broadcast %cst_107 : f32 to vector<8x1xf32>
    %146 = arith.addf %142, %145 : vector<8x1xf32>
    %147 = math.rsqrt %146 : vector<8x1xf32>
    %148 = vector.broadcast %147 : vector<8x1xf32> to vector<8x48xf32>
    %149 = arith.mulf %144, %148 : vector<8x48xf32>
    %150 = vector.broadcast %130 : vector<1x48xf32> to vector<8x48xf32>
    %151 = arith.mulf %149, %150 : vector<8x48xf32>
    %152 = vector.broadcast %131 : vector<1x48xf32> to vector<8x48xf32>
    %153 = arith.addf %151, %152 : vector<8x48xf32>
    %154 = arith.truncf %153 : vector<8x48xf32> to vector<8x48xbf16>
    %c0_108 = arith.constant 0 : index
    %c0_109 = arith.constant 0 : index
    %155 = vector.load %arg9[%c0_108, %c0_109] : memref<48x48xbf16, #tpu.memory_space<vmem>>, vector<48x48xbf16>
    %cst_110 = arith.constant dense<0.000000e+00> : vector<8x48xf32>
    %156 = tpu.matmul %154, %155, %cst_110 {dimension_numbers = #tpu.dot_dimension_numbers<[1], [0], [0], [1], [0, 0, 1, 1], [], []>} : vector<8x48xbf16>, vector<48x48xbf16>, vector<8x48xf32> -> vector<8x48xf32>
    %c0_111 = arith.constant 0 : index
    %c0_112 = arith.constant 0 : index
    %157 = vector.load %arg10[%c0_111, %c0_112] : memref<1x48xf32, #tpu.memory_space<vmem>>, vector<1x48xf32>
    %158 = vector.broadcast %157 : vector<1x48xf32> to vector<8x48xf32>
    %159 = arith.addf %156, %158 : vector<8x48xf32>
    %160 = arith.truncf %159 : vector<8x48xf32> to vector<8x48xbf16>
    %161 = vector.shape_cast %160 : vector<8x48xbf16> to vector<1x8x48xbf16>
    %c0_113 = arith.constant 0 : index
    %c0_114 = arith.constant 0 : index
    %c0_115 = arith.constant 0 : index
    %162 = vector.load %arg25[%c0_113, %c0_114, %c0_115] : memref<1x8x48xbf16, #tpu.memory_space<vmem>>, vector<1x8x48xbf16>
    tpu.vector_store %arg25[%c0_113, %c0_114, %c0_115], %161 {strides = array<i32>} : memref<1x8x48xbf16, #tpu.memory_space<vmem>>, vector<1x8x48xbf16>,
    %c0_116 = arith.constant 0 : index
    %c0_117 = arith.constant 0 : index
    %163 = vector.load %arg11[%c0_116, %c0_117] : memref<48x96xbf16, #tpu.memory_space<vmem>>, vector<48x96xbf16>
    %cst_118 = arith.constant dense<0.000000e+00> : vector<12x96xf32>
    %164 = tpu.matmul %4, %163, %cst_118 {dimension_numbers = #tpu.dot_dimension_numbers<[1], [0], [0], [1], [0, 0, 1, 1], [], []>} : vector<12x48xbf16>, vector<48x96xbf16>, vector<12x96xf32> -> vector<12x96xf32>
    %c0_119 = arith.constant 0 : index
    %c0_120 = arith.constant 0 : index
    %165 = vector.load %arg12[%c0_119, %c0_120] : memref<1x96xf32, #tpu.memory_space<vmem>>, vector<1x96xf32>
    %166 = vector.broadcast %165 : vector<1x96xf32> to vector<12x96xf32>
    %167 = arith.addf %164, %166 : vector<12x96xf32>
    %168 = arith.truncf %167 : vector<12x96xf32> to vector<12x96xbf16>
    %169 = vector.shape_cast %168 : vector<12x96xbf16> to vector<1x12x96xbf16>
    %c0_121 = arith.constant 0 : index
    %c0_122 = arith.constant 0 : index
    %c0_123 = arith.constant 0 : index
    %170 = vector.load %arg26[%c0_121, %c0_122, %c0_123] : memref<1x12x96xbf16, #tpu.memory_space<vmem>>, vector<1x12x96xbf16>
    tpu.vector_store %arg26[%c0_121, %c0_122, %c0_123], %169 {strides = array<i32>} : memref<1x12x96xbf16, #tpu.memory_space<vmem>>, vector<1x12x96xbf16>,
    %c0_124 = arith.constant 0 : index
    %c0_125 = arith.constant 0 : index
    %c0_126 = arith.constant 0 : index
    %171 = vector.load %arg25[%c0_124, %c0_125, %c0_126] : memref<1x8x48xbf16, #tpu.memory_space<vmem>>, vector<1x8x8xbf16>
    %c0_127 = arith.constant 0 : index
    %c0_128 = arith.constant 0 : index
    %c0_129 = arith.constant 0 : index
    %172 = vector.load %arg26[%c0_127, %c0_128, %c0_129] : memref<1x12x96xbf16, #tpu.memory_space<vmem>>, vector<1x12x8xbf16>
    %c0_130 = arith.constant 0 : index
    %c0_131 = arith.constant 0 : index
    %c48_132 = arith.constant 48 : index
    %173 = vector.load %arg26[%c0_130, %c0_131, %c48_132] : memref<1x12x96xbf16, #tpu.memory_space<vmem>>, vector<1x12x8xbf16>
    "tpu.trace_start"() <{level = 10 : i32, message = "bqd,bkd->bqk"}> : () -> ()
    %cst_133 = arith.constant dense<0.000000e+00> : vector<1x8x12xf32>
    %174 = tpu.matmul %171, %172, %cst_133 {dimension_numbers = #tpu.dot_dimension_numbers<[2], [2], [1], [1], [0, 0, 0, 1, 1, 1], [0], [0]>} : vector<1x8x8xbf16>, vector<1x12x8xbf16>, vector<1x8x12xf32> -> vector<1x8x12xf32>
    "tpu.trace_stop"() : () -> ()
    %cst_134 = arith.constant dense<0xFF800000> : vector<1x8xf32>
    %175 = vector.multi_reduction <maximumf>, %174, %cst_134 [2] : vector<1x8x12xf32> to vector<1x8xf32>
    %176 = vector.shape_cast %175 : vector<1x8xf32> to vector<1x8x1xf32>
    %177 = vector.broadcast %176 : vector<1x8x1xf32> to vector<1x8x12xf32>
    %178 = arith.subf %174, %177 : vector<1x8x12xf32>
    %179 = math.exp %178 : vector<1x8x12xf32>
    %cst_135 = arith.constant dense<0.000000e+00> : vector<1x8xf32>
    %180 = vector.multi_reduction <add>, %179, %cst_135 [2] : vector<1x8x12xf32> to vector<1x8xf32>
    %181 = vector.shape_cast %180 : vector<1x8xf32> to vector<1x8x1xf32>
    %182 = tpu.reciprocal %181 {approx = true} : vector<1x8x1xf32> -> vector<1x8x1xf32>
    %183 = vector.broadcast %182 : vector<1x8x1xf32> to vector<1x8x12xf32>
    %184 = arith.mulf %179, %183 : vector<1x8x12xf32>
    %185 = arith.truncf %184 : vector<1x8x12xf32> to vector<1x8x12xbf16>
    "tpu.trace_start"() <{level = 10 : i32, message = "bqk,bkd->bqd"}> : () -> ()
    %cst_136 = arith.constant dense<0.000000e+00> : vector<1x8x8xf32>
    %186 = tpu.matmul %185, %173, %cst_136 {dimension_numbers = #tpu.dot_dimension_numbers<[2], [1], [1], [2], [0, 0, 0, 1, 1, 2], [0], [0]>} : vector<1x8x12xbf16>, vector<1x12x8xbf16>, vector<1x8x8xf32> -> vector<1x8x8xf32>
    "tpu.trace_stop"() : () -> ()
    %187 = arith.truncf %186 : vector<1x8x8xf32> to vector<1x8x8xbf16>
    %c0_137 = arith.constant 0 : index
    %c0_138 = arith.constant 0 : index
    %c0_139 = arith.constant 0 : index
    %188 = vector.load %arg27[%c0_137, %c0_138, %c0_139] : memref<1x8x48xbf16, #tpu.memory_space<vmem>>, vector<1x8x8xbf16>
    tpu.vector_store %arg27[%c0_137, %c0_138, %c0_139], %187 {strides = array<i32>} : memref<1x8x48xbf16, #tpu.memory_space<vmem>>, vector<1x8x8xbf16>,
    %c0_140 = arith.constant 0 : index
    %c0_141 = arith.constant 0 : index
    %c8_142 = arith.constant 8 : index
    %189 = vector.load %arg25[%c0_140, %c0_141, %c8_142] : memref<1x8x48xbf16, #tpu.memory_space<vmem>>, vector<1x8x8xbf16>
    %c0_143 = arith.constant 0 : index
    %c0_144 = arith.constant 0 : index
    %c8_145 = arith.constant 8 : index
    %190 = vector.load %arg26[%c0_143, %c0_144, %c8_145] : memref<1x12x96xbf16, #tpu.memory_space<vmem>>, vector<1x12x8xbf16>
    %c0_146 = arith.constant 0 : index
    %c0_147 = arith.constant 0 : index
    %c56_148 = arith.constant 56 : index
    %191 = vector.load %arg26[%c0_146, %c0_147, %c56_148] : memref<1x12x96xbf16, #tpu.memory_space<vmem>>, vector<1x12x8xbf16>
    "tpu.trace_start"() <{level = 10 : i32, message = "bqd,bkd->bqk"}> : () -> ()
    %cst_149 = arith.constant dense<0.000000e+00> : vector<1x8x12xf32>
    %192 = tpu.matmul %189, %190, %cst_149 {dimension_numbers = #tpu.dot_dimension_numbers<[2], [2], [1], [1], [0, 0, 0, 1, 1, 1], [0], [0]>} : vector<1x8x8xbf16>, vector<1x12x8xbf16>, vector<1x8x12xf32> -> vector<1x8x12xf32>
    "tpu.trace_stop"() : () -> ()
    %cst_150 = arith.constant dense<0xFF800000> : vector<1x8xf32>
    %193 = vector.multi_reduction <maximumf>, %192, %cst_150 [2] : vector<1x8x12xf32> to vector<1x8xf32>
    %194 = vector.shape_cast %193 : vector<1x8xf32> to vector<1x8x1xf32>
    %195 = vector.broadcast %194 : vector<1x8x1xf32> to vector<1x8x12xf32>
    %196 = arith.subf %192, %195 : vector<1x8x12xf32>
    %197 = math.exp %196 : vector<1x8x12xf32>
    %cst_151 = arith.constant dense<0.000000e+00> : vector<1x8xf32>
    %198 = vector.multi_reduction <add>, %197, %cst_151 [2] : vector<1x8x12xf32> to vector<1x8xf32>
    %199 = vector.shape_cast %198 : vector<1x8xf32> to vector<1x8x1xf32>
    %200 = tpu.reciprocal %199 {approx = true} : vector<1x8x1xf32> -> vector<1x8x1xf32>
    %201 = vector.broadcast %200 : vector<1x8x1xf32> to vector<1x8x12xf32>
    %202 = arith.mulf %197, %201 : vector<1x8x12xf32>
    %203 = arith.truncf %202 : vector<1x8x12xf32> to vector<1x8x12xbf16>
    "tpu.trace_start"() <{level = 10 : i32, message = "bqk,bkd->bqd"}> : () -> ()
    %cst_152 = arith.constant dense<0.000000e+00> : vector<1x8x8xf32>
    %204 = tpu.matmul %203, %191, %cst_152 {dimension_numbers = #tpu.dot_dimension_numbers<[2], [1], [1], [2], [0, 0, 0, 1, 1, 2], [0], [0]>} : vector<1x8x12xbf16>, vector<1x12x8xbf16>, vector<1x8x8xf32> -> vector<1x8x8xf32>
    "tpu.trace_stop"() : () -> ()
    %205 = arith.truncf %204 : vector<1x8x8xf32> to vector<1x8x8xbf16>
    %c0_153 = arith.constant 0 : index
    %c0_154 = arith.constant 0 : index
    %c8_155 = arith.constant 8 : index
    %206 = vector.load %arg27[%c0_153, %c0_154, %c8_155] : memref<1x8x48xbf16, #tpu.memory_space<vmem>>, vector<1x8x8xbf16>
    tpu.vector_store %arg27[%c0_153, %c0_154, %c8_155], %205 {strides = array<i32>} : memref<1x8x48xbf16, #tpu.memory_space<vmem>>, vector<1x8x8xbf16>,
    %c0_156 = arith.constant 0 : index
    %c0_157 = arith.constant 0 : index
    %c16_158 = arith.constant 16 : index
    %207 = vector.load %arg25[%c0_156, %c0_157, %c16_158] : memref<1x8x48xbf16, #tpu.memory_space<vmem>>, vector<1x8x8xbf16>
    %c0_159 = arith.constant 0 : index
    %c0_160 = arith.constant 0 : index
    %c16_161 = arith.constant 16 : index
    %208 = vector.load %arg26[%c0_159, %c0_160, %c16_161] : memref<1x12x96xbf16, #tpu.memory_space<vmem>>, vector<1x12x8xbf16>
    %c0_162 = arith.constant 0 : index
    %c0_163 = arith.constant 0 : index
    %c64_164 = arith.constant 64 : index
    %209 = vector.load %arg26[%c0_162, %c0_163, %c64_164] : memref<1x12x96xbf16, #tpu.memory_space<vmem>>, vector<1x12x8xbf16>
    "tpu.trace_start"() <{level = 10 : i32, message = "bqd,bkd->bqk"}> : () -> ()
    %cst_165 = arith.constant dense<0.000000e+00> : vector<1x8x12xf32>
    %210 = tpu.matmul %207, %208, %cst_165 {dimension_numbers = #tpu.dot_dimension_numbers<[2], [2], [1], [1], [0, 0, 0, 1, 1, 1], [0], [0]>} : vector<1x8x8xbf16>, vector<1x12x8xbf16>, vector<1x8x12xf32> -> vector<1x8x12xf32>
    "tpu.trace_stop"() : () -> ()
    %cst_166 = arith.constant dense<0xFF800000> : vector<1x8xf32>
    %211 = vector.multi_reduction <maximumf>, %210, %cst_166 [2] : vector<1x8x12xf32> to vector<1x8xf32>
    %212 = vector.shape_cast %211 : vector<1x8xf32> to vector<1x8x1xf32>
    %213 = vector.broadcast %212 : vector<1x8x1xf32> to vector<1x8x12xf32>
    %214 = arith.subf %210, %213 : vector<1x8x12xf32>
    %215 = math.exp %214 : vector<1x8x12xf32>
    %cst_167 = arith.constant dense<0.000000e+00> : vector<1x8xf32>
    %216 = vector.multi_reduction <add>, %215, %cst_167 [2] : vector<1x8x12xf32> to vector<1x8xf32>
    %217 = vector.shape_cast %216 : vector<1x8xf32> to vector<1x8x1xf32>
    %218 = tpu.reciprocal %217 {approx = true} : vector<1x8x1xf32> -> vector<1x8x1xf32>
    %219 = vector.broadcast %218 : vector<1x8x1xf32> to vector<1x8x12xf32>
    %220 = arith.mulf %215, %219 : vector<1x8x12xf32>
    %221 = arith.truncf %220 : vector<1x8x12xf32> to vector<1x8x12xbf16>
    "tpu.trace_start"() <{level = 10 : i32, message = "bqk,bkd->bqd"}> : () -> ()
    %cst_168 = arith.constant dense<0.000000e+00> : vector<1x8x8xf32>
    %222 = tpu.matmul %221, %209, %cst_168 {dimension_numbers = #tpu.dot_dimension_numbers<[2], [1], [1], [2], [0, 0, 0, 1, 1, 2], [0], [0]>} : vector<1x8x12xbf16>, vector<1x12x8xbf16>, vector<1x8x8xf32> -> vector<1x8x8xf32>
    "tpu.trace_stop"() : () -> ()
    %223 = arith.truncf %222 : vector<1x8x8xf32> to vector<1x8x8xbf16>
    %c0_169 = arith.constant 0 : index
    %c0_170 = arith.constant 0 : index
    %c16_171 = arith.constant 16 : index
    %224 = vector.load %arg27[%c0_169, %c0_170, %c16_171] : memref<1x8x48xbf16, #tpu.memory_space<vmem>>, vector<1x8x8xbf16>
    tpu.vector_store %arg27[%c0_169, %c0_170, %c16_171], %223 {strides = array<i32>} : memref<1x8x48xbf16, #tpu.memory_space<vmem>>, vector<1x8x8xbf16>,
    %c0_172 = arith.constant 0 : index
    %c0_173 = arith.constant 0 : index
    %c24_174 = arith.constant 24 : index
    %225 = vector.load %arg25[%c0_172, %c0_173, %c24_174] : memref<1x8x48xbf16, #tpu.memory_space<vmem>>, vector<1x8x8xbf16>
    %c0_175 = arith.constant 0 : index
    %c0_176 = arith.constant 0 : index
    %c24_177 = arith.constant 24 : index
    %226 = vector.load %arg26[%c0_175, %c0_176, %c24_177] : memref<1x12x96xbf16, #tpu.memory_space<vmem>>, vector<1x12x8xbf16>
    %c0_178 = arith.constant 0 : index
    %c0_179 = arith.constant 0 : index
    %c72_180 = arith.constant 72 : index
    %227 = vector.load %arg26[%c0_178, %c0_179, %c72_180] : memref<1x12x96xbf16, #tpu.memory_space<vmem>>, vector<1x12x8xbf16>
    "tpu.trace_start"() <{level = 10 : i32, message = "bqd,bkd->bqk"}> : () -> ()
    %cst_181 = arith.constant dense<0.000000e+00> : vector<1x8x12xf32>
    %228 = tpu.matmul %225, %226, %cst_181 {dimension_numbers = #tpu.dot_dimension_numbers<[2], [2], [1], [1], [0, 0, 0, 1, 1, 1], [0], [0]>} : vector<1x8x8xbf16>, vector<1x12x8xbf16>, vector<1x8x12xf32> -> vector<1x8x12xf32>
    "tpu.trace_stop"() : () -> ()
    %cst_182 = arith.constant dense<0xFF800000> : vector<1x8xf32>
    %229 = vector.multi_reduction <maximumf>, %228, %cst_182 [2] : vector<1x8x12xf32> to vector<1x8xf32>
    %230 = vector.shape_cast %229 : vector<1x8xf32> to vector<1x8x1xf32>
    %231 = vector.broadcast %230 : vector<1x8x1xf32> to vector<1x8x12xf32>
    %232 = arith.subf %228, %231 : vector<1x8x12xf32>
    %233 = math.exp %232 : vector<1x8x12xf32>
    %cst_183 = arith.constant dense<0.000000e+00> : vector<1x8xf32>
    %234 = vector.multi_reduction <add>, %233, %cst_183 [2] : vector<1x8x12xf32> to vector<1x8xf32>
    %235 = vector.shape_cast %234 : vector<1x8xf32> to vector<1x8x1xf32>
    %236 = tpu.reciprocal %235 {approx = true} : vector<1x8x1xf32> -> vector<1x8x1xf32>
    %237 = vector.broadcast %236 : vector<1x8x1xf32> to vector<1x8x12xf32>
    %238 = arith.mulf %233, %237 : vector<1x8x12xf32>
    %239 = arith.truncf %238 : vector<1x8x12xf32> to vector<1x8x12xbf16>
    "tpu.trace_start"() <{level = 10 : i32, message = "bqk,bkd->bqd"}> : () -> ()
    %cst_184 = arith.constant dense<0.000000e+00> : vector<1x8x8xf32>
    %240 = tpu.matmul %239, %227, %cst_184 {dimension_numbers = #tpu.dot_dimension_numbers<[2], [1], [1], [2], [0, 0, 0, 1, 1, 2], [0], [0]>} : vector<1x8x12xbf16>, vector<1x12x8xbf16>, vector<1x8x8xf32> -> vector<1x8x8xf32>
    "tpu.trace_stop"() : () -> ()
    %241 = arith.truncf %240 : vector<1x8x8xf32> to vector<1x8x8xbf16>
    %c0_185 = arith.constant 0 : index
    %c0_186 = arith.constant 0 : index
    %c24_187 = arith.constant 24 : index
    %242 = vector.load %arg27[%c0_185, %c0_186, %c24_187] : memref<1x8x48xbf16, #tpu.memory_space<vmem>>, vector<1x8x8xbf16>
    tpu.vector_store %arg27[%c0_185, %c0_186, %c24_187], %241 {strides = array<i32>} : memref<1x8x48xbf16, #tpu.memory_space<vmem>>, vector<1x8x8xbf16>,
    %c0_188 = arith.constant 0 : index
    %c0_189 = arith.constant 0 : index
    %c32_190 = arith.constant 32 : index
    %243 = vector.load %arg25[%c0_188, %c0_189, %c32_190] : memref<1x8x48xbf16, #tpu.memory_space<vmem>>, vector<1x8x8xbf16>
    %c0_191 = arith.constant 0 : index
    %c0_192 = arith.constant 0 : index
    %c32_193 = arith.constant 32 : index
    %244 = vector.load %arg26[%c0_191, %c0_192, %c32_193] : memref<1x12x96xbf16, #tpu.memory_space<vmem>>, vector<1x12x8xbf16>
    %c0_194 = arith.constant 0 : index
    %c0_195 = arith.constant 0 : index
    %c80_196 = arith.constant 80 : index
    %245 = vector.load %arg26[%c0_194, %c0_195, %c80_196] : memref<1x12x96xbf16, #tpu.memory_space<vmem>>, vector<1x12x8xbf16>
    "tpu.trace_start"() <{level = 10 : i32, message = "bqd,bkd->bqk"}> : () -> ()
    %cst_197 = arith.constant dense<0.000000e+00> : vector<1x8x12xf32>
    %246 = tpu.matmul %243, %244, %cst_197 {dimension_numbers = #tpu.dot_dimension_numbers<[2], [2], [1], [1], [0, 0, 0, 1, 1, 1], [0], [0]>} : vector<1x8x8xbf16>, vector<1x12x8xbf16>, vector<1x8x12xf32> -> vector<1x8x12xf32>
    "tpu.trace_stop"() : () -> ()
    %cst_198 = arith.constant dense<0xFF800000> : vector<1x8xf32>
    %247 = vector.multi_reduction <maximumf>, %246, %cst_198 [2] : vector<1x8x12xf32> to vector<1x8xf32>
    %248 = vector.shape_cast %247 : vector<1x8xf32> to vector<1x8x1xf32>
    %249 = vector.broadcast %248 : vector<1x8x1xf32> to vector<1x8x12xf32>
    %250 = arith.subf %246, %249 : vector<1x8x12xf32>
    %251 = math.exp %250 : vector<1x8x12xf32>
    %cst_199 = arith.constant dense<0.000000e+00> : vector<1x8xf32>
    %252 = vector.multi_reduction <add>, %251, %cst_199 [2] : vector<1x8x12xf32> to vector<1x8xf32>
    %253 = vector.shape_cast %252 : vector<1x8xf32> to vector<1x8x1xf32>
    %254 = tpu.reciprocal %253 {approx = true} : vector<1x8x1xf32> -> vector<1x8x1xf32>
    %255 = vector.broadcast %254 : vector<1x8x1xf32> to vector<1x8x12xf32>
    %256 = arith.mulf %251, %255 : vector<1x8x12xf32>
    %257 = arith.truncf %256 : vector<1x8x12xf32> to vector<1x8x12xbf16>
    "tpu.trace_start"() <{level = 10 : i32, message = "bqk,bkd->bqd"}> : () -> ()
    %cst_200 = arith.constant dense<0.000000e+00> : vector<1x8x8xf32>
    %258 = tpu.matmul %257, %245, %cst_200 {dimension_numbers = #tpu.dot_dimension_numbers<[2], [1], [1], [2], [0, 0, 0, 1, 1, 2], [0], [0]>} : vector<1x8x12xbf16>, vector<1x12x8xbf16>, vector<1x8x8xf32> -> vector<1x8x8xf32>
    "tpu.trace_stop"() : () -> ()
    %259 = arith.truncf %258 : vector<1x8x8xf32> to vector<1x8x8xbf16>
    %c0_201 = arith.constant 0 : index
    %c0_202 = arith.constant 0 : index
    %c32_203 = arith.constant 32 : index
    %260 = vector.load %arg27[%c0_201, %c0_202, %c32_203] : memref<1x8x48xbf16, #tpu.memory_space<vmem>>, vector<1x8x8xbf16>
    tpu.vector_store %arg27[%c0_201, %c0_202, %c32_203], %259 {strides = array<i32>} : memref<1x8x48xbf16, #tpu.memory_space<vmem>>, vector<1x8x8xbf16>,
    %c0_204 = arith.constant 0 : index
    %c0_205 = arith.constant 0 : index
    %c40_206 = arith.constant 40 : index
    %261 = vector.load %arg25[%c0_204, %c0_205, %c40_206] : memref<1x8x48xbf16, #tpu.memory_space<vmem>>, vector<1x8x8xbf16>
    %c0_207 = arith.constant 0 : index
    %c0_208 = arith.constant 0 : index
    %c40_209 = arith.constant 40 : index
    %262 = vector.load %arg26[%c0_207, %c0_208, %c40_209] : memref<1x12x96xbf16, #tpu.memory_space<vmem>>, vector<1x12x8xbf16>
    %c0_210 = arith.constant 0 : index
    %c0_211 = arith.constant 0 : index
    %c88_212 = arith.constant 88 : index
    %263 = vector.load %arg26[%c0_210, %c0_211, %c88_212] : memref<1x12x96xbf16, #tpu.memory_space<vmem>>, vector<1x12x8xbf16>
    "tpu.trace_start"() <{level = 10 : i32, message = "bqd,bkd->bqk"}> : () -> ()
    %cst_213 = arith.constant dense<0.000000e+00> : vector<1x8x12xf32>
    %264 = tpu.matmul %261, %262, %cst_213 {dimension_numbers = #tpu.dot_dimension_numbers<[2], [2], [1], [1], [0, 0, 0, 1, 1, 1], [0], [0]>} : vector<1x8x8xbf16>, vector<1x12x8xbf16>, vector<1x8x12xf32> -> vector<1x8x12xf32>
    "tpu.trace_stop"() : () -> ()
    %cst_214 = arith.constant dense<0xFF800000> : vector<1x8xf32>
    %265 = vector.multi_reduction <maximumf>, %264, %cst_214 [2] : vector<1x8x12xf32> to vector<1x8xf32>
    %266 = vector.shape_cast %265 : vector<1x8xf32> to vector<1x8x1xf32>
    %267 = vector.broadcast %266 : vector<1x8x1xf32> to vector<1x8x12xf32>
    %268 = arith.subf %264, %267 : vector<1x8x12xf32>
    %269 = math.exp %268 : vector<1x8x12xf32>
    %cst_215 = arith.constant dense<0.000000e+00> : vector<1x8xf32>
    %270 = vector.multi_reduction <add>, %269, %cst_215 [2] : vector<1x8x12xf32> to vector<1x8xf32>
    %271 = vector.shape_cast %270 : vector<1x8xf32> to vector<1x8x1xf32>
    %272 = tpu.reciprocal %271 {approx = true} : vector<1x8x1xf32> -> vector<1x8x1xf32>
    %273 = vector.broadcast %272 : vector<1x8x1xf32> to vector<1x8x12xf32>
    %274 = arith.mulf %269, %273 : vector<1x8x12xf32>
    %275 = arith.truncf %274 : vector<1x8x12xf32> to vector<1x8x12xbf16>
    "tpu.trace_start"() <{level = 10 : i32, message = "bqk,bkd->bqd"}> : () -> ()
    %cst_216 = arith.constant dense<0.000000e+00> : vector<1x8x8xf32>
    %276 = tpu.matmul %275, %263, %cst_216 {dimension_numbers = #tpu.dot_dimension_numbers<[2], [1], [1], [2], [0, 0, 0, 1, 1, 2], [0], [0]>} : vector<1x8x12xbf16>, vector<1x12x8xbf16>, vector<1x8x8xf32> -> vector<1x8x8xf32>
    "tpu.trace_stop"() : () -> ()
    %277 = arith.truncf %276 : vector<1x8x8xf32> to vector<1x8x8xbf16>
    %c0_217 = arith.constant 0 : index
    %c0_218 = arith.constant 0 : index
    %c40_219 = arith.constant 40 : index
    %278 = vector.load %arg27[%c0_217, %c0_218, %c40_219] : memref<1x8x48xbf16, #tpu.memory_space<vmem>>, vector<1x8x8xbf16>
    tpu.vector_store %arg27[%c0_217, %c0_218, %c40_219], %277 {strides = array<i32>} : memref<1x8x48xbf16, #tpu.memory_space<vmem>>, vector<1x8x8xbf16>,
    %c0_220 = arith.constant 0 : index
    %c0_221 = arith.constant 0 : index
    %c0_222 = arith.constant 0 : index
    %279 = vector.load %arg27[%c0_220, %c0_221, %c0_222] : memref<1x8x48xbf16, #tpu.memory_space<vmem>>, vector<1x8x48xbf16>
    %280 = vector.shape_cast %279 : vector<1x8x48xbf16> to vector<8x48xbf16>
    %c0_223 = arith.constant 0 : index
    %c0_224 = arith.constant 0 : index
    %281 = vector.load %arg13[%c0_223, %c0_224] : memref<48x48xbf16, #tpu.memory_space<vmem>>, vector<48x48xbf16>
    %cst_225 = arith.constant dense<0.000000e+00> : vector<8x48xf32>
    %282 = tpu.matmul %280, %281, %cst_225 {dimension_numbers = #tpu.dot_dimension_numbers<[1], [0], [0], [1], [0, 0, 1, 1], [], []>} : vector<8x48xbf16>, vector<48x48xbf16>, vector<8x48xf32> -> vector<8x48xf32>
    %c0_226 = arith.constant 0 : index
    %c0_227 = arith.constant 0 : index
    %283 = vector.load %arg14[%c0_226, %c0_227] : memref<1x48xf32, #tpu.memory_space<vmem>>, vector<1x48xf32>
    %284 = vector.broadcast %283 : vector<1x48xf32> to vector<8x48xf32>
    %285 = arith.addf %282, %284 : vector<8x48xf32>
    %286 = arith.addf %153, %285 : vector<8x48xf32>
    %c0_228 = arith.constant 0 : index
    %c0_229 = arith.constant 0 : index
    %287 = vector.load %arg15[%c0_228, %c0_229] : memref<1x48xf32, #tpu.memory_space<vmem>>, vector<1x48xf32>
    %c0_230 = arith.constant 0 : index
    %c0_231 = arith.constant 0 : index
    %288 = vector.load %arg16[%c0_230, %c0_231] : memref<1x48xf32, #tpu.memory_space<vmem>>, vector<1x48xf32>
    %cst_232 = arith.constant dense<0.000000e+00> : vector<8xf32>
    %289 = vector.multi_reduction <add>, %286, %cst_232 [1] : vector<8x48xf32> to vector<8xf32>
    %290 = vector.shape_cast %289 : vector<8xf32> to vector<8x1xf32>
    %cst_233 = arith.constant 4.800000e+01 : f32
    %291 = vector.broadcast %cst_233 : f32 to vector<8x1xf32>
    %292 = arith.divf %290, %291 : vector<8x1xf32>
    %293 = vector.broadcast %292 : vector<8x1xf32> to vector<8x48xf32>
    %294 = arith.subf %286, %293 : vector<8x48xf32>
    %295 = arith.mulf %294, %294 : vector<8x48xf32>
    %cst_234 = arith.constant dense<0.000000e+00> : vector<8xf32>
    %296 = vector.multi_reduction <add>, %295, %cst_234 [1] : vector<8x48xf32> to vector<8xf32>
    %297 = vector.shape_cast %296 : vector<8xf32> to vector<8x1xf32>
    %cst_235 = arith.constant 4.800000e+01 : f32
    %298 = vector.broadcast %cst_235 : f32 to vector<8x1xf32>
    %299 = arith.divf %297, %298 : vector<8x1xf32>
    %300 = vector.broadcast %292 : vector<8x1xf32> to vector<8x48xf32>
    %301 = arith.subf %286, %300 : vector<8x48xf32>
    %cst_236 = arith.constant 9.99999974E-6 : f32
    %302 = vector.broadcast %cst_236 : f32 to vector<8x1xf32>
    %303 = arith.addf %299, %302 : vector<8x1xf32>
    %304 = math.rsqrt %303 : vector<8x1xf32>
    %305 = vector.broadcast %304 : vector<8x1xf32> to vector<8x48xf32>
    %306 = arith.mulf %301, %305 : vector<8x48xf32>
    %307 = vector.broadcast %287 : vector<1x48xf32> to vector<8x48xf32>
    %308 = arith.mulf %306, %307 : vector<8x48xf32>
    %309 = vector.broadcast %288 : vector<1x48xf32> to vector<8x48xf32>
    %310 = arith.addf %308, %309 : vector<8x48xf32>
    %311 = arith.truncf %310 : vector<8x48xf32> to vector<8x48xbf16>
    %c0_237 = arith.constant 0 : index
    %c0_238 = arith.constant 0 : index
    %312 = vector.load %arg17[%c0_237, %c0_238] : memref<48x64xbf16, #tpu.memory_space<vmem>>, vector<48x64xbf16>
    %cst_239 = arith.constant dense<0.000000e+00> : vector<8x64xf32>
    %313 = tpu.matmul %311, %312, %cst_239 {dimension_numbers = #tpu.dot_dimension_numbers<[1], [0], [0], [1], [0, 0, 1, 1], [], []>} : vector<8x48xbf16>, vector<48x64xbf16>, vector<8x64xf32> -> vector<8x64xf32>
    %c0_240 = arith.constant 0 : index
    %c0_241 = arith.constant 0 : index
    %314 = vector.load %arg18[%c0_240, %c0_241] : memref<1x64xf32, #tpu.memory_space<vmem>>, vector<1x64xf32>
    %315 = vector.broadcast %314 : vector<1x64xf32> to vector<8x64xf32>
    %316 = arith.addf %313, %315 : vector<8x64xf32>
    %cst_242 = arith.constant 0.000000e+00 : f32
    %317 = vector.broadcast %cst_242 : f32 to vector<8x64xf32>
    %318 = arith.maximumf %316, %317 : vector<8x64xf32>
    %319 = arith.truncf %318 : vector<8x64xf32> to vector<8x64xbf16>
    %c0_243 = arith.constant 0 : index
    %c0_244 = arith.constant 0 : index
    %320 = vector.load %arg19[%c0_243, %c0_244] : memref<64x48xbf16, #tpu.memory_space<vmem>>, vector<64x48xbf16>
    %cst_245 = arith.constant dense<0.000000e+00> : vector<8x48xf32>
    %321 = tpu.matmul %319, %320, %cst_245 {dimension_numbers = #tpu.dot_dimension_numbers<[1], [0], [0], [1], [0, 0, 1, 1], [], []>} : vector<8x64xbf16>, vector<64x48xbf16>, vector<8x48xf32> -> vector<8x48xf32>
    %c0_246 = arith.constant 0 : index
    %c0_247 = arith.constant 0 : index
    %322 = vector.load %arg20[%c0_246, %c0_247] : memref<1x48xf32, #tpu.memory_space<vmem>>, vector<1x48xf32>
    %323 = vector.broadcast %322 : vector<1x48xf32> to vector<8x48xf32>
    %324 = arith.addf %321, %323 : vector<8x48xf32>
    %325 = arith.addf %310, %324 : vector<8x48xf32>
    %c0_248 = arith.constant 0 : index
    %c0_249 = arith.constant 0 : index
    %326 = vector.load %arg21[%c0_248, %c0_249] : memref<1x48xf32, #tpu.memory_space<vmem>>, vector<1x48xf32>
    %c0_250 = arith.constant 0 : index
    %c0_251 = arith.constant 0 : index
    %327 = vector.load %arg22[%c0_250, %c0_251] : memref<1x48xf32, #tpu.memory_space<vmem>>, vector<1x48xf32>
    %cst_252 = arith.constant dense<0.000000e+00> : vector<8xf32>
    %328 = vector.multi_reduction <add>, %325, %cst_252 [1] : vector<8x48xf32> to vector<8xf32>
    %329 = vector.shape_cast %328 : vector<8xf32> to vector<8x1xf32>
    %cst_253 = arith.constant 4.800000e+01 : f32
    %330 = vector.broadcast %cst_253 : f32 to vector<8x1xf32>
    %331 = arith.divf %329, %330 : vector<8x1xf32>
    %332 = vector.broadcast %331 : vector<8x1xf32> to vector<8x48xf32>
    %333 = arith.subf %325, %332 : vector<8x48xf32>
    %334 = arith.mulf %333, %333 : vector<8x48xf32>
    %cst_254 = arith.constant dense<0.000000e+00> : vector<8xf32>
    %335 = vector.multi_reduction <add>, %334, %cst_254 [1] : vector<8x48xf32> to vector<8xf32>
    %336 = vector.shape_cast %335 : vector<8xf32> to vector<8x1xf32>
    %cst_255 = arith.constant 4.800000e+01 : f32
    %337 = vector.broadcast %cst_255 : f32 to vector<8x1xf32>
    %338 = arith.divf %336, %337 : vector<8x1xf32>
    %339 = vector.broadcast %331 : vector<8x1xf32> to vector<8x48xf32>
    %340 = arith.subf %325, %339 : vector<8x48xf32>
    %cst_256 = arith.constant 9.99999974E-6 : f32
    %341 = vector.broadcast %cst_256 : f32 to vector<8x1xf32>
    %342 = arith.addf %338, %341 : vector<8x1xf32>
    %343 = math.rsqrt %342 : vector<8x1xf32>
    %344 = vector.broadcast %343 : vector<8x1xf32> to vector<8x48xf32>
    %345 = arith.mulf %340, %344 : vector<8x48xf32>
    %346 = vector.broadcast %326 : vector<1x48xf32> to vector<8x48xf32>
    %347 = arith.mulf %345, %346 : vector<8x48xf32>
    %348 = vector.broadcast %327 : vector<1x48xf32> to vector<8x48xf32>
    %349 = arith.addf %347, %348 : vector<8x48xf32>
    %350 = vector.shape_cast %349 : vector<8x48xf32> to vector<1x8x48xf32>
    %c0_257 = arith.constant 0 : index
    %c0_258 = arith.constant 0 : index
    %c0_259 = arith.constant 0 : index
    %351 = vector.load %arg23[%c0_257, %c0_258, %c0_259] : memref<1x8x48xf32, #tpu.memory_space<vmem>>, vector<1x8x48xf32>
    tpu.vector_store %arg23[%c0_257, %c0_258, %c0_259], %350 {strides = array<i32>} : memref<1x8x48xf32, #tpu.memory_space<vmem>>, vector<1x8x48xf32>,
    return
  }
  func.func @transform_0(%arg0: i32) -> (i32, i32, i32) {
    %c0_i32 = arith.constant 0 : i32
    %c0_i32_0 = arith.constant 0 : i32
    %c0_i32_1 = arith.constant 0 : i32
    return %arg0, %c0_i32, %c0_i32_0 : i32, i32, i32
  }
  func.func @transform_1(%arg0: i32) -> (i32, i32, i32) {
    %c0_i32 = arith.constant 0 : i32
    %c0_i32_0 = arith.constant 0 : i32
    %c0_i32_1 = arith.constant 0 : i32
    return %arg0, %c0_i32, %c0_i32_0 : i32, i32, i32
  }
  func.func @transform_2(%arg0: i32) -> (i32, i32) {
    %c0_i32 = arith.constant 0 : i32
    %c0_i32_0 = arith.constant 0 : i32
    %c0_i32_1 = arith.constant 0 : i32
    return %c0_i32, %c0_i32_0 : i32, i32
  }
  func.func @transform_3(%arg0: i32) -> (i32, i32) {
    %c0_i32 = arith.constant 0 : i32
    %c0_i32_0 = arith.constant 0 : i32
    %c0_i32_1 = arith.constant 0 : i32
    return %c0_i32, %c0_i32_0 : i32, i32
  }
  func.func @transform_4(%arg0: i32) -> (i32, i32) {
    %c0_i32 = arith.constant 0 : i32
    %c0_i32_0 = arith.constant 0 : i32
    %c0_i32_1 = arith.constant 0 : i32
    return %c0_i32, %c0_i32_0 : i32, i32
  }
  func.func @transform_5(%arg0: i32) -> (i32, i32) {
    %c0_i32 = arith.constant 0 : i32
    %c0_i32_0 = arith.constant 0 : i32
    %c0_i32_1 = arith.constant 0 : i32
    return %c0_i32, %c0_i32_0 : i32, i32
  }
  func.func @transform_6(%arg0: i32) -> (i32, i32) {
    %c0_i32 = arith.constant 0 : i32
    %c0_i32_0 = arith.constant 0 : i32
    %c0_i32_1 = arith.constant 0 : i32
    return %c0_i32, %c0_i32_0 : i32, i32
  }
  func.func @transform_7(%arg0: i32) -> (i32, i32) {
    %c0_i32 = arith.constant 0 : i32
    %c0_i32_0 = arith.constant 0 : i32
    %c0_i32_1 = arith.constant 0 : i32
    return %c0_i32, %c0_i32_0 : i32, i32
  }
  func.func @transform_8(%arg0: i32) -> (i32, i32) {
    %c0_i32 = arith.constant 0 : i32
    %c0_i32_0 = arith.constant 0 : i32
    %c0_i32_1 = arith.constant 0 : i32
    return %c0_i32, %c0_i32_0 : i32, i32
  }
  func.func @transform_9(%arg0: i32) -> (i32, i32) {
    %c0_i32 = arith.constant 0 : i32
    %c0_i32_0 = arith.constant 0 : i32
    %c0_i32_1 = arith.constant 0 : i32
    return %c0_i32, %c0_i32_0 : i32, i32
  }
  func.func @transform_10(%arg0: i32) -> (i32, i32) {
    %c0_i32 = arith.constant 0 : i32
    %c0_i32_0 = arith.constant 0 : i32
    %c0_i32_1 = arith.constant 0 : i32
    return %c0_i32, %c0_i32_0 : i32, i32
  }
  func.func @transform_11(%arg0: i32) -> (i32, i32) {
    %c0_i32 = arith.constant 0 : i32
    %c0_i32_0 = arith.constant 0 : i32
    %c0_i32_1 = arith.constant 0 : i32
    return %c0_i32, %c0_i32_0 : i32, i32
  }
  func.func @transform_12(%arg0: i32) -> (i32, i32) {
    %c0_i32 = arith.constant 0 : i32
    %c0_i32_0 = arith.constant 0 : i32
    %c0_i32_1 = arith.constant 0 : i32
    return %c0_i32, %c0_i32_0 : i32, i32
  }
  func.func @transform_13(%arg0: i32) -> (i32, i32) {
    %c0_i32 = arith.constant 0 : i32
    %c0_i32_0 = arith.constant 0 : i32
    %c0_i32_1 = arith.constant 0 : i32
    return %c0_i32, %c0_i32_0 : i32, i32
  }
  func.func @transform_14(%arg0: i32) -> (i32, i32) {
    %c0_i32 = arith.constant 0 : i32
    %c0_i32_0 = arith.constant 0 : i32
    %c0_i32_1 = arith.constant 0 : i32
    return %c0_i32, %c0_i32_0 : i32, i32
  }
  func.func @transform_15(%arg0: i32) -> (i32, i32) {
    %c0_i32 = arith.constant 0 : i32
    %c0_i32_0 = arith.constant 0 : i32
    %c0_i32_1 = arith.constant 0 : i32
    return %c0_i32, %c0_i32_0 : i32, i32
  }
  func.func @transform_16(%arg0: i32) -> (i32, i32) {
    %c0_i32 = arith.constant 0 : i32
    %c0_i32_0 = arith.constant 0 : i32
    %c0_i32_1 = arith.constant 0 : i32
    return %c0_i32, %c0_i32_0 : i32, i32
  }
  func.func @transform_17(%arg0: i32) -> (i32, i32) {
    %c0_i32 = arith.constant 0 : i32
    %c0_i32_0 = arith.constant 0 : i32
    %c0_i32_1 = arith.constant 0 : i32
    return %c0_i32, %c0_i32_0 : i32, i32
  }
  func.func @transform_18(%arg0: i32) -> (i32, i32) {
    %c0_i32 = arith.constant 0 : i32
    %c0_i32_0 = arith.constant 0 : i32
    %c0_i32_1 = arith.constant 0 : i32
    return %c0_i32, %c0_i32_0 : i32, i32
  }
  func.func @transform_19(%arg0: i32) -> (i32, i32) {
    %c0_i32 = arith.constant 0 : i32
    %c0_i32_0 = arith.constant 0 : i32
    %c0_i32_1 = arith.constant 0 : i32
    return %c0_i32, %c0_i32_0 : i32, i32
  }
  func.func @transform_20(%arg0: i32) -> (i32, i32) {
    %c0_i32 = arith.constant 0 : i32
    %c0_i32_0 = arith.constant 0 : i32
    %c0_i32_1 = arith.constant 0 : i32
    return %c0_i32, %c0_i32_0 : i32, i32
  }
  func.func @transform_21(%arg0: i32) -> (i32, i32) {
    %c0_i32 = arith.constant 0 : i32
    %c0_i32_0 = arith.constant 0 : i32
    %c0_i32_1 = arith.constant 0 : i32
    return %c0_i32, %c0_i32_0 : i32, i32
  }
  func.func @transform_22(%arg0: i32) -> (i32, i32, i32) {
    %c0_i32 = arith.constant 0 : i32
    %c0_i32_0 = arith.constant 0 : i32
    %c0_i32_1 = arith.constant 0 : i32
    return %arg0, %c0_i32, %c0_i32_0 : i32, i32, i32
  }
}

</mosaic_0001>

<bundles_post_ra>
// kernel: tpu_custom_call.1
= control target key start
LH: loop header
LB: loop body
LE: loop exit
PB: predicated region body
PF: predicated region fallthrough
CT: control target
= control target key end

     0   :  { %s5332_s0 = inlined_call_operand.hbm [shape: bf16[2,8,48], index: 0, kind: input, shape index: {}]   ;;  %s5333_s1 = inlined_call_operand.vmem [shape: bf16[2,12,48], index: 1, kind: input, shape index: {}]   ;;  %s5334_s2 = inlined_call_operand.vmem [shape: bf16[48,144], index: 2, kind: input, shape index: {}]   ;;  %s5335_s3 = inlined_call_operand.hbm [shape: f32[1,144], index: 3, kind: input, shape index: {}]   ;;  %s5336_s4 = inlined_call_operand.vmem [shape: bf16[48,48], index: 4, kind: input, shape index: {}]   ;;  %s5337_s5 = inlined_call_operand.hbm [shape: f32[1,48], index: 5, kind: input, shape index: {}]   ;;  %s5338_s6 = inlined_call_operand.hbm [shape: f32[1,48], index: 6, kind: input, shape index: {}]   ;;  %s5339_s7 = inlined_call_operand.hbm [shape: f32[1,48], index: 7, kind: input, shape index: {}]   ;;  %s5340_s8 = inlined_call_operand.hbm [shape: bf16[48,48], index: 8, kind: input, shape index: {}]   ;;  %s5341_s9 = inlined_call_operand.hbm [shape: f32[1,48], index: 9, kind: input, shape index: {}]   ;;  %s5342_s10 = inlined_call_operand.vmem [shape: bf16[48,96], index: 10, kind: input, shape index: {}]   ;;  %s5343_s11 = inlined_call_operand.hbm [shape: f32[1,96], index: 11, kind: input, shape index: {}]   ;;  %s5344_s12 = inlined_call_operand.hbm [shape: bf16[48,48], index: 12, kind: input, shape index: {}]   ;;  %s5345_s13 = inlined_call_operand.hbm [shape: f32[1,48], index: 13, kind: input, shape index: {}]   ;;  %s5346_s14 = inlined_call_operand.hbm [shape: f32[1,48], index: 14, kind: input, shape index: {}]   ;;  %s5347_s15 = inlined_call_operand.hbm [shape: f32[1,48], index: 15, kind: input, shape index: {}]   ;;  %s5348_s16 = inlined_call_operand.vmem [shape: bf16[48,64], index: 16, kind: input, shape index: {}]   ;;  %s5349_s17 = inlined_call_operand.vmem [shape: f32[1,64], index: 17, kind: input, shape index: {}]   ;;  %s5350_s18 = inlined_call_operand.vmem [shape: bf16[64,48], index: 18, kind: input, shape index: {}]   ;;  %s5351_s19 = inlined_call_operand.vmem [shape: f32[1,48], index: 19, kind: input, shape index: {}]   ;;  %s5352_s20 = inlined_call_operand.vmem [shape: f32[1,48], index: 20, kind: input, shape index: {}]   ;;  %s5353_s21 = inlined_call_operand.vmem [shape: f32[1,48], index: 21, kind: input, shape index: {}]   ;;  %s5354_s22 = inlined_call_operand.hbm [shape: f32[2,8,48], index: 22, kind: output, shape index: {}]  }
   0x1   :  { %5395 = sst [smem:[#allocation36_spill]] %s5332_s0 }
   0x2   :  { %5396 = sst [smem:[#allocation37_spill]] %s5333_s1 }
   0x3   :  { %5397 = sst [smem:[#allocation38_spill]] %s5334_s2 }
   0x4   :  { %5398 = sst [smem:[#allocation39_spill]] %s5335_s3 }
   0x5   :  { %5399 = sst [smem:[#allocation40_spill]] %s5336_s4 }
   0x6   :  { %5400 = sst [smem:[#allocation41_spill]] %s5337_s5 }
   0x7   :  { %5401 = sst [smem:[#allocation42_spill]] %s5338_s6 }
   0x8   :  { %5402 = sst [smem:[#allocation43_spill]] %s5339_s7 }
   0x9   :  { %5403 = sst [smem:[#allocation44_spill]] %s5340_s8 }
   0xa   :  { %5404 = sst [smem:[#allocation45_spill]] %s5341_s9 }
   0xb   :  { %5405 = sst [smem:[#allocation46_spill]] %s5342_s10 }
   0xc   :  { %5406 = sst [smem:[#allocation47_spill]] %s5343_s11 }
   0xd   :  { %5407 = sst [smem:[#allocation48_spill]] %s5344_s12 }
   0xe   :  { %5408 = sst [smem:[#allocation49_spill]] %s5348_s16 }
   0xf   :  { %5409 = sst [smem:[#allocation50_spill]] %s5349_s17 }
  0x10   :  { %5410 = sst [smem:[#allocation51_spill]] %s5350_s18 }
  0x11   :  { %5411 = sst [smem:[#allocation52_spill]] %s5351_s19 }
  0x12   :  { %5412 = sst [smem:[#allocation53_spill]] %s5352_s20 }
  0x13   :  { %5413 = sst [smem:[#allocation54_spill]] %s5353_s21 }
  0x14   :  { %5414 = sst [smem:[#allocation55_spill]] %s5354_s22 }
  0x15   :  { %27 = vsyncpa [#allocation7], 0 }
  0x16   :  { %29 = vsyncpa [#allocation7 + $0x1], 0 }
  0x17   :  { %30 = vsyncpa [#allocation10], 0 }
  0x18   :  { %31 = vsyncpa [#allocation13], 0 }
  0x19   :  { %32 = vsyncpa [#allocation16], 0 }
  0x1a   :  { %33 = vsyncpa [#allocation19], 0 }
  0x1b   :  { %34 = vsyncpa [#allocation22], 0 }
  0x1c   :  { %35 = vsyncpa [#allocation25], 0 }
  0x1d   :  { %36 = vsyncpa [#allocation8], 0 }
  0x1e   :  { %38 = vsyncpa [#allocation8 + $0x1], 0  ;;  %s4529_s3 = smov 0   ;;  %s4531_s28 = smov 0  }
  0x1f   :  { %s4533_s29 = smov 0   ;;  %s4535_s30 = smov 0  }
  0x20 LB: > { %s4381_s4 = smov [#allocation9]   ;;  %s4550_s23 = sadd.s32 4294967295, %s4379_s30   ;;  %s4379_s30 = sphi %s4535_s30, %s5479_s30   ;;  %s4375_s29 = sphi %s4533_s29, %s5478_s29   ;;  %s4371_s28 = sphi %s4531_s28, %s5477_s28   ;;  %s4367_s3 = sphi %s4529_s3, %s5476_s3  }
  0x21   : > { %s563_s0 = sshll.u32 %s4381_s4, 4  ;;  %p3243_p0 = scmp.ge.s32.totalorder %s4379_s30, 1  ;;  %s564_s0 = int_to_ptr.vmem [resolvable:$true] %s563_s0 }
  0x22   : > { %p5362_p1 = scmp.eq.s32.totalorder %s4550_s23, 0  ;;  %p547_p2 = scmp.lt.s32.totalorder %s4379_s30, 3 }
  0x23   : > { %s4382_s5 = smov [#allocation12]   ;;  %s4383_s6 = smov [#allocation15]  }
  0x24   : > { %p4555_p3 = pnand %p3243_p0, %p547_p2  ;;  %s588_s24 = sshll.u32 %s4382_s5, 4  ;;  %s4562_s24 = int_to_ptr.vmem [resolvable:$true] %s588_s24 }
  0x25   : > { %s609_s25 = sshll.u32 %s4383_s6, 4  ;;  %s5418_s4 = sld [smem:[#allocation39_spill]]  ;;  %s4570_s25 = int_to_ptr.vmem [resolvable:$true] %s609_s25 }
  0x26   : > { %s5415_s1 = scalar_select %p4555_p3, 1, 0 }
  0x27   : > { %p3720_p5 = pneg %p4555_p3 }
  0x28   : > { %5416 = sst [smem:[#allocation35_spill]] %s5415_s1 }
  0x29   : > { %p4566_p6 = pnand %p3720_p5, %p5362_p1 }
  0x2b   : > { %s3951_s22 = scalar_lea.hbm %s5418_s4, 32  ;;  %p4580_p8 = pneg %p4566_p6 }
  0x2c   : > { %p3952_p7 = scmp.ne.s32.totalorder %s5418_s4, %s3951_s22  ;;  %p3958_p11 = scmp.lt.u32.totalorder %s3951_s22, %s5418_s4 }
  0x2e   : > { %p3954_p9 = pnand %p4580_p8, %p3952_p7 }
  0x30   : > { %p3955_p10 = pneg %p3954_p9 }
  0x32   : > { %p3960_p12 = pnand %p3958_p11, %p3955_p10 }
  0x34   : > { %3963 = shalt.err (!%p3960_p12)
}
  0x35   : > { %s3964_s2 = scalar_lea.vmem %s564_s0, 32  ;;  %p3972_p5 = scmp.lt.s32.totalorder %s564_s0, %s564_s0 }
  0x36   : > { %p3965_p13 = scmp.ne.s32.totalorder %s564_s0, %s3964_s2  ;;  %p3973_p4 = scmp.lt.s32.totalorder %s3964_s2, %s3964_s2 }
  0x38   : > { %p3967_p0 = pnand %p3965_p13, %p4580_p8  ;;  %p3974_p1 = por %p3973_p4, %p3972_p5 }
  0x3a   : > { %p3968_p2 = pneg %p3967_p0 }
  0x3c   : > { %p3975_p3 = pnand %p3974_p1, %p3968_p2 }
  0x3e   : > { %3978 = shalt.err (!%p3975_p3)
}
  0x3f   : > { %3723 = dma.hbm_to_vmem [thread:$0]  (!%p4566_p6), %s5418_s4, 32, %s564_s0, [#allocation10]  }
  0x40   : > { %s5420_s27 = sld [smem:[#allocation42_spill]] }
  0x46   : > { %s3979_s6 = scalar_lea.hbm %s5420_s27, 16 }
  0x47   : > { %p3980_p7 = scmp.ne.s32.totalorder %s5420_s27, %s3979_s6  ;;  %p3986_p1 = scmp.lt.u32.totalorder %s3979_s6, %s5420_s27 }
  0x49   : > { %p3982_p9 = pnand %p3980_p7, %p4580_p8 }
  0x4b   : > { %p3983_p4 = pneg %p3982_p9 }
  0x4d   : > { %p3988_p3 = pnand %p3986_p1, %p3983_p4 }
  0x4f   : > { %3991 = shalt.err (!%p3988_p3)
}
  0x50   : > { %s3992_s0 = scalar_lea.vmem %s4562_s24, 16  ;;  %s3999_s17 = scalar_lea.vmem %s4562_s24, 32 }
  0x51   : > { %p3993_p10 = scmp.ne.s32.totalorder %s4562_s24, %s3992_s0  ;;  %p4000_p13 = scmp.lt.s32.totalorder %s4562_s24, %s4562_s24 }
  0x52   : > { %p4001_p0 = scmp.lt.s32.totalorder %s3999_s17, %s3992_s0 }
  0x53   : > { %p3995_p11 = pnand %p3993_p10, %p4580_p8 }
  0x54   : > { %p4002_p2 = por %p4001_p0, %p4000_p13 }
  0x55   : > { %p3996_p12 = pneg %p3995_p11 }
  0x57   : > { %p4003_p5 = pnand %p4002_p2, %p3996_p12 }
  0x59   : > { %4006 = shalt.err (!%p4003_p5)
}
  0x5a   : > { %3729 = dma.hbm_to_vmem [thread:$0]  (!%p4566_p6), %s5420_s27, 16, %s4562_s24, [#allocation13]  }
  0x5b   : > { %s5421_s8 = sld [smem:[#allocation44_spill]] }
  0x61   : > { %s4007_s19 = scalar_lea.hbm %s5421_s8, 384 }
  0x62   : > { %p4008_p7 = scmp.ne.s32.totalorder %s5421_s8, %s4007_s19  ;;  %p4014_p1 = scmp.lt.u32.totalorder %s4007_s19, %s5421_s8 }
  0x64   : > { %p4010_p9 = pnand %p4008_p7, %p4580_p8 }
  0x66   : > { %p4011_p4 = pneg %p4010_p9 }
  0x68   : > { %p4016_p3 = pnand %p4014_p1, %p4011_p4 }
  0x6a   : > { %4019 = shalt.err (!%p4016_p3)
}
  0x6b   : > { %s4020_s24 = scalar_lea.vmem %s4570_s25, 384  ;;  %p4028_p13 = scmp.lt.s32.totalorder %s4570_s25, %s4570_s25 }
  0x6c   : > { %p4021_p10 = scmp.ne.s32.totalorder %s4570_s25, %s4020_s24  ;;  %p4029_p0 = scmp.lt.s32.totalorder %s4020_s24, %s4020_s24 }
  0x6e   : > { %p4023_p11 = pnand %p4021_p10, %p4580_p8  ;;  %p4030_p2 = por %p4029_p0, %p4028_p13 }
  0x70   : > { %p4024_p12 = pneg %p4023_p11 }
  0x72   : > { %p4031_p5 = pnand %p4030_p2, %p4024_p12 }
  0x74   : > { %4034 = shalt.err (!%p4031_p5)
}
  0x75   : > { %s4384_s17 = smov 64   ;;  %s4385_s16 = smov 4  }
  0x76   : > { %3735 = dma.hbm_to_vmem [thread:$0]  (!%p4566_p6), %s5421_s8, 384, %s4570_s25, [#allocation16], %s4384_s17, %s4384_s17, %s4385_s16  }
  0x77   : > { %s4386_s21 = smov [#allocation18]   ;;  %s4387_s22 = smov [#allocation21]  }
  0x78   : > { %s637_s19 = sshll.u32 %s4386_s21, 4  ;;  %s661_s6 = sshll.u32 %s4387_s22, 4  ;;  %s638_s19 = int_to_ptr.vmem [resolvable:$true] %s637_s19  ;;  %s662_s6 = int_to_ptr.vmem [resolvable:$true] %s661_s6 }
  0x79   : > { %s5422_s11 = sld [smem:[#allocation47_spill]] }
  0x7f   : > { %s4035_s24 = scalar_lea.hbm %s5422_s11, 16 }
  0x80   : > { %p4036_p7 = scmp.ne.s32.totalorder %s5422_s11, %s4035_s24  ;;  %p4042_p1 = scmp.lt.u32.totalorder %s4035_s24, %s5422_s11 }
  0x82   : > { %p4038_p9 = pnand %p4036_p7, %p4580_p8 }
  0x84   : > { %p4039_p4 = pneg %p4038_p9 }
  0x86   : > { %p4044_p3 = pnand %p4042_p1, %p4039_p4 }
  0x88   : > { %4047 = shalt.err (!%p4044_p3)
}
  0x89   : > { %s4048_s25 = scalar_lea.vmem %s638_s19, 16  ;;  %s4055_s18 = scalar_lea.vmem %s638_s19, 32 }
  0x8a   : > { %p4049_p10 = scmp.ne.s32.totalorder %s638_s19, %s4048_s25  ;;  %p4056_p13 = scmp.lt.s32.totalorder %s638_s19, %s638_s19 }
  0x8b   : > { %p4057_p0 = scmp.lt.s32.totalorder %s4055_s18, %s4048_s25 }
  0x8c   : > { %p4051_p11 = pnand %p4049_p10, %p4580_p8 }
  0x8d   : > { %p4058_p2 = por %p4057_p0, %p4056_p13 }
  0x8e   : > { %p4052_p12 = pneg %p4051_p11 }
  0x90   : > { %p4059_p5 = pnand %p4058_p2, %p4052_p12 }
  0x92   : > { %4062 = shalt.err (!%p4059_p5)
}
  0x93   : > { %3741 = dma.hbm_to_vmem [thread:$0]  (!%p4566_p6), %s5422_s11, 16, %s638_s19, [#allocation19]  }
  0x94   : > { %s4063_s20 = scalar_lea.hbm %s5345_s13, 16 }
  0x95   : > { %p4064_p7 = scmp.ne.s32.totalorder %s5345_s13, %s4063_s20  ;;  %p4070_p1 = scmp.lt.u32.totalorder %s4063_s20, %s5345_s13 }
  0x97   : > { %p4066_p9 = pnand %p4064_p7, %p4580_p8 }
  0x99   : > { %p4067_p4 = pneg %p4066_p9 }
  0x9b   : > { %p4072_p3 = pnand %p4070_p1, %p4067_p4 }
  0x9d   : > { %4075 = shalt.err (!%p4072_p3)
}
  0x9e   : > { %s4076_s24 = scalar_lea.vmem %s662_s6, 16  ;;  %s4083_s19 = scalar_lea.vmem %s662_s6, 32 }
  0x9f   : > { %p4077_p10 = scmp.ne.s32.totalorder %s662_s6, %s4076_s24  ;;  %p4084_p13 = scmp.lt.s32.totalorder %s662_s6, %s662_s6 }
  0xa0   : > { %p4085_p0 = scmp.lt.s32.totalorder %s4083_s19, %s4076_s24 }
  0xa1   : > { %p4079_p11 = pnand %p4077_p10, %p4580_p8 }
  0xa2   : > { %p4086_p2 = por %p4085_p0, %p4084_p13 }
  0xa3   : > { %p4080_p12 = pneg %p4079_p11 }
  0xa5   : > { %p4087_p5 = pnand %p4086_p2, %p4080_p12 }
  0xa7   : > { %4090 = shalt.err (!%p4087_p5)
}
  0xa8   : > { %3747 = dma.hbm_to_vmem [thread:$0]  (!%p4566_p6), %s5345_s13, 16, %s662_s6, [#allocation22]  }
  0xa9   : > { %s4388_s4 = smov [#allocation11]   ;;  %s4389_s10 = smov [#allocation14]  }
  0xaa   : > { %s577_s27 = sshll.u32 %s4388_s4, 4  ;;  %s599_s1 = sshll.u32 %s4389_s10, 4  ;;  %s578_s27 = int_to_ptr.vmem [resolvable:$true] %s577_s27  ;;  %s600_s1 = int_to_ptr.vmem [resolvable:$true] %s599_s1 }
  0xab   : > { %s5423_s22 = sld [smem:[#allocation41_spill]] }
  0xb1   : > { %s4091_s2 = scalar_lea.hbm %s5423_s22, 16 }
  0xb2   : > { %p4092_p7 = scmp.ne.s32.totalorder %s5423_s22, %s4091_s2  ;;  %p4098_p1 = scmp.lt.u32.totalorder %s4091_s2, %s5423_s22 }
  0xb4   : > { %p4094_p9 = pnand %p4092_p7, %p4580_p8 }
  0xb6   : > { %p4095_p4 = pneg %p4094_p9 }
  0xb8   : > { %p4100_p3 = pnand %p4098_p1, %p4095_p4 }
  0xba   : > { %4103 = shalt.err (!%p4100_p3)
}
  0xbb   : > { %s4104_s6 = scalar_lea.vmem %s578_s27, 16  ;;  %s4111_s18 = scalar_lea.vmem %s578_s27, 32 }
  0xbc   : > { %p4105_p10 = scmp.ne.s32.totalorder %s578_s27, %s4104_s6  ;;  %p4112_p13 = scmp.lt.s32.totalorder %s578_s27, %s578_s27 }
  0xbd   : > { %p4113_p0 = scmp.lt.s32.totalorder %s4111_s18, %s4104_s6 }
  0xbe   : > { %p4107_p11 = pnand %p4105_p10, %p4580_p8 }
  0xbf   : > { %p4114_p2 = por %p4113_p0, %p4112_p13 }
  0xc0   : > { %p4108_p12 = pneg %p4107_p11 }
  0xc2   : > { %p4115_p5 = pnand %p4114_p2, %p4108_p12 }
  0xc4   : > { %4118 = shalt.err (!%p4115_p5)
}
  0xc5   : > { %3726 = dma.hbm_to_vmem [thread:$0]  (!%p4566_p6), %s5423_s22, 16, %s578_s27, [#allocation10]  }
  0xc6   : > { %s5424_s7 = sld [smem:[#allocation43_spill]] }
  0xcc   : > { %s4119_s2 = scalar_lea.hbm %s5424_s7, 16 }
  0xcd   : > { %p4120_p7 = scmp.ne.s32.totalorder %s5424_s7, %s4119_s2  ;;  %p4126_p1 = scmp.lt.u32.totalorder %s4119_s2, %s5424_s7 }
  0xcf   : > { %p4122_p9 = pnand %p4120_p7, %p4580_p8 }
  0xd1   : > { %p4123_p4 = pneg %p4122_p9 }
  0xd3   : > { %p4128_p3 = pnand %p4126_p1, %p4123_p4 }
  0xd5   : > { %4131 = shalt.err (!%p4128_p3)
}
  0xd6   : > { %s4132_s6 = scalar_lea.vmem %s600_s1, 16  ;;  %s4139_s27 = scalar_lea.vmem %s600_s1, 32 }
  0xd7   : > { %p4133_p10 = scmp.ne.s32.totalorder %s600_s1, %s4132_s6  ;;  %p4140_p13 = scmp.lt.s32.totalorder %s600_s1, %s600_s1 }
  0xd8   : > { %p4141_p0 = scmp.lt.s32.totalorder %s4139_s27, %s4132_s6 }
  0xd9   : > { %p4135_p11 = pnand %p4133_p10, %p4580_p8 }
  0xda   : > { %p4142_p2 = por %p4141_p0, %p4140_p13 }
  0xdb   : > { %p4136_p12 = pneg %p4135_p11 }
  0xdd   : > { %p4143_p5 = pnand %p4142_p2, %p4136_p12 }
  0xdf   : > { %4146 = shalt.err (!%p4143_p5)
}
  0xe0   : > { %3732 = dma.hbm_to_vmem [thread:$0]  (!%p4566_p6), %s5424_s7, 16, %s600_s1, [#allocation13]  }
  0xe1   : > { %s4390_s10 = smov [#allocation17]   ;;  %s4391_s21 = smov [#allocation20]  }
  0xe2   : > { %s623_s20 = sshll.u32 %s4390_s10, 4  ;;  %s647_s2 = sshll.u32 %s4391_s21, 4  ;;  %s624_s20 = int_to_ptr.vmem [resolvable:$true] %s623_s20  ;;  %s648_s2 = int_to_ptr.vmem [resolvable:$true] %s647_s2 }
  0xe3   : > { %s5425_s9 = sld [smem:[#allocation45_spill]] }
  0xe9   : > { %s4147_s19 = scalar_lea.hbm %s5425_s9, 16 }
  0xea   : > { %p4148_p7 = scmp.ne.s32.totalorder %s5425_s9, %s4147_s19  ;;  %p4154_p1 = scmp.lt.u32.totalorder %s4147_s19, %s5425_s9 }
  0xec   : > { %p4150_p9 = pnand %p4148_p7, %p4580_p8 }
  0xee   : > { %p4151_p4 = pneg %p4150_p9 }
  0xf0   : > { %p4156_p3 = pnand %p4154_p1, %p4151_p4 }
  0xf2   : > { %4159 = shalt.err (!%p4156_p3)
}
  0xf3   : > { %s4160_s1 = scalar_lea.vmem %s624_s20, 16  ;;  %s4167_s4 = scalar_lea.vmem %s624_s20, 32 }
  0xf4   : > { %p4161_p10 = scmp.ne.s32.totalorder %s624_s20, %s4160_s1  ;;  %p4168_p13 = scmp.lt.s32.totalorder %s624_s20, %s624_s20 }
  0xf5   : > { %p4169_p0 = scmp.lt.s32.totalorder %s4167_s4, %s4160_s1 }
  0xf6   : > { %p4163_p11 = pnand %p4161_p10, %p4580_p8 }
  0xf7   : > { %p4170_p2 = por %p4169_p0, %p4168_p13 }
  0xf8   : > { %p4164_p12 = pneg %p4163_p11 }
  0xfa   : > { %p4171_p5 = pnand %p4170_p2, %p4164_p12 }
  0xfc   : > { %4174 = shalt.err (!%p4171_p5)
}
  0xfd   : > { %3738 = dma.hbm_to_vmem [thread:$0]  (!%p4566_p6), %s5425_s9, 16, %s624_s20, [#allocation16]  }
  0xfe   : > { %s5426_s12 = sld [smem:[#allocation48_spill]] }
 0x104   : > { %s4175_s19 = scalar_lea.hbm %s5426_s12, 384 }
 0x105   : > { %p4176_p7 = scmp.ne.s32.totalorder %s5426_s12, %s4175_s19  ;;  %p4182_p1 = scmp.lt.u32.totalorder %s4175_s19, %s5426_s12 }
 0x107   : > { %p4178_p9 = pnand %p4176_p7, %p4580_p8 }
 0x109   : > { %p4179_p4 = pneg %p4178_p9 }
 0x10b   : > { %p4184_p3 = pnand %p4182_p1, %p4179_p4 }
 0x10d   : > { %4187 = shalt.err (!%p4184_p3)
}
 0x10e   : > { %s4188_s1 = scalar_lea.vmem %s648_s2, 384  ;;  %p4196_p13 = scmp.lt.s32.totalorder %s648_s2, %s648_s2 }
 0x10f   : > { %p4189_p10 = scmp.ne.s32.totalorder %s648_s2, %s4188_s1  ;;  %p4197_p0 = scmp.lt.s32.totalorder %s4188_s1, %s4188_s1 }
 0x111   : > { %p4191_p11 = pnand %p4189_p10, %p4580_p8  ;;  %p4198_p2 = por %p4197_p0, %p4196_p13 }
 0x113   : > { %p4192_p12 = pneg %p4191_p11 }
 0x115   : > { %p4199_p5 = pnand %p4198_p2, %p4192_p12 }
 0x117   : > { %4202 = shalt.err (!%p4199_p5)
}
 0x118   : > { %3744 = dma.hbm_to_vmem [thread:$0]  (!%p4566_p6), %s5426_s12, 384, %s648_s2, [#allocation19], %s4384_s17, %s4384_s17, %s4385_s16  }
 0x119   : > { %s4392_s10 = smov [#allocation23]   ;;  %s4393_s0 = smov [#allocation24]  }
 0x11a   : > { %s672_s21 = sshll.u32 %s4392_s10, 4  ;;  %s683_s24 = sshll.u32 %s4393_s0, 4  ;;  %s673_s21 = int_to_ptr.vmem [resolvable:$true] %s672_s21  ;;  %s684_s24 = int_to_ptr.vmem [resolvable:$true] %s683_s24 }
 0x11b   : > { %s4203_s6 = scalar_lea.hbm %s5346_s14, 16 }
 0x11c   : > { %p4204_p7 = scmp.ne.s32.totalorder %s5346_s14, %s4203_s6  ;;  %p4210_p1 = scmp.lt.u32.totalorder %s4203_s6, %s5346_s14 }
 0x11e   : > { %p4206_p9 = pnand %p4204_p7, %p4580_p8 }
 0x120   : > { %p4207_p4 = pneg %p4206_p9 }
 0x122   : > { %p4212_p3 = pnand %p4210_p1, %p4207_p4 }
 0x124   : > { %4215 = shalt.err (!%p4212_p3)
}
 0x125   : > { %s4216_s17 = scalar_lea.vmem %s673_s21, 16  ;;  %s4223_s16 = scalar_lea.vmem %s673_s21, 32 }
 0x126   : > { %p4217_p10 = scmp.ne.s32.totalorder %s673_s21, %s4216_s17  ;;  %p4224_p13 = scmp.lt.s32.totalorder %s673_s21, %s673_s21 }
 0x127   : > { %p4225_p0 = scmp.lt.s32.totalorder %s4223_s16, %s4216_s17 }
 0x128   : > { %p4219_p11 = pnand %p4217_p10, %p4580_p8 }
 0x129   : > { %p4226_p2 = por %p4225_p0, %p4224_p13 }
 0x12a   : > { %p4220_p12 = pneg %p4219_p11 }
 0x12c   : > { %p4227_p5 = pnand %p4226_p2, %p4220_p12 }
 0x12e   : > { %4230 = shalt.err (!%p4227_p5)
}
 0x12f   : > { %3750 = dma.hbm_to_vmem [thread:$0]  (!%p4566_p6), %s5346_s14, 16, %s673_s21, [#allocation22]  }
 0x130   : > { %s4231_s19 = scalar_lea.hbm %s5347_s15, 16 }
 0x131   : > { %p4232_p7 = scmp.ne.s32.totalorder %s5347_s15, %s4231_s19  ;;  %p4238_p1 = scmp.lt.u32.totalorder %s4231_s19, %s5347_s15 }
 0x133   : > { %p4234_p9 = pnand %p4232_p7, %p4580_p8 }
 0x135   : > { %p4235_p4 = pneg %p4234_p9 }
 0x137   : > { %p4240_p3 = pnand %p4238_p1, %p4235_p4 }
 0x139   : > { %4243 = shalt.err (!%p4240_p3)
}
 0x13a   : > { %s4244_s1 = scalar_lea.vmem %s684_s24, 16  ;;  %s4251_s21 = scalar_lea.vmem %s684_s24, 32 }
 0x13b   : > { %p4245_p10 = scmp.ne.s32.totalorder %s684_s24, %s4244_s1  ;;  %p4252_p13 = scmp.lt.s32.totalorder %s684_s24, %s684_s24 }
 0x13c   : > { %p4253_p0 = scmp.lt.s32.totalorder %s4251_s21, %s4244_s1 }
 0x13d   : > { %p4247_p11 = pnand %p4245_p10, %p4580_p8 }
 0x13e   : > { %p4254_p2 = por %p4253_p0, %p4252_p13 }
 0x13f   : > { %p4248_p12 = pneg %p4247_p11 }
 0x141   : > { %p4255_p5 = pnand %p4254_p2, %p4248_p12 }
 0x143   : > { %4258 = shalt.err (!%p4255_p5)
}
 0x144   : > { %3753 = dma.hbm_to_vmem [thread:$0]  (!%p4566_p6), %s5347_s15, 16, %s684_s24, [#allocation25]  }
 0x145   : > { %s3242_s5 = sadd.s32 4294967294, %s4379_s30   ;;  %s4795_s26 = sadd.s32 1, %s4379_s30  }
 0x146   : > { %s51_s16 = sadd.s32 1, %s4375_s29  ;;  %s48_s2 = ssub.s32 %s4379_s30, %s4795_s26 }
 0x147   : > { %p58_p8 = scmp.ne.s32.totalorder %s4375_s29, %s4371_s28  ;;  %p49_p7 = scmp.eq.s32.totalorder %s48_s2, 0 }
 0x148   : > { %p59_p9 = scmp.eq.s32.totalorder %s4379_s30, 0  ;;  %p64_p4 = scmp.ne.s32.totalorder %s4371_s28, %s4367_s3 }
 0x149   : > { %p534_p1 = scmp.eq.s32.totalorder %s4550_s23, 1  ;;  %p5427_p10 = scmp.eq.s32.totalorder %s4550_s23, 0 }
 0x14a   : > { %s4807_s4 = scalar_select %p49_p7, %s4375_s29, %s51_s16  }
 0x14b   : > { %p60_p3 = por %p59_p9, %p58_p8  ;;  %p4811_p11 = por %p5427_p10, %p64_p4 }
 0x14c   : > { %p4815_p6 = por %p534_p1, %p58_p8  ;;  %p540_p12 = scmp.eq.s32.totalorder %s3242_s5, 1 }
 0x14d   : > { %p3773_p13 = scmp.lt.s32.totalorder %s4379_s30, 2  ;;  %s712_s0 = sand.u32 1, %s4375_s29  }
 0x14e   : > { %s5429_s24 = scalar_select %p4815_p6, 1, 0 }
 0x14f   : > { %p4821_p0 = por %p540_p12, %p64_p4  ;;  %s3256_s25 = sshll.u32 %s712_s0, 2 }
 0x150   : > { %s3257_s6 = sshll.u32 %s4379_s30, 6  ;;  %s5431_s1 = sld [smem:[#allocation36_spill]] }
 0x151   : > { %s5430_s19 = scalar_select %p4821_p0, 1, 0 }
 0x152   : > { %s716_s20 = scalar_lea.vmem [#allocation6], %s3256_s25  ;;  %p4831_p2 = pnand %p3773_p13, %p60_p3 }
 0x153   : > { %s723_s17 = sshll.u32 %s716_s20, 4  ;;  %s713_s16 = scalar_lea.sflag [#allocation7], %s712_s0  ;;  %s4835_s17 = int_to_ptr.vmem [resolvable:$true] %s723_s17 }
 0x154   : > { %p4261_p8 = pneg %p4831_p2 }
 0x156   : > { %s4829_s21 = scalar_lea.hbm %s5431_s1, %s3257_s6  ;;  %s4264_s27 = scalar_lea.hbm %s5431_s1, 128 }
 0x157   : > { %s4259_s2 = scalar_lea.hbm %s4829_s21, 64  ;;  %p4265_p4 = scmp.lt.u32.totalorder %s4829_s21, %s5431_s1 }
 0x158   : > { %p4260_p5 = scmp.ne.s32.totalorder %s4829_s21, %s4259_s2  ;;  %p4266_p1 = scmp.lt.u32.totalorder %s4264_s27, %s4259_s2 }
 0x159   : > { %p4268_p10 = scmp.lt.u32.totalorder %s4259_s2, %s4829_s21 }
 0x15a   : > { %p4262_p7 = pnand %p4261_p8, %p4260_p5  ;;  %p4267_p3 = por %p4266_p1, %p4265_p4 }
 0x15c   : > { %p4263_p9 = pneg %p4262_p7  ;;  %p4269_p12 = por %p4268_p10, %p4267_p3 }
 0x15e   : > { %p4270_p13 = pnand %p4269_p12, %p4263_p9 }
 0x160   : > { %4273 = shalt.err (!%p4270_p13)
}
 0x161   : > { %s4274_s0 = scalar_lea.vmem %s4835_s17, 64  ;;  %s4394_s6 = smov [#allocation6]  }
 0x162   : > { %p4275_p5 = scmp.ne.s32.totalorder %s4835_s17, %s4274_s0  ;;  %s4279_s25 = sshll.u32 %s4394_s6, 4  ;;  %s4280_s25 = int_to_ptr.vmem [resolvable:$false] %s4279_s25 }
 0x163   : > { %s4281_s18 = scalar_lea.vmem %s4280_s25, 128  ;;  %p4282_p6 = scmp.lt.s32.totalorder %s4835_s17, %s4280_s25 }
 0x164   : > { %p4277_p7 = pnand %p4275_p5, %p4261_p8  ;;  %p4283_p4 = scmp.lt.s32.totalorder %s4281_s18, %s4274_s0 }
 0x166   : > { %p4278_p0 = pneg %p4277_p7  ;;  %p4284_p1 = por %p4283_p4, %p4282_p6 }
 0x168   : > { %p4285_p3 = pnand %p4284_p1, %p4278_p0 }
 0x16a   : > { %4288 = shalt.err (!%p4285_p3)
}
 0x16b   : > { %3757 = dma.hbm_to_vmem [thread:$0]  (!%p4831_p2), %s4829_s21, 64, %s4835_s17, %s713_s16  }
 0x16c   : > { %s5433_s2 = sld [smem:[#allocation35_spill]] }
 0x172   : > { %p5434_p9 = scmp.ne.s32.totalorder %s5433_s2, 0 }
 0x173   : > { %s4865_s27 = sand.u32 (!%p5434_p9), 1, %s4371_s28  }
 0x174   : > { %740 = sbr.rel (%p5434_p9) target bundleno = 4814 (0x12ce), region = 108  ;;  %s3259_s20 = sshll.u32 (!%p5434_p9), %s4865_s27, 2 }
 0x175   : > { %s743_s6 = scalar_lea.sflag (!%p5434_p9), [#allocation7], %s4865_s27  ;;  %s746_s0 = scalar_lea.vmem (!%p5434_p9), [#allocation6], %s3259_s20 }
 0x17b   : > { %4334 = dma.done.wait (%p4811_p11), %s743_s6, 64  }
 0x17c   : > { %4336 = vsyncadd (%p4811_p11), %s743_s6, 4294967232  ;;  %p5435_p6 = scmp.eq.s32.totalorder %s4550_s23, 0 }
 0x17e   : > { %4338 = dma.done.wait (%p5435_p6), [#allocation10], 48   ;;  %p5436_p0 = pmov %p5435_p6 }
 0x180   : > { %4340 = vsyncadd (%p5436_p0), [#allocation10], 4294967248  ;;  %p5437_p2 = pmov %p5436_p0 }
 0x181   : > { %p5438_p8 = pmov %p5436_p0 }
 0x182   : > { %4342 = dma.done.wait (%p5437_p2), [#allocation13], 32  }
 0x183   : > { %4344 = vsyncadd (%p5438_p8), [#allocation13], 4294967264  ;;  %p5439_p10 = pmov %p5436_p0 }
 0x184   : > { %p5440_p12 = pmov %p5436_p0 }
 0x185   : > { %4346 = dma.done.wait (%p5439_p10), [#allocation16], 400  }
 0x186   : > { %4348 = vsyncadd (%p5440_p12), [#allocation16], 4294966896  ;;  %p5441_p11 = pmov %p5436_p0 }
 0x187   : > { %p5442_p13 = pmov %p5436_p0 }
 0x188   : > { %4350 = dma.done.wait (%p5441_p11), [#allocation19], 400  }
 0x189   : > { %4352 = vsyncadd (%p5442_p13), [#allocation19], 4294966896  ;;  %p5443_p5 = pmov %p5436_p0 }
 0x18a   : > { %p5444_p7 = pmov %p5436_p0 }
 0x18b   : > { %4354 = dma.done.wait (%p5443_p5), [#allocation22], 32  }
 0x18c   : > { %4356 = vsyncadd (%p5444_p7), [#allocation22], 4294967264  ;;  %p5445_p4 = pmov %p5436_p0 }
 0x18d   : > { %p5446_p1 = pmov %p5436_p0 }
 0x18e   : > { %4358 = dma.done.wait (%p5445_p4), [#allocation25], 16  }
 0x18f   : > { %4360 = vsyncadd (%p5446_p1), [#allocation25], 4294967280  ;;  %v4395_v0 = vmov 0   ;;  %s5447_s17 = sld [smem:[#allocation38_spill]]  ;;  %vm915_vm0 = vcmask 392192   ;;  %v875_v9 = vlaneseq  ;;  %vm968_vm1 = vcmask 1043456  }
 0x190   : > { %951 = vmatprep.mubr.bf16.mxu0 %v4395_v0  ;;  %v4915_v7 = vld [vmem:[%s746_s0] sm:$0xf]  ;;  %v873_v12 = vld [vmem:[#allocation9] sm:$0x3]  ;;  %vm969_vm2 = vcmask 130052   ;;  %v4396_v22 = vmov 0.0  }
 0x191   : > { %v3274_v8 = vcombine.low %v4915_v7, %v4915_v7  ;;  %v876_v10 = vshrl.u32 %v875_v9, 7  ;;  %vm970_vm3 = vmor %vm969_vm2, %vm968_vm1  ;;  %3466 = vmatprep.subr.bf16.mxu1 %v4396_v22  ;;  %vm4397_vm4 = vmmov 0   ;;  %s5391_s1 = smov 120   ;;  %s5375_s0 = smov 80   ;;  %vm978_vm5 = vcmask 64512  }
 0x192   : > { %3468 = vmatprep.mubr.msk.bf16.mxu1 %vm4397_vm4, %v4396_v22  ;;  %s5374_s5 = smov 64   ;;  %s5376_s16 = smov 72   ;;  %vm1086_vm6 = vcmask 60416   ;;  %vm1209_vm7 = vcmask 126016   ;;  %vm1332_vm8 = vcmask 191616   ;;  %vm1455_vm9 = vcmask 257216  }
 0x193   : > { %v877_v11 = vsub.s32 0, %v876_v10  ;;  %v881_v13 = vsub.s32 1, %v876_v10  ;;  %s5373_s25 = smov 56   ;;  %s5382_s18 = smov 112   ;;  %vm1577_vm10 = vcmask 322816   ;;  %vm1704_vm11 = vcmask 388416  }
 0x194   : > { %s5372_s2 = smov 48   ;;  %s5385_s20 = smov 104   ;;  %vm1978_vm12 = vcmask 781312   ;;  %vm1980_vm13 = vcmask 779264   ;;  %vm1888_vm14 = vcmask 388096   ;;  %vm2036_vm15 = vcmask 97280  }
 0x195   : > { %v3849_v1 = vld [vmem:[%s5447_s17 + $0x4] ss:$8 sps:$4 sm:$0xff]   ;;  %v3851_v2 = vld [vmem:[%s5447_s17] ss:$8 sps:$4 sm:$0xff]   ;;  %v3852_v3 = vld [vmem:[%s5447_s17 + $0x14] ss:$8 sps:$4 sm:$0xff]   ;;  %v878_v14 = vrot.slane %v873_v12, %v877_v11  ;;  %v882_v15 = vrot.slane %v873_v12, %v881_v13 }
 0x196   : > { %919 = vmatprep.subr.bf16.mxu0 %v3849_v1  ;;  %v3854_v4 = vld [vmem:[%s5447_s17 + $0x10] ss:$8 sps:$4 sm:$0xff]   ;;  %v3855_v5 = vld [vmem:[%s5447_s17 + $0x24] ss:$8 sps:$4 sm:$0xff]   ;;  %v3857_v6 = vld [vmem:[%s5447_s17 + $0x20] ss:$8 sps:$4 sm:$0xff]  }
 0x197   : > { %920 = vmatpush1.bf16.msra.mxu0 %v3851_v2  ;;  %s5389_s6 = smov 40   ;;  %s5379_s10 = smov 96   ;;  %vm2966_vm2 = vcmask 523264  }
 0x198   : > { %921 = vmatprep.subr.bf16.mxu0 %v3852_v3  ;;  %s5377_s21 = smov 88   ;;  %p856_p3 = scmp.lt.s32.totalorder %s4550_s23, 1 }
 0x199   : > { %s5472_s11 = sld [smem:[#allocation55_spill]]  ;;  %p5473_p6 = scmp.ne.s32.totalorder %s5429_s24, 0 }
 0x19b   : > { %922 = vmatpush1.bf16.msra.mxu0 %v3854_v4 }
 0x19c   : > { %923 = vmatprep.subr.bf16.mxu0 %v3855_v5 }
 0x19f   : > { %924 = vmatpush1.bf16.msra.mxu0 %v3857_v6 }
 0x1a0   : > { %3478 = vmatprep.subr.bf16.mxu0 %v4396_v22 }
 0x1a2   : > { %3281 = vmatmul.mubr.msk.bf16.vlgmr.msra.gmra.mrb[0].mxu0 %vm915_vm0, %v3274_v8 }
 0x1a3   : > { %3480 = vmatprep.mubr.msk.bf16.mxu0 %vm4397_vm4, %v4396_v22 }
 0x275   : > { %v953_v16 = vpop.f32.mrb[0].mxu0 }
 0x276   : > { %v954_v17 = vadd.f32 %v953_v16, %v878_v14  ;;  %v955_v18 = vpop.f32.mrb[1].mxu0 }
 0x277   : > { %v956_v19 = vadd.f32 %v955_v18, %v882_v15  ;;  %v957_v20 = vpop.f32.mrb[2].mxu0 }
 0x278   : > { %v958_v21 = vpop.f32.mrb[3].mxu0 }
 0x279   : > { %v3380_v23 = vpack.c.bf16 %v956_v19, %v954_v17 }
 0x27b   : > { %971 = vst.msk [vmem:[#allocation2] sm:$0xff] %vm970_vm3, %v3380_v23 }
 0x282   : > { %v4927_v24 = vld [vmem:[#allocation2] ss:$0 sps:$4 sm:$0xff]  }
 0x283   : > { %v972_v25 = vld [vmem:[#allocation2] sm:$0xf]  ;;  %1092 = vrot.lane.b32.xlu1 %v4927_v24, %s5391_s1 }
 0x284   : > { %v4929_v26 = vcombine.low %v972_v25, %v972_v25  ;;  %v4935_v27 = vld [vmem:[#allocation2] ss:$0 sps:$4 sm:$0xff]  }
 0x285   : > { %v4941_v28 = vld [vmem:[#allocation2] ss:$0 sps:$4 sm:$0xff]  }
 0x286   : > { %976 = vrot.lane.b32.xlu0 %v4929_v26, %s5375_s0  ;;  %v3863_v29 = vld [vmem:[#allocation2] ss:$0 sps:$4 sm:$0xff]   ;;  %s5381_s0 = smov 8  }
 0x287   : > { %1217 = vrot.lane.b32.xlu1 %v4935_v27, %s5374_s5  ;;  %v3864_v30 = vld [vmem:[#allocation2] ss:$0 sps:$4 sm:$0xff]   ;;  %s5384_s5 = smov 16  }
 0x28a   : > { %1094 = vrot.lane.b32.xlu0 %v4927_v24, %s5376_s16  ;;  %s5449_s16 = sld [smem:[#allocation46_spill]] }
 0x28b   : > { %1340 = vrot.lane.b32.xlu1 %v4941_v28, %s5373_s25  ;;  %s5387_s25 = smov 32  }
 0x28e   : > { %1215 = vrot.lane.b32.xlu0 %v4935_v27, %s5382_s18  ;;  %s5456_s18 = smov 72  }
 0x28f   : > { %1464 = vrot.lane.b32.xlu1 %v3863_v29, %s5372_s2  ;;  %s5388_s2 = smov 24  }
 0x292   : > { %1338 = vrot.lane.b32.xlu0 %v4941_v28, %s5385_s20  ;;  %s5457_s20 = smov 80  }
 0x293   : > { %1586 = vrot.lane.b32.xlu1 %v3864_v30, %s5389_s6 }
 0x296   : > { %1462 = vrot.lane.b32.xlu0 %v3863_v29, %s5379_s10  ;;  %s5448_s10 = sld [smem:[#allocation40_spill]] }
 0x29a   : > { %1584 = vrot.lane.b32.xlu0 %v3864_v30, %s5377_s21  ;;  %s857_s21 = scalar_select %p856_p3, %s4550_s23, 1 }
 0x2f5   : > { %v1093_v33 = vpop.permute.xlu1 %1092 }
 0x2f8   : > { %v977_v31 = vpop.permute.xlu0 %976 }
 0x2f9   : > { %v983_v32 = vsel %vm978_vm5, %v977_v31, 0  ;;  %v1218_v36 = vpop.permute.xlu1 %1217 }
 0x2fa   : > { %3467 = vmatpush3.bf16.xpose.msra.mxu1 %v983_v32  ;;  %v1223_v37 = vsel %vm978_vm5, %v1218_v36, 0 }
 0x2fb   : > { %3472 = vmatprep.subr.bf16.mxu1 %v4396_v22 }
 0x2fc   : > { %v1095_v34 = vpop.permute.xlu0 %1094 }
 0x2fd   : > { %v1100_v35 = vsel %vm978_vm5, %v1095_v34, 0  ;;  %v1341_v38 = vpop.permute.xlu1 %1340 }
 0x2fe   : > { %3479 = vmatpush3.bf16.xpose.msra.mxu0 %v1100_v35  ;;  %v1346_v40 = vsel %vm978_vm5, %v1341_v38, 0 }
 0x2ff   : > { %3490 = vmatprep.subr.bf16.mxu0 %v4396_v22 }
 0x300   : > { %v1216_v39 = vpop.permute.xlu0 %1215 }
 0x301   : > { %3469 = vmatmul.mubr.msk.bf16.vlgmr.msra.gmra.mrb[0].mxu1 %vm978_vm5, %v972_v25  ;;  %v1465_v41 = vpop.permute.xlu1 %1464 }
 0x302   : > { %3474 = vmatprep.mubr.msk.bf16.mxu1 %vm4397_vm4, %v4396_v22  ;;  %v1470_v43 = vsel %vm978_vm5, %v1465_v41, 0 }
 0x304   : > { %v1339_v42 = vpop.permute.xlu0 %1338 }
 0x305   : > { %3481 = vmatmul.mubr.msk.bf16.vlgmr.msra.gmra.mrb[4].mxu0 %vm978_vm5, %v1093_v33  ;;  %v1587_v44 = vpop.permute.xlu1 %1586 }
 0x306   : > { %3491 = vmatpush3.bf16.xpose.msra.mxu0 %v1223_v37  ;;  %3492 = vmatprep.mubr.msk.bf16.mxu0 %vm4397_vm4, %v4396_v22  ;;  %v1592_v46 = vsel %vm978_vm5, %v1587_v44, 0 }
 0x307   : > { %3502 = vmatprep.subr.bf16.mxu0 %v4396_v22 }
 0x308   : > { %v1463_v45 = vpop.permute.xlu0 %1462 }
 0x30c   : > { %v1585_v47 = vpop.permute.xlu0 %1584 }
 0x30d   : > { %3493 = vmatmul.mubr.msk.bf16.vlgmr.msra.gmra.mrb[8].mxu0 %vm978_vm5, %v1216_v39 }
 0x30e   : > { %3503 = vmatpush3.bf16.xpose.msra.mxu0 %v1346_v40  ;;  %3504 = vmatprep.mubr.msk.bf16.mxu0 %vm4397_vm4, %v4396_v22 }
 0x30f   : > { %3514 = vmatprep.subr.bf16.mxu0 %v4396_v22 }
 0x315   : > { %3505 = vmatmul.mubr.msk.bf16.vlgmr.msra.gmra.mrb[12].mxu0 %vm978_vm5, %v1339_v42 }
 0x316   : > { %3515 = vmatpush3.bf16.xpose.msra.mxu0 %v1470_v43  ;;  %3516 = vmatprep.mubr.msk.bf16.mxu0 %vm4397_vm4, %v4396_v22 }
 0x317   : > { %3526 = vmatprep.subr.bf16.mxu0 %v4396_v22 }
 0x31d   : > { %3517 = vmatmul.mubr.msk.bf16.vlgmr.msra.gmra.mrb[16].mxu0 %vm978_vm5, %v1463_v45 }
 0x31e   : > { %3527 = vmatpush3.bf16.xpose.msra.mxu0 %v1592_v46  ;;  %3528 = vmatprep.mubr.msk.bf16.mxu0 %vm4397_vm4, %v4396_v22 }
 0x31f   : > { %3538 = vmatprep.subr.bf16.mxu0 %v4396_v22 }
 0x325   : > { %3529 = vmatmul.mubr.msk.bf16.vlgmr.msra.gmra.mrb[20].mxu0 %vm978_vm5, %v1585_v47 }
 0x326   : > { %3544 = vmatprep.mubr.msk.bf16.mxu0 %vm4397_vm4, %v4396_v22 }
 0x3d4   : > { %v1019_v48 = vpop.f32.mrb[0].mxu1 }
 0x3d5   : > { %v3470_v49 = vpop.f32.mrb[1].mxu1  ;;  %v1025_v50 = vsel %vm978_vm5, %v1019_v48, -inf }
 0x3d6   : > { %1026 = vmax.xlane.f32.xlu1 %v1025_v50  ;;  %v1022_v51 = vpop.f32.mrb[2].mxu1 }
 0x3d7   : > { %v3471_v52 = vpop.f32.mrb[3].mxu1 }
 0x3d8   : > { %v1136_v53 = vpop.f32.mrb[4].mxu0 }
 0x3d9   : > { %v3482_v54 = vpop.f32.mrb[5].mxu0  ;;  %v1142_v55 = vsel %vm978_vm5, %v1136_v53, -inf }
 0x3da   : > { %1143 = vmax.xlane.f32.xlu0 %v1142_v55  ;;  %v1139_v56 = vpop.f32.mrb[6].mxu0 }
 0x3db   : > { %v3483_v57 = vpop.f32.mrb[7].mxu0 }
 0x3e0   : > { %v1259_v58 = vpop.f32.mrb[8].mxu0 }
 0x3e1   : > { %v3494_v59 = vpop.f32.mrb[9].mxu0  ;;  %v1265_v60 = vsel %vm978_vm5, %v1259_v58, -inf }
 0x3e2   : > { %1266 = vmax.xlane.f32.xlu0 %v1265_v60  ;;  %v1262_v61 = vpop.f32.mrb[10].mxu0 }
 0x3e3   : > { %v3495_v62 = vpop.f32.mrb[11].mxu0 }
 0x3e8   : > { %v1382_v63 = vpop.f32.mrb[12].mxu0 }
 0x3e9   : > { %v3506_v0 = vpop.f32.mrb[13].mxu0  ;;  %v1388_v1 = vsel %vm978_vm5, %v1382_v63, -inf }
 0x3ea   : > { %1389 = vmax.xlane.f32.xlu1 %v1388_v1  ;;  %v1385_v2 = vpop.f32.mrb[14].mxu0 }
 0x3eb   : > { %v3507_v3 = vpop.f32.mrb[15].mxu0 }
 0x3f0   : > { %v1506_v4 = vpop.f32.mrb[16].mxu0 }
 0x3f1   : > { %v3518_v5 = vpop.f32.mrb[17].mxu0  ;;  %v1512_v6 = vsel %vm978_vm5, %v1506_v4, -inf }
 0x3f2   : > { %1513 = vmax.xlane.f32.xlu0 %v1512_v6  ;;  %v1509_v8 = vpop.f32.mrb[18].mxu0 }
 0x3f3   : > { %v3519_v9 = vpop.f32.mrb[19].mxu0 }
 0x3f4   : > { %v1458_v9 = vld [vmem:[#allocation2 + $0x4] sm:$0xf] }
 0x3f8   : > { %v1628_v10 = vpop.f32.mrb[20].mxu0 }
 0x3f9   : > { %v3530_v11 = vpop.f32.mrb[21].mxu0  ;;  %v1634_v12 = vsel %vm978_vm5, %v1628_v10, -inf }
 0x3fa   : > { %1635 = vmax.xlane.f32.xlu1 %v1634_v12  ;;  %v1631_v13 = vpop.f32.mrb[22].mxu0  ;;  %v1528_v12 = vsel %vm968_vm1, %v1458_v9, 0 }
 0x3fb   : > { %v3531_v14 = vpop.f32.mrb[23].mxu0 }
 0x463   : > { %v1027_v15 = vpop.xlane.xlu1 %1026 }
 0x464   : > { %v1028_v16 = vsub.f32 %v1019_v48, %v1027_v15  ;;  %v3865_v48 = vld [vmem:[#allocation2 + $0x4] ss:$0 sps:$4 sm:$0xff]  }
 0x466   : > { %v1029_v17 = vmul.f32 1.442695, %v1028_v16 }
 0x467   : > { %v1144_v18 = vpop.xlane.xlu0 %1143 }
 0x468   : > { %3897 = vpow2.f32 %v1029_v17  ;;  %v1145_v19 = vsub.f32 %v1136_v53, %v1144_v18 }
 0x46a   : > { %v1146_v20 = vmul.f32 1.442695, %v1145_v19 }
 0x46c   : > { %3899 = vpow2.f32 %v1146_v20 }
 0x46f   : > { %v1267_v21 = vpop.xlane.xlu0 %1266 }
 0x470   : > { %v1268_v23 = vsub.f32 %v1259_v58, %v1267_v21 }
 0x472   : > { %v3898_v25 = vpop.eup %3897  ;;  %v1269_v29 = vmul.f32 1.442695, %v1268_v23 }
 0x473   : > { %v1031_v30 = vsel %vm978_vm5, %v3898_v25, 0.0 }
 0x474   : > { %3901 = vpow2.f32 %v1269_v29  ;;  %1032 = vadd.xlane.f32.xlu0 %v1031_v30 }
 0x476   : > { %v3900_v31 = vpop.eup %3899 }
 0x477   : > { %v1148_v32 = vsel %vm978_vm5, %v3900_v31, 0.0  ;;  %v1390_v35 = vpop.xlane.xlu1 %1389 }
 0x478   : > { %1149 = vadd.xlane.f32.xlu1 %v1148_v32  ;;  %v1391_v36 = vsub.f32 %v1382_v63, %v1390_v35 }
 0x47a   : > { %v1392_v38 = vmul.f32 1.442695, %v1391_v36 }
 0x47c   : > { %3903 = vpow2.f32 %v1392_v38 }
 0x47e   : > { %v3902_v33 = vpop.eup %3901 }
 0x47f   : > { %v1271_v34 = vsel %vm978_vm5, %v3902_v33, 0.0  ;;  %v1514_v37 = vpop.xlane.xlu0 %1513 }
 0x480   : > { %1272 = vadd.xlane.f32.xlu0 %v1271_v34  ;;  %v1515_v39 = vsub.f32 %v1506_v4, %v1514_v37 }
 0x482   : > { %v1516_v41 = vmul.f32 1.442695, %v1515_v39 }
 0x484   : > { %3905 = vpow2.f32 %v1516_v41 }
 0x486   : > { %v3904_v44 = vpop.eup %3903 }
 0x487   : > { %v1636_v40 = vpop.xlane.xlu1 %1635  ;;  %v1394_v45 = vsel %vm978_vm5, %v3904_v44, 0.0 }
 0x488   : > { %v1637_v42 = vsub.f32 %v1628_v10, %v1636_v40  ;;  %v3866_v40 = vld [vmem:[%s5448_s10] sm:$0xff]  }
 0x489   : > { %1154 = vrot.lane.b32.xlu1 %v4927_v24, %s5388_s2  ;;  %3539 = vmatpush3.bf16.msra.mxu0 %v3866_v40 }
 0x48a   : > { %v1638_v43 = vmul.f32 1.442695, %v1637_v42  ;;  %3540 = vmatprep.subr.bf16.mxu0 %v4396_v22 }
 0x48c   : > { %3907 = vpow2.f32 %v1638_v43 }
 0x48e   : > { %v4997_v24 = vpop.eup %3905 }
 0x496   : > { %1037 = vrot.lane.b32.xlu0 %v4929_v26, %s5387_s25  ;;  %v1518_v26 = vsel %vm978_vm5, %v4997_v24, 0.0  ;;  %v5001_v46 = vpop.eup %3907 }
 0x497   : > { %v1640_v47 = vsel %vm978_vm5, %v5001_v46, 0.0 }
 0x4ad   : > { %1395 = vadd.xlane.f32.xlu1 %v1394_v45 }
 0x4b1   : > { %1519 = vadd.xlane.f32.xlu1 %v1518_v26 }
 0x4b5   : > { %1641 = vadd.xlane.f32.xlu0 %v1640_v47 }
 0x4c2   : > { %1277 = vrot.lane.b32.xlu1 %v4935_v27, %s5384_s5 }
 0x4c6   : > { %1400 = vrot.lane.b32.xlu1 %v4941_v28, %s5381_s0 }
 0x4ca   : > { %1649 = vrot.lane.b32.xlu1 %v3865_v48, %s5391_s1  ;;  %s5450_s1 = sld [smem:[#allocation37_spill]] }
 0x501   : > { %v1033_v49 = vpop.xlane.xlu0 %1032 }
 0x502   : > { %3909 = vrcp.f32 %v1033_v49 }
 0x505   : > { %v1150_v50 = vpop.xlane.xlu1 %1149 }
 0x506   : > { %3911 = vrcp.f32 %v1150_v50 }
 0x509   : > { %v1155_v56 = vpop.permute.xlu1 %1154 }
 0x50a   : > { %v1160_v28 = vsel %vm968_vm1, %v1155_v56, 0 }
 0x50c   : > { %v3910_v51 = vpop.eup %3909 }
 0x50d   : > { %v1273_v52 = vpop.xlane.xlu0 %1272  ;;  %v1035_v53 = vmul.f32 %v3910_v51, %v3898_v25 }
 0x50e   : > { %3913 = vrcp.f32 %v1273_v52 }
 0x50f   : > { %v1036_v27 = vpack.c.bf16 %v1035_v53, %v1035_v53 }
 0x510   : > { %v3912_v57 = vpop.eup %3911 }
 0x511   : > { %v1038_v54 = vpop.permute.xlu0 %1037  ;;  %v1152_v58 = vmul.f32 %v3912_v57, %v3900_v31 }
 0x512   : > { %v1043_v55 = vsel %vm968_vm1, %v1038_v54, 0 }
 0x513   : > { %3473 = vmatpush3.bf16.msra.mxu1 %v1043_v55  ;;  %v1153_v59 = vpack.c.bf16 %v1152_v58, %v1152_v58 }
 0x514   : > { %3484 = vmatprep.subr.bf16.mxu1 %v4396_v22 }
 0x516   : > { %3475 = vmatmul.mubr.msk.bf16.vlgmr.msra.gmra.mrb[4].mxu1 %vm978_vm5, %v1036_v27 }
 0x517   : > { %3485 = vmatpush3.bf16.msra.mxu1 %v1160_v28  ;;  %3486 = vmatprep.mubr.msk.bf16.mxu1 %vm4397_vm4, %v4396_v22 }
 0x518   : > { %3496 = vmatprep.subr.bf16.mxu1 %v4396_v22  ;;  %v3914_v61 = vpop.eup %3913 }
 0x519   : > { %v1275_v63 = vmul.f32 %v3914_v61, %v3902_v33  ;;  %v863_v61 = vunpack.c.l.bf16 %v4915_v7 }
 0x51b   : > { %v1276_v2 = vpack.c.bf16 %v1275_v63, %v1275_v63 }
 0x51e   : > { %3487 = vmatmul.mubr.msk.bf16.vlgmr.msra.gmra.mrb[8].mxu1 %vm978_vm5, %v1153_v59 }
 0x51f   : > { %3498 = vmatprep.mubr.msk.bf16.mxu1 %vm4397_vm4, %v4396_v22 }
 0x53a   : > { %v1396_v60 = vpop.xlane.xlu1 %1395 }
 0x53b   : > { %3915 = vrcp.f32 %v1396_v60  ;;  %v3307_v60 = vld [vmem:[#allocation11] ss:$0 sm:$0xff] }
 0x53e   : > { %v1520_v62 = vpop.xlane.xlu1 %1519 }
 0x53f   : > { %3917 = vrcp.f32 %v1520_v62 }
 0x542   : > { %v1278_v0 = vpop.permute.xlu1 %1277  ;;  %v1642_v8 = vpop.xlane.xlu0 %1641 }
 0x543   : > { %v1283_v1 = vsel %vm968_vm1, %v1278_v0, 0  ;;  %3919 = vrcp.f32 %v1642_v8 }
 0x544   : > { %3497 = vmatpush3.bf16.msra.mxu1 %v1283_v1 }
 0x545   : > { %3508 = vmatprep.subr.bf16.mxu1 %v4396_v22  ;;  %v3916_v3 = vpop.eup %3915 }
 0x546   : > { %v1401_v4 = vpop.permute.xlu1 %1400  ;;  %v1398_v6 = vmul.f32 %v3916_v3, %v3904_v44 }
 0x547   : > { %v1406_v5 = vsel %vm968_vm1, %v1401_v4, 0  ;;  %3499 = vmatmul.mubr.msk.bf16.vlgmr.msra.gmra.mrb[12].mxu1 %vm978_vm5, %v1276_v2 }
 0x548   : > { %3509 = vmatpush3.bf16.msra.mxu1 %v1406_v5  ;;  %3510 = vmatprep.mubr.msk.bf16.mxu1 %vm4397_vm4, %v4396_v22  ;;  %v1399_v10 = vpack.c.bf16 %v1398_v6, %v1398_v6  ;;  %v3869_v5 = vld [vmem:[%s5449_s16] sm:$0xff]  }
 0x549   : > { %3520 = vmatprep.subr.bf16.mxu1 %v4396_v22  ;;  %v3918_v11 = vpop.eup %3917 }
 0x54a   : > { %v1522_v13 = vmul.f32 %v3918_v11, %v4997_v24  ;;  %v1650_v14 = vpop.permute.xlu1 %1649  ;;  %v3867_v24 = vld [vmem:[%s5448_s10 + $0x8] sm:$0xff]  }
 0x54b   : > { %v1655_v17 = vsel %vm968_vm1, %v1650_v14, 0  ;;  %3541 = vmatpush3.bf16.msra.mxu0 %v3867_v24  ;;  %v3870_v11 = vld [vmem:[%s5449_s16 + $0x8] sm:$0xff]   ;;  %vm2054_vm1 = vcmask 1045504  }
 0x54c   : > { %v1523_v15 = vpack.c.bf16 %v1522_v13, %v1522_v13  ;;  %3542 = vmatprep.subr.bf16.mxu0 %v4396_v22  ;;  %v3873_v14 = vld [vmem:[#allocation15] sm:$0xff]  }
 0x54d   : > { %v3920_v16 = vpop.eup %3919 }
 0x54e   : > { %v1644_v18 = vmul.f32 %v3920_v16, %v5001_v46  ;;  %v3868_v46 = vld [vmem:[%s5448_s10 + $0x10] sm:$0xff]   ;;  %v3875_v16 = vld [vmem:[#allocation15 + $0x10] sm:$0xff]  }
 0x54f   : > { %3511 = vmatmul.mubr.msk.bf16.vlgmr.msra.gmra.mrb[16].mxu1 %vm978_vm5, %v1399_v10  ;;  %3543 = vmatpush3.bf16.msra.mxu0 %v3868_v46 }
 0x550   : > { %3521 = vmatpush3.bf16.msra.mxu1 %v1528_v12  ;;  %3522 = vmatprep.mubr.msk.bf16.mxu1 %vm4397_vm4, %v4396_v22  ;;  %v1645_v19 = vpack.c.bf16 %v1644_v18, %v1644_v18  ;;  %v3871_v12 = vld [vmem:[%s5449_s16 + $0x10] sm:$0xff]  }
 0x551   : > { %3532 = vmatprep.subr.bf16.mxu1 %v4396_v22  ;;  %3558 = vmatprep.subr.bf16.mxu0 %v4396_v22 }
 0x557   : > { %3523 = vmatmul.mubr.msk.bf16.vlgmr.msra.gmra.mrb[20].mxu1 %vm978_vm5, %v1523_v15  ;;  %v3874_v15 = vld [vmem:[#allocation15 + $0x8] sm:$0xff]  }
 0x558   : > { %3533 = vmatpush3.bf16.msra.mxu1 %v1655_v17  ;;  %3534 = vmatprep.mubr.msk.bf16.mxu1 %vm4397_vm4, %v4396_v22 }
 0x559   : > { %3548 = vmatprep.subr.bf16.mxu1 %v4396_v22 }
 0x55f   : > { %3535 = vmatmul.mubr.msk.bf16.vlgmr.msra.gmra.mrb[24].mxu1 %vm978_vm5, %v1645_v19 }
 0x560   : > { %3554 = vmatprep.mubr.msk.bf16.mxu1 %vm4397_vm4, %v4396_v22  ;;  %3549 = vmatpush3.bf16.msra.mxu1 %v3873_v14 }
 0x561   : > { %3550 = vmatprep.subr.bf16.mxu1 %v4396_v22 }
 0x564   : > { %3551 = vmatpush3.bf16.msra.mxu1 %v3874_v15 }
 0x565   : > { %3552 = vmatprep.subr.bf16.mxu1 %v4396_v22 }
 0x568   : > { %3553 = vmatpush3.bf16.msra.mxu1 %v3875_v16 }
 0x569   : > { %3568 = vmatprep.subr.bf16.mxu1 %v4396_v22 }
 0x5e9   : > { %v1079_v20 = vpop.f32.mrb[4].mxu1 }
 0x5ea   : > { %v1085_v21 = vpack.c.bf16 %v1079_v20, %v1079_v20  ;;  %v3476_v23 = vpop.f32.mrb[5].mxu1 }
 0x5eb   : > { %v1082_v25 = vpop.f32.mrb[6].mxu1 }
 0x5ec   : > { %1087 = vst.msk [vmem:[#allocation5] sm:$0xf] %vm1086_vm6, %v1085_v21  ;;  %v3477_v29 = vpop.f32.mrb[7].mxu1  ;;  %v3312_v21 = vld [vmem:[#allocation12] ss:$0 sm:$0xff] }
 0x5ed   : > { %v3313_v25 = vld [vmem:[#allocation14] ss:$0 sm:$0xff] }
 0x5f1   : > { %v1196_v30 = vpop.f32.mrb[8].mxu1 }
 0x5f2   : > { %v3381_v31 = vpack.c.bf16 %v1196_v30, %v1196_v30  ;;  %v3488_v32 = vpop.f32.mrb[9].mxu1 }
 0x5f3   : > { %v1199_v33 = vpop.f32.mrb[10].mxu1  ;;  %v3319_v32 = vld [vmem:[#allocation18] ss:$0 sm:$0xff] }
 0x5f4   : > { %1206 = vrot.lane.b32.xlu1 %v3381_v31, %s5381_s0  ;;  %v3489_v34 = vpop.f32.mrb[11].mxu1  ;;  %s5459_s0 = smov 56  }
 0x61a   : > { %v1319_v35 = vpop.f32.mrb[12].mxu1 }
 0x61b   : > { %v3382_v36 = vpack.c.bf16 %v1319_v35, %v1319_v35  ;;  %v3500_v37 = vpop.f32.mrb[13].mxu1 }
 0x61c   : > { %v1322_v38 = vpop.f32.mrb[14].mxu1 }
 0x61d   : > { %1329 = vrot.lane.b32.xlu1 %v3382_v36, %s5384_s5  ;;  %v3501_v39 = vpop.f32.mrb[15].mxu1  ;;  %s5460_s5 = smov 48  }
 0x622   : > { %v1442_v41 = vpop.f32.mrb[16].mxu1 }
 0x623   : > { %v3383_v42 = vpack.c.bf16 %v1442_v41, %v1442_v41  ;;  %v3512_v43 = vpop.f32.mrb[17].mxu1 }
 0x624   : > { %v1445_v44 = vpop.f32.mrb[18].mxu1 }
 0x625   : > { %1452 = vrot.lane.b32.xlu1 %v3383_v42, %s5388_s2  ;;  %v3513_v45 = vpop.f32.mrb[19].mxu1  ;;  %s5454_s2 = smov 96  }
 0x626   : > { %v3314_v45 = vld [vmem:[#allocation17] ss:$0 sm:$0xff] }
 0x62a   : > { %v1564_v26 = vpop.f32.mrb[20].mxu1 }
 0x62b   : > { %v3384_v47 = vpack.c.bf16 %v1564_v26, %v1564_v26  ;;  %v3524_v48 = vpop.f32.mrb[21].mxu1 }
 0x62c   : > { %v1567_v49 = vpop.f32.mrb[22].mxu1 }
 0x62d   : > { %1574 = vrot.lane.b32.xlu1 %v3384_v47, %s5387_s25  ;;  %v3525_v50 = vpop.f32.mrb[23].mxu1  ;;  %s3379_s25 = sshll.u32 %s857_s21, 3  ;;  %s5458_s21 = smov 64  }
 0x62e   : > { %s860_s7 = scalar_lea.vmem %s5450_s1, %s3379_s25  ;;  %s5452_s1 = smov 104  }
 0x62f   : > { %v3872_v13 = vld [vmem:[%s860_s7] sm:$0x3f]   ;;  %s5451_s7 = smov 120   ;;  %s5453_s25 = smov 112  }
 0x632   : > { %v1691_v51 = vpop.f32.mrb[24].mxu1 }
 0x633   : > { %v3385_v52 = vpack.c.bf16 %v1691_v51, %v1691_v51  ;;  %v3536_v53 = vpop.f32.mrb[25].mxu1 }
 0x634   : > { %v1694_v54 = vpop.f32.mrb[26].mxu1 }
 0x635   : > { %1701 = vrot.lane.b32.xlu1 %v3385_v52, %s5389_s6  ;;  %v3537_v55 = vpop.f32.mrb[27].mxu1  ;;  %s5455_s6 = smov 88  }
 0x666   : > { %v1207_v56 = vpop.permute.xlu1 %1206 }
 0x667   : > { %1210 = vst.msk [vmem:[#allocation5] sm:$0xf] %vm1209_vm7, %v1207_v56 }
 0x68f   : > { %v1330_v27 = vpop.permute.xlu1 %1329 }
 0x690   : > { %1333 = vst.msk [vmem:[#allocation5] sm:$0xf] %vm1332_vm8, %v1330_v27 }
 0x697   : > { %v1453_v57 = vpop.permute.xlu1 %1452 }
 0x698   : > { %1456 = vst.msk [vmem:[#allocation5] sm:$0xf] %vm1455_vm9, %v1453_v57 }
 0x69f   : > { %v1575_v28 = vpop.permute.xlu1 %1574 }
 0x6a0   : > { %1578 = vst.msk [vmem:[#allocation5] sm:$0xf] %vm1577_vm10, %v1575_v28 }
 0x6a7   : > { %v1702_v58 = vpop.permute.xlu1 %1701 }
 0x6a8   : > { %1705 = vst.msk [vmem:[#allocation5] sm:$0xf] %vm1704_vm11, %v1702_v58 }
 0x6af   : > { %v1706_v59 = vld [vmem:[#allocation5] sm:$0xf] }
 0x6b0   : > { %3545 = vmatmul.mubr.msk.bf16.vlgmr.msra.gmra.mrb[24].mxu0 %vm915_vm0, %v1706_v59 }
 0x6b1   : > { %3564 = vmatprep.mubr.msk.bf16.mxu0 %vm4397_vm4, %v4396_v22  ;;  %3559 = vmatpush3.bf16.msra.mxu0 %v3869_v5 }
 0x6b2   : > { %3560 = vmatprep.subr.bf16.mxu0 %v4396_v22 }
 0x6b5   : > { %3561 = vmatpush3.bf16.msra.mxu0 %v3870_v11 }
 0x6b6   : > { %3562 = vmatprep.subr.bf16.mxu0 %v4396_v22 }
 0x6b9   : > { %3563 = vmatpush3.bf16.msra.mxu0 %v3871_v12 }
 0x6ba   : > { %3574 = vmatprep.subr.bf16.mxu0 %v4396_v22 }
 0x6bc   : > { %3565 = vmatmul.mubr.msk.bf16.vlgmr.msra.gmra.mrb[28].mxu0 %vm915_vm0, %v3872_v13 }
 0x6bd   : > { %3576 = vmatprep.mubr.msk.bf16.mxu0 %vm4397_vm4, %v4396_v22 }
 0x783   : > { %v1775_v62 = vpop.f32.mrb[24].mxu0 }
 0x784   : > { %v1776_v63 = vadd.f32 %v3307_v60, %v1775_v62  ;;  %v3546_v0 = vpop.f32.mrb[25].mxu0 }
 0x785   : > { %v1778_v1 = vpop.f32.mrb[26].mxu0 }
 0x786   : > { %v3547_v2 = vpop.f32.mrb[27].mxu0  ;;  %v1781_v3 = vadd.f32 %v1776_v63, %v863_v61 }
 0x788   : > { %v1784_v4 = vsel %vm915_vm0, %v1781_v3, 0.0 }
 0x789   : > { %1785 = vadd.xlane.f32.xlu0 %v1784_v4 }
 0x78f   : > { %v1963_v33 = vpop.f32.mrb[28].mxu0 }
 0x790   : > { %v1964_v34 = vadd.f32 %v3319_v32, %v1963_v33  ;;  %v3566_v35 = vpop.f32.mrb[29].mxu0 }
 0x791   : > { %v1966_v36 = vpop.f32.mrb[30].mxu0 }
 0x792   : > { %v3386_v37 = vpack.c.bf16 %v1964_v34, %v1964_v34  ;;  %v1967_v38 = vadd.f32 %v3319_v32, %v1966_v36  ;;  %v3567_v39 = vpop.f32.mrb[31].mxu0 }
 0x794   : > { %1979 = vst.msk [vmem:[#allocation4] sm:$0xf] %vm1978_vm12, %v3386_v37  ;;  %v3387_v40 = vpack.c.bf16 %v1967_v38, %v1967_v38 }
 0x796   : > { %1981 = vst.msk [vmem:[#allocation4 + $0x4] sm:$0x3] %vm1980_vm13, %v3387_v40 }
 0x79d   : > { %v5101_v41 = vld [vmem:[#allocation4] sm:$0x3f]  }
 0x79e   : > { %v5103_v42 = vld [vmem:[#allocation4] sm:$0x3f]  }
 0x79f   : > { %v5105_v43 = vld [vmem:[#allocation4] sm:$0x3f]   ;;  %2113 = vrot.lane.b32.xlu0 %v5101_v41, %s5451_s7 }
 0x7a0   : > { %v1994_v44 = vsel %vm978_vm5, %v5105_v43, 0  ;;  %v5120_v54 = vld [vmem:[#allocation4] sm:$0x3f]  }
 0x7a1   : > { %v5125_v56 = vld [vmem:[#allocation4] sm:$0x3f]  }
 0x7a2   : > { %v5131_v28 = vld [vmem:[#allocation4] sm:$0x3f]  }
 0x816   : > { %v1786_v6 = vpop.xlane.xlu0 %1785 }
 0x817   : > { %v1788_v7 = vmul.f32 0.020833334, %v1786_v6 }
 0x819   : > { %v1789_v8 = vsub.f32 %v1781_v3, %v1788_v7 }
 0x81a   : > { %v2114_v50 = vpop.permute.xlu0 %2113 }
 0x81b   : > { %v1790_v9 = vmul.f32 %v1789_v8, %v1789_v8  ;;  %v2119_v51 = vsel %vm978_vm5, %v2114_v50, 0 }
 0x81d   : > { %v1791_v10 = vsel %vm915_vm0, %v1790_v9, 0.0 }
 0x81e   : > { %1792 = vadd.xlane.f32.xlu1 %v1791_v10 }
 0x82f   : > { %2371 = vrot.lane.b32.xlu1 %v5103_v42, %s5452_s1 }
 0x8ab   : > { %v1793_v17 = vpop.xlane.xlu1 %1792 }
 0x8ac   : > { %v1794_v18 = vmul.f32 0.020833334, %v1793_v17 }
 0x8ae   : > { %v1795_v19 = vadd.f32 1e-05, %v1794_v18 }
 0x8af   : > { %v2372_v63 = vpop.permute.xlu1 %2371 }
 0x8b0   : > { %3921 = vrsqrt.f32 %v1795_v19  ;;  %v2377_v1 = vsel %vm978_vm5, %v2372_v63, 0 }
 0x8ba   : > { %v3922_v20 = vpop.eup %3921 }
 0x8bb   : > { %v1797_v23 = vmul.f32 %v3922_v20, %v1789_v8 }
 0x8bd   : > { %v1804_v29 = vmul.f32 %v3312_v21, %v1797_v23 }
 0x8bf   : > { %v5094_v30 = vadd.f32 %v3313_v25, %v1804_v29 }
 0x8c1   : > { %v1812_v31 = vpack.c.bf16 %v5094_v30, %v5094_v30 }
 0x8c3   : > { %3555 = vmatmul.mubr.msk.bf16.vlgmr.msra.gmra.mrb[28].mxu1 %vm915_vm0, %v1812_v31 }
 0x8c4   : > { %3570 = vmatprep.mubr.msk.bf16.mxu1 %vm4397_vm4, %v4396_v22  ;;  %3569 = vmatpush3.bf16.xpose.msra.mxu1 %v1994_v44 }
 0x8c5   : > { %3580 = vmatprep.subr.bf16.mxu1 %v4396_v22 }
 0x996   : > { %v1881_v24 = vpop.f32.mrb[28].mxu1 }
 0x997   : > { %v1882_v26 = vadd.f32 %v3314_v45, %v1881_v24  ;;  %v3556_v46 = vpop.f32.mrb[29].mxu1 }
 0x998   : > { %v1884_v47 = vpop.f32.mrb[30].mxu1 }
 0x999   : > { %v1887_v48 = vpack.c.bf16 %v1882_v26, %v1882_v26  ;;  %v3557_v49 = vpop.f32.mrb[31].mxu1 }
 0x99b   : > { %1889 = vst.msk [vmem:[#allocation3] sm:$0xf] %vm1888_vm14, %v1887_v48 }
 0x9a2   : > { %v1982_v52 = vld [vmem:[#allocation3] sm:$0xf] }
 0x9a3   : > { %v3879_v53 = vld [vmem:[#allocation3] ss:$0 sps:$4 sm:$0xff]   ;;  %3571 = vmatmul.mubr.msk.bf16.vlgmr.msra.gmra.mrb[32].mxu1 %vm978_vm5, %v1982_v52 }
 0x9a4   : > { %2106 = vrot.lane.b32.xlu0 %v3879_v53, %s5451_s7  ;;  %3581 = vmatpush3.bf16.xpose.msra.mxu1 %v2119_v51  ;;  %v3881_v55 = vld [vmem:[#allocation3] ss:$0 sps:$4 sm:$0xff]   ;;  %s5461_s7 = smov 40  }
 0x9a5   : > { %3582 = vmatprep.mubr.msk.bf16.mxu1 %vm4397_vm4, %v4396_v22  ;;  %3592 = vmatprep.subr.bf16.mxu1 %v4396_v22  ;;  %v3883_v27 = vld [vmem:[#allocation3] ss:$0 sps:$4 sm:$0xff]  }
 0x9a6   : > { %v3884_v57 = vld [vmem:[#allocation3] ss:$0 sps:$4 sm:$0xff]  }
 0x9a7   : > { %v3886_v58 = vld [vmem:[#allocation3] ss:$0 sps:$4 sm:$0xff]  }
 0x9a8   : > { %2242 = vrot.lane.b32.xlu0 %v5120_v54, %s5453_s25 }
 0x9ac   : > { %2235 = vrot.lane.b32.xlu0 %v3881_v55, %s5453_s25  ;;  %s5463_s25 = smov 16  }
 0x9b0   : > { %2500 = vrot.lane.b32.xlu0 %v5125_v56, %s5454_s2 }
 0x9b4   : > { %2364 = vrot.lane.b32.xlu0 %v3883_v27, %s5452_s1  ;;  %s5462_s1 = smov 8  }
 0x9b8   : > { %2493 = vrot.lane.b32.xlu0 %v3884_v57, %s5454_s2  ;;  %s5464_s2 = smov 24  }
 0x9bc   : > { %2629 = vrot.lane.b32.xlu0 %v5131_v28, %s5455_s6 }
 0x9c0   : > { %2622 = vrot.lane.b32.xlu0 %v3886_v58, %s5455_s6  ;;  %s5465_s6 = smov 32  }
 0xa16   : > { %v2107_v59 = vpop.permute.xlu0 %2106 }
 0xa17   : > { %3583 = vmatmul.mubr.msk.bf16.vlgmr.msra.gmra.mrb[36].mxu1 %vm978_vm5, %v2107_v59 }
 0xa18   : > { %3594 = vmatprep.mubr.msk.bf16.mxu1 %vm4397_vm4, %v4396_v22 }
 0xa1a   : > { %v2243_v60 = vpop.permute.xlu0 %2242 }
 0xa1b   : > { %v2248_v61 = vsel %vm978_vm5, %v2243_v60, 0 }
 0xa1c   : > { %3593 = vmatpush3.bf16.xpose.msra.mxu1 %v2248_v61 }
 0xa1d   : > { %3604 = vmatprep.subr.bf16.mxu1 %v4396_v22 }
 0xa1e   : > { %v2236_v62 = vpop.permute.xlu0 %2235 }
 0xa22   : > { %v2501_v0 = vpop.permute.xlu0 %2500 }
 0xa23   : > { %3595 = vmatmul.mubr.msk.bf16.vlgmr.msra.gmra.mrb[40].mxu1 %vm978_vm5, %v2236_v62  ;;  %v2506_v4 = vsel %vm978_vm5, %v2501_v0, 0 }
 0xa24   : > { %3605 = vmatpush3.bf16.xpose.msra.mxu1 %v2377_v1  ;;  %3606 = vmatprep.mubr.msk.bf16.mxu1 %vm4397_vm4, %v4396_v22 }
 0xa25   : > { %3616 = vmatprep.subr.bf16.mxu1 %v4396_v22 }
 0xa26   : > { %v2365_v2 = vpop.permute.xlu0 %2364 }
 0xa2a   : > { %v2494_v3 = vpop.permute.xlu0 %2493 }
 0xa2b   : > { %3607 = vmatmul.mubr.msk.bf16.vlgmr.msra.gmra.mrb[44].mxu1 %vm978_vm5, %v2365_v2 }
 0xa2c   : > { %3617 = vmatpush3.bf16.xpose.msra.mxu1 %v2506_v4  ;;  %3618 = vmatprep.mubr.msk.bf16.mxu1 %vm4397_vm4, %v4396_v22 }
 0xa2d   : > { %3628 = vmatprep.subr.bf16.mxu1 %v4396_v22 }
 0xa2e   : > { %v2630_v5 = vpop.permute.xlu0 %2629 }
 0xa2f   : > { %v2635_v6 = vsel %vm978_vm5, %v2630_v5, 0 }
 0xa32   : > { %v2623_v7 = vpop.permute.xlu0 %2622 }
 0xa33   : > { %3619 = vmatmul.mubr.msk.bf16.vlgmr.msra.gmra.mrb[48].mxu1 %vm978_vm5, %v2494_v3 }
 0xa34   : > { %3629 = vmatpush3.bf16.xpose.msra.mxu1 %v2635_v6  ;;  %3630 = vmatprep.mubr.msk.bf16.mxu1 %vm4397_vm4, %v4396_v22 }
 0xa35   : > { %3640 = vmatprep.subr.bf16.mxu1 %v4396_v22 }
 0xa3b   : > { %3631 = vmatmul.mubr.msk.bf16.vlgmr.msra.gmra.mrb[52].mxu1 %vm978_vm5, %v2623_v7 }
 0xa3c   : > { %3646 = vmatprep.mubr.msk.bf16.mxu1 %vm4397_vm4, %v4396_v22 }
 0xa76   : > { %v2030_v8 = vpop.f32.mrb[32].mxu1 }
 0xa77   : > { %v3572_v9 = vpop.f32.mrb[33].mxu1  ;;  %v2037_v10 = vsel %vm2036_vm15, %v2030_v8, -inf }
 0xa78   : > { %2038 = vmax.xlane.f32.xlu1 %v2037_v10  ;;  %v2033_v11 = vpop.f32.mrb[34].mxu1 }
 0xa79   : > { %v3573_v12 = vpop.f32.mrb[35].mxu1 }
 0xaea   : > { %v2155_v13 = vpop.f32.mrb[36].mxu1 }
 0xaeb   : > { %v3584_v14 = vpop.f32.mrb[37].mxu1  ;;  %v2161_v15 = vsel %vm2036_vm15, %v2155_v13, -inf }
 0xaec   : > { %2162 = vmax.xlane.f32.xlu0 %v2161_v15  ;;  %v2158_v16 = vpop.f32.mrb[38].mxu1 }
 0xaed   : > { %v3585_v17 = vpop.f32.mrb[39].mxu1 }
 0xaf6   : > { %v2284_v18 = vpop.f32.mrb[40].mxu1 }
 0xaf7   : > { %v3596_v19 = vpop.f32.mrb[41].mxu1  ;;  %v2290_v20 = vsel %vm2036_vm15, %v2284_v18, -inf }
 0xaf8   : > { %2291 = vmax.xlane.f32.xlu0 %v2290_v20  ;;  %v2287_v21 = vpop.f32.mrb[42].mxu1 }
 0xaf9   : > { %v3597_v23 = vpop.f32.mrb[43].mxu1 }
 0xafe   : > { %v2413_v25 = vpop.f32.mrb[44].mxu1 }
 0xaff   : > { %v3608_v29 = vpop.f32.mrb[45].mxu1  ;;  %v2419_v31 = vsel %vm2036_vm15, %v2413_v25, -inf }
 0xb00   : > { %2420 = vmax.xlane.f32.xlu1 %v2419_v31  ;;  %v2416_v32 = vpop.f32.mrb[46].mxu1 }
 0xb01   : > { %v3609_v33 = vpop.f32.mrb[47].mxu1 }
 0xb05   : > { %v2039_v34 = vpop.xlane.xlu1 %2038 }
 0xb06   : > { %v2040_v35 = vsub.f32 %v2030_v8, %v2039_v34  ;;  %v2542_v36 = vpop.f32.mrb[48].mxu1 }
 0xb07   : > { %v3620_v37 = vpop.f32.mrb[49].mxu1  ;;  %v2548_v38 = vsel %vm2036_vm15, %v2542_v36, -inf }
 0xb08   : > { %v2041_v39 = vmul.f32 1.442695, %v2040_v35  ;;  %2549 = vmax.xlane.f32.xlu0 %v2548_v38  ;;  %v2545_v40 = vpop.f32.mrb[50].mxu1 }
 0xb09   : > { %v3621_v44 = vpop.f32.mrb[51].mxu1 }
 0xb0a   : > { %3923 = vpow2.f32 %v2041_v39 }
 0xb0e   : > { %v2671_v45 = vpop.f32.mrb[52].mxu1 }
 0xb0f   : > { %v3632_v24 = vpop.f32.mrb[53].mxu1  ;;  %v2677_v26 = vsel %vm2036_vm15, %v2671_v45, -inf }
 0xb10   : > { %2678 = vmax.xlane.f32.xlu1 %v2677_v26  ;;  %v2674_v46 = vpop.f32.mrb[54].mxu1 }
 0xb11   : > { %v3633_v47 = vpop.f32.mrb[55].mxu1 }
 0xb14   : > { %v3924_v48 = vpop.eup %3923 }
 0xb15   : > { %v2043_v49 = vsel %vm2036_vm15, %v3924_v48, 0.0 }
 0xb16   : > { %2044 = vadd.xlane.f32.xlu0 %v2043_v49 }
 0xb79   : > { %v2163_v50 = vpop.xlane.xlu0 %2162 }
 0xb7a   : > { %v2164_v51 = vsub.f32 %v2155_v13, %v2163_v50 }
 0xb7c   : > { %v2165_v52 = vmul.f32 1.442695, %v2164_v51 }
 0xb7e   : > { %3925 = vpow2.f32 %v2165_v52 }
 0xb85   : > { %v2292_v53 = vpop.xlane.xlu0 %2291 }
 0xb86   : > { %v2293_v55 = vsub.f32 %v2284_v18, %v2292_v53 }
 0xb88   : > { %v3926_v27 = vpop.eup %3925  ;;  %v2294_v57 = vmul.f32 1.442695, %v2293_v55 }
 0xb89   : > { %v2167_v58 = vsel %vm2036_vm15, %v3926_v27, 0.0 }
 0xb8a   : > { %3927 = vpow2.f32 %v2294_v57  ;;  %2168 = vadd.xlane.f32.xlu1 %v2167_v58 }
 0xb8d   : > { %v2421_v61 = vpop.xlane.xlu1 %2420 }
 0xb8e   : > { %v2422_v62 = vsub.f32 %v2413_v25, %v2421_v61 }
 0xb90   : > { %v2423_v0 = vmul.f32 1.442695, %v2422_v62 }
 0xb92   : > { %3929 = vpow2.f32 %v2423_v0 }
 0xb94   : > { %v3928_v59 = vpop.eup %3927 }
 0xb95   : > { %v2296_v60 = vsel %vm2036_vm15, %v3928_v59, 0.0  ;;  %v2550_v63 = vpop.xlane.xlu0 %2549 }
 0xb96   : > { %2297 = vadd.xlane.f32.xlu0 %v2296_v60  ;;  %v2551_v1 = vsub.f32 %v2542_v36, %v2550_v63 }
 0xb98   : > { %v2552_v2 = vmul.f32 1.442695, %v2551_v1  ;;  %v3887_v1 = vld [vmem:[#allocation20] sm:$0xff]  }
 0xb99   : > { %3641 = vmatpush3.bf16.msra.mxu1 %v3887_v1 }
 0xb9a   : > { %3931 = vpow2.f32 %v2552_v2  ;;  %3642 = vmatprep.subr.bf16.mxu1 %v4396_v22 }
 0xb9b   : > { %2173 = vrot.lane.b32.xlu1 %v5101_v41, %s5456_s18  ;;  %s5468_s18 = sld [smem:[#allocation50_spill]] }
 0xb9c   : > { %v3930_v6 = vpop.eup %3929 }
 0xb9d   : > { %v2679_v3 = vpop.xlane.xlu1 %2678  ;;  %v2425_v7 = vsel %vm2036_vm15, %v3930_v6, 0.0 }
 0xb9e   : > { %v2680_v4 = vsub.f32 %v2671_v45, %v2679_v3 }
 0xba0   : > { %v2681_v5 = vmul.f32 1.442695, %v2680_v4 }
 0xba2   : > { %3933 = vpow2.f32 %v2681_v5 }
 0xba3   : > { %v2045_v10 = vpop.xlane.xlu0 %2044 }
 0xba4   : > { %v5173_v8 = vpop.eup %3931  ;;  %3935 = vrcp.f32 %v2045_v10 }
 0xba5   : > { %v2554_v41 = vsel %vm2036_vm15, %v5173_v8, 0.0 }
 0xbac   : > { %2049 = vrot.lane.b32.xlu0 %v5105_v43, %s5457_s20  ;;  %v5177_v43 = vpop.eup %3933 }
 0xbad   : > { %v2683_v9 = vsel %vm2036_vm15, %v5177_v43, 0.0 }
 0xbae   : > { %v3936_v12 = vpop.eup %3935 }
 0xbaf   : > { %v2047_v14 = vmul.f32 %v3936_v12, %v3924_v48 }
 0xbbf   : > { %2426 = vadd.xlane.f32.xlu1 %v2425_v7  ;;  %v3888_v7 = vld [vmem:[#allocation20 + $0x8] sm:$0xff]  }
 0xbc0   : > { %3643 = vmatpush3.bf16.msra.mxu1 %v3888_v7 }
 0xbc1   : > { %3644 = vmatprep.subr.bf16.mxu1 %v4396_v22 }
 0xbc3   : > { %2555 = vadd.xlane.f32.xlu1 %v2554_v41  ;;  %v3889_v41 = vld [vmem:[#allocation20 + $0x10] sm:$0xff]  }
 0xbc4   : > { %3645 = vmatpush3.bf16.msra.mxu1 %v3889_v41 }
 0xbc5   : > { %3660 = vmatprep.subr.bf16.mxu1 %v4396_v22 }
 0xbcb   : > { %2684 = vadd.xlane.f32.xlu0 %v2683_v9 }
 0xbd4   : > { %2302 = vrot.lane.b32.xlu1 %v5120_v54, %s5458_s21  ;;  %s5466_s21 = sld [smem:[#allocation49_spill]] }
 0xbd8   : > { %2431 = vrot.lane.b32.xlu1 %v5103_v42, %s5459_s0  ;;  %v2048_v42 = vpack.c.bf16 %v2047_v14, %v2047_v14  ;;  %s5471_s0 = sld [smem:[#allocation54_spill]] }
 0xbdc   : > { %2560 = vrot.lane.b32.xlu1 %v5125_v56, %s5460_s5  ;;  %s5469_s5 = sld [smem:[#allocation52_spill]] }
 0xbe0   : > { %2689 = vrot.lane.b32.xlu1 %v5131_v28, %s5461_s7 }
 0xc17   : > { %v2169_v11 = vpop.xlane.xlu1 %2168 }
 0xc18   : > { %3937 = vrcp.f32 %v2169_v11 }
 0xc1b   : > { %v2174_v16 = vpop.permute.xlu1 %2173 }
 0xc1c   : > { %v2179_v17 = vsel %vm2054_vm1, %v2174_v16, 0 }
 0xc22   : > { %v3938_v56 = vpop.eup %3937 }
 0xc23   : > { %v2298_v13 = vpop.xlane.xlu0 %2297  ;;  %v2171_v28 = vmul.f32 %v3938_v56, %v3926_v27 }
 0xc24   : > { %3939 = vrcp.f32 %v2298_v13 }
 0xc25   : > { %v2172_v18 = vpack.c.bf16 %v2171_v28, %v2171_v28 }
 0xc27   : > { %v2050_v15 = vpop.permute.xlu0 %2049 }
 0xc28   : > { %v2056_v54 = vsel %vm2054_vm1, %v2050_v15, 0 }
 0xc29   : > { %3575 = vmatpush3.bf16.msra.mxu0 %v2056_v54 }
 0xc2a   : > { %3586 = vmatprep.subr.bf16.mxu0 %v4396_v22 }
 0xc2c   : > { %3577 = vmatmul.mubr.msk.bf16.vlgmr.msra.gmra.mrb[32].mxu0 %vm2036_vm15, %v2048_v42 }
 0xc2d   : > { %3587 = vmatpush3.bf16.msra.mxu0 %v2179_v17  ;;  %3588 = vmatprep.mubr.msk.bf16.mxu0 %vm4397_vm4, %v4396_v22 }
 0xc2e   : > { %3598 = vmatprep.subr.bf16.mxu0 %v4396_v22  ;;  %v3940_v20 = vpop.eup %3939 }
 0xc2f   : > { %v2300_v23 = vmul.f32 %v3940_v20, %v3928_v59 }
 0xc31   : > { %v2301_v31 = vpack.c.bf16 %v2300_v23, %v2300_v23 }
 0xc34   : > { %3589 = vmatmul.mubr.msk.bf16.vlgmr.msra.gmra.mrb[36].mxu0 %vm2036_vm15, %v2172_v18 }
 0xc35   : > { %3600 = vmatprep.mubr.msk.bf16.mxu0 %vm4397_vm4, %v4396_v22 }
 0xc4c   : > { %v2427_v19 = vpop.xlane.xlu1 %2426 }
 0xc4d   : > { %3941 = vrcp.f32 %v2427_v19  ;;  %v3355_v19 = vld [vmem:[#allocation21] ss:$0 sm:$0xff] }
 0xc50   : > { %v2556_v21 = vpop.xlane.xlu1 %2555 }
 0xc51   : > { %3943 = vrcp.f32 %v2556_v21 }
 0xc54   : > { %v2303_v25 = vpop.permute.xlu1 %2302 }
 0xc55   : > { %v2308_v29 = vsel %vm2054_vm1, %v2303_v25, 0 }
 0xc56   : > { %3599 = vmatpush3.bf16.msra.mxu0 %v2308_v29 }
 0xc57   : > { %3610 = vmatprep.subr.bf16.mxu0 %v4396_v22  ;;  %v3942_v32 = vpop.eup %3941 }
 0xc58   : > { %v2432_v33 = vpop.permute.xlu1 %2431  ;;  %v2429_v35 = vmul.f32 %v3942_v32, %v3930_v6  ;;  %v2685_v36 = vpop.xlane.xlu0 %2684 }
 0xc59   : > { %v2437_v34 = vsel %vm2054_vm1, %v2432_v33, 0  ;;  %3601 = vmatmul.mubr.msk.bf16.vlgmr.msra.gmra.mrb[40].mxu0 %vm2036_vm15, %v2301_v31  ;;  %3945 = vrcp.f32 %v2685_v36 }
 0xc5a   : > { %3611 = vmatpush3.bf16.msra.mxu0 %v2437_v34  ;;  %3612 = vmatprep.mubr.msk.bf16.mxu0 %vm4397_vm4, %v4396_v22  ;;  %v2430_v38 = vpack.c.bf16 %v2429_v35, %v2429_v35 }
 0xc5b   : > { %3622 = vmatprep.subr.bf16.mxu0 %v4396_v22  ;;  %v3944_v39 = vpop.eup %3943 }
 0xc5c   : > { %v2561_v37 = vpop.permute.xlu1 %2560  ;;  %v2558_v44 = vmul.f32 %v3944_v39, %v5173_v8  ;;  %v3892_v39 = vld [vmem:[%s5466_s21 + $0x10] sm:$0xff]  }
 0xc5d   : > { %v2566_v40 = vsel %vm2054_vm1, %v2561_v37, 0 }
 0xc5e   : > { %v2559_v24 = vpack.c.bf16 %v2558_v44, %v2558_v44 }
 0xc60   : > { %v2690_v45 = vpop.permute.xlu1 %2689 }
 0xc61   : > { %3613 = vmatmul.mubr.msk.bf16.vlgmr.msra.gmra.mrb[44].mxu0 %vm2036_vm15, %v2430_v38  ;;  %v2695_v46 = vsel %vm2054_vm1, %v2690_v45, 0  ;;  %v3890_v38 = vld [vmem:[%s5466_s21] sm:$0xff]  }
 0xc62   : > { %3623 = vmatpush3.bf16.msra.mxu0 %v2566_v40  ;;  %3624 = vmatprep.mubr.msk.bf16.mxu0 %vm4397_vm4, %v4396_v22 }
 0xc63   : > { %3634 = vmatprep.subr.bf16.mxu0 %v4396_v22  ;;  %v3946_v26 = vpop.eup %3945 }
 0xc64   : > { %v2687_v47 = vmul.f32 %v3946_v26, %v5177_v43 }
 0xc66   : > { %v2688_v48 = vpack.c.bf16 %v2687_v47, %v2687_v47  ;;  %v3360_v47 = vld [vmem:[#allocation23] ss:$0 sm:$0xff] }
 0xc69   : > { %3625 = vmatmul.mubr.msk.bf16.vlgmr.msra.gmra.mrb[48].mxu0 %vm2036_vm15, %v2559_v24 }
 0xc6a   : > { %3635 = vmatpush3.bf16.msra.mxu0 %v2695_v46  ;;  %3636 = vmatprep.mubr.msk.bf16.mxu0 %vm4397_vm4, %v4396_v22 }
 0xc6b   : > { %3650 = vmatprep.subr.bf16.mxu0 %v4396_v22 }
 0xc71   : > { %3637 = vmatmul.mubr.msk.bf16.vlgmr.msra.gmra.mrb[52].mxu0 %vm2036_vm15, %v2688_v48 }
 0xc72   : > { %3656 = vmatprep.mubr.msk.bf16.mxu0 %vm4397_vm4, %v4396_v22  ;;  %3651 = vmatpush3.bf16.msra.mxu0 %v3890_v38 }
 0xc73   : > { %3652 = vmatprep.subr.bf16.mxu0 %v4396_v22 }
 0xcff   : > { %v2092_v49 = vpop.f32.mrb[32].mxu0 }
 0xd00   : > { %v2098_v50 = vpack.c.bf16 %v2092_v49, %v2092_v49  ;;  %v3578_v51 = vpop.f32.mrb[33].mxu0  ;;  %v3361_v49 = vld [vmem:[#allocation24] ss:$0 sm:$0xff] }
 0xd01   : > { %v2095_v52 = vpop.f32.mrb[34].mxu0 }
 0xd02   : > { %2099 = vst.msk [vmem:[#allocation5] sm:$0xf] %vm1086_vm6, %v2098_v50  ;;  %v3579_v53 = vpop.f32.mrb[35].mxu0 }
 0xd07   : > { %v2215_v55 = vpop.f32.mrb[36].mxu0 }
 0xd08   : > { %v3388_v27 = vpack.c.bf16 %v2215_v55, %v2215_v55  ;;  %v3590_v57 = vpop.f32.mrb[37].mxu0 }
 0xd09   : > { %v2218_v58 = vpop.f32.mrb[38].mxu0 }
 0xd0a   : > { %2225 = vrot.lane.b32.xlu1 %v3388_v27, %s5462_s1  ;;  %v3591_v59 = vpop.f32.mrb[39].mxu0  ;;  %v3362_v27 = vld [vmem:[%s5468_s18] ss:$0 sm:$0xff]  ;;  %s3042_s1 = scalar_lea.sflag [#allocation8], %s4865_s27 }
 0xd2c   : > { %v2344_v60 = vpop.f32.mrb[40].mxu0 }
 0xd2d   : > { %v3389_v61 = vpack.c.bf16 %v2344_v60, %v2344_v60  ;;  %v3602_v62 = vpop.f32.mrb[41].mxu0 }
 0xd2e   : > { %v2347_v63 = vpop.f32.mrb[42].mxu0 }
 0xd2f   : > { %2354 = vrot.lane.b32.xlu1 %v3389_v61, %s5463_s25  ;;  %v3603_v0 = vpop.f32.mrb[43].mxu0 }
 0xd34   : > { %v2473_v2 = vpop.f32.mrb[44].mxu0 }
 0xd35   : > { %v3390_v3 = vpack.c.bf16 %v2473_v2, %v2473_v2  ;;  %v3614_v4 = vpop.f32.mrb[45].mxu0 }
 0xd36   : > { %v2476_v5 = vpop.f32.mrb[46].mxu0 }
 0xd37   : > { %2483 = vrot.lane.b32.xlu1 %v3390_v3, %s5464_s2  ;;  %v3615_v6 = vpop.f32.mrb[47].mxu0  ;;  %s5470_s2 = sld [smem:[#allocation53_spill]] }
 0xd3c   : > { %v2602_v8 = vpop.f32.mrb[48].mxu0 }
 0xd3d   : > { %v3391_v43 = vpack.c.bf16 %v2602_v8, %v2602_v8  ;;  %v3626_v9 = vpop.f32.mrb[49].mxu0 }
 0xd3e   : > { %v2605_v10 = vpop.f32.mrb[50].mxu0 }
 0xd3f   : > { %2612 = vrot.lane.b32.xlu1 %v3391_v43, %s5465_s6  ;;  %v3627_v11 = vpop.f32.mrb[51].mxu0  ;;  %s5467_s6 = sld [smem:[#allocation51_spill]] }
 0xd44   : > { %v2731_v12 = vpop.f32.mrb[52].mxu0 }
 0xd45   : > { %v3392_v13 = vpack.c.bf16 %v2731_v12, %v2731_v12  ;;  %v3638_v14 = vpop.f32.mrb[53].mxu0  ;;  %v3893_v40 = vld [vmem:[%s5467_s6] sm:$0xff]   ;;  %v3894_v44 = vld [vmem:[%s5467_s6 + $0x8] sm:$0xff]   ;;  %v3895_v53 = vld [vmem:[%s5467_s6 + $0x10] sm:$0xff]  }
 0xd46   : > { %v2734_v15 = vpop.f32.mrb[54].mxu0  ;;  %v3896_v55 = vld [vmem:[%s5467_s6 + $0x18] sm:$0xff]   ;;  %v3373_v14 = vld [vmem:[%s5470_s2] ss:$0 sm:$0xff] }
 0xd47   : > { %2741 = vrot.lane.b32.xlu0 %v3392_v13, %s5461_s7  ;;  %v3639_v54 = vpop.f32.mrb[55].mxu0  ;;  %s3271_s7 = sshll.u32 %s4865_s27, 3 }
 0xd48   : > { %v3374_v54 = vld [vmem:[%s5471_s0] ss:$0 sm:$0xff]  ;;  %s855_s6 = scalar_lea.vmem [#allocation26], %s3271_s7 }
 0xd49   : > { %s3055_s8 = sshll.u32 %s855_s6, 4  ;;  %s5289_s8 = int_to_ptr.vmem [resolvable:$true] %s3055_s8 }
 0xd4a   : > { %s4289_s25 = scalar_lea.vmem %s5289_s8, 128 }
 0xd4b   : > { %p4290_p9 = scmp.ne.s32.totalorder %s5289_s8, %s4289_s25 }
 0xd4d   : > { %p4291_p0 = pnand %p4290_p9, %p5473_p6 }
 0xd4f   : > { %p4292_p2 = pneg %p4291_p0 }
 0xd7c   : > { %v2226_v16 = vpop.permute.xlu1 %2225 }
 0xd7d   : > { %2228 = vst.msk [vmem:[#allocation5] sm:$0xf] %vm1209_vm7, %v2226_v16 }
 0xda1   : > { %v2355_v42 = vpop.permute.xlu1 %2354 }
 0xda2   : > { %2357 = vst.msk [vmem:[#allocation5] sm:$0xf] %vm1332_vm8, %v2355_v42 }
 0xda9   : > { %v2484_v56 = vpop.permute.xlu1 %2483 }
 0xdaa   : > { %2486 = vst.msk [vmem:[#allocation5] sm:$0xf] %vm1455_vm9, %v2484_v56 }
 0xdb1   : > { %v2613_v17 = vpop.permute.xlu1 %2612 }
 0xdb2   : > { %2615 = vst.msk [vmem:[#allocation5] sm:$0xf] %vm1577_vm10, %v2613_v17 }
 0xdb9   : > { %v2742_v28 = vpop.permute.xlu0 %2741 }
 0xdba   : > { %2744 = vst.msk [vmem:[#allocation5] sm:$0xf] %vm1704_vm11, %v2742_v28 }
 0xdc1   : > { %v2745_v18 = vld [vmem:[#allocation5] sm:$0xf] }
 0xdc2   : > { %3647 = vmatmul.mubr.msk.bf16.vlgmr.msra.gmra.mrb[56].mxu1 %vm915_vm0, %v2745_v18 }
 0xdc3   : > { %3668 = vmatprep.mubr.msk.bf16.mxu1 %vm4397_vm4, %v4396_v22  ;;  %3661 = vmatpush3.bf16.msra.mxu1 %v3893_v40 }
 0xdc4   : > { %3662 = vmatprep.subr.bf16.mxu1 %v4396_v22 }
 0xdc7   : > { %3663 = vmatpush3.bf16.msra.mxu1 %v3894_v44 }
 0xdc8   : > { %3664 = vmatprep.subr.bf16.mxu1 %v4396_v22 }
 0xdcb   : > { %3665 = vmatpush3.bf16.msra.mxu1 %v3895_v53 }
 0xdcc   : > { %3666 = vmatprep.subr.bf16.mxu1 %v4396_v22 }
 0xdcf   : > { %3667 = vmatpush3.bf16.msra.mxu1 %v3896_v55 }
 0xe95   : > { %v2814_v20 = vpop.f32.mrb[56].mxu1 }
 0xe96   : > { %v2815_v21 = vadd.f32 %v3355_v19, %v2814_v20  ;;  %v3648_v23 = vpop.f32.mrb[57].mxu1 }
 0xe97   : > { %v2817_v25 = vpop.f32.mrb[58].mxu1 }
 0xe98   : > { %v3649_v29 = vpop.f32.mrb[59].mxu1  ;;  %v2820_v31 = vadd.f32 %v2815_v21, %v5094_v30  ;;  %v3891_v30 = vld [vmem:[%s5466_s21 + $0x8] sm:$0xff]  }
 0xe99   : > { %3653 = vmatpush3.bf16.msra.mxu0 %v3891_v30 }
 0xe9a   : > { %v2823_v32 = vsel %vm915_vm0, %v2820_v31, 0.0  ;;  %3654 = vmatprep.subr.bf16.mxu0 %v4396_v22  ;;  %v3367_v22 = vld [vmem:[%s5469_s5] ss:$0 sm:$0xff]  ;;  %s3376_s5 = sshll.u32 %s4550_s23, 7  ;;  %s4413_s23 = smov [#allocation26]  }
 0xe9b   : > { %2824 = vadd.xlane.f32.xlu1 %v2823_v32  ;;  %s5287_s12 = scalar_lea.hbm %s5472_s11, %s3376_s5  ;;  %s4293_s7 = sshll.u32 %s4413_s23, 4  ;;  %s4294_s7 = int_to_ptr.vmem [resolvable:$false] %s4293_s7 }
 0xe9c   : > { %s4295_s2 = scalar_lea.vmem %s4294_s7, 256  ;;  %p4296_p8 = scmp.lt.s32.totalorder %s5289_s8, %s4294_s7 }
 0xe9d   : > { %3655 = vmatpush3.bf16.msra.mxu0 %v3892_v39  ;;  %p4297_p10 = scmp.lt.s32.totalorder %s4295_s2, %s4289_s25 }
 0xe9f   : > { %p4298_p12 = por %p4297_p10, %p4296_p8 }
 0xea1   : > { %p4299_p11 = pnand %p4298_p12, %p4292_p2 }
 0xf28   : > { %v2825_v33 = vpop.xlane.xlu1 %2824 }
 0xf29   : > { %v2826_v34 = vmul.f32 0.020833334, %v2825_v33 }
 0xf2b   : > { %v2827_v35 = vsub.f32 %v2820_v31, %v2826_v34 }
 0xf2d   : > { %v2828_v36 = vmul.f32 %v2827_v35, %v2827_v35 }
 0xf2f   : > { %v2829_v37 = vsel %vm915_vm0, %v2828_v36, 0.0 }
 0xf30   : > { %2830 = vadd.xlane.f32.xlu0 %v2829_v37 }
 0xfbd   : > { %v2831_v45 = vpop.xlane.xlu0 %2830 }
 0xfbe   : > { %v2832_v24 = vmul.f32 0.020833334, %v2831_v45 }
 0xfc0   : > { %v2833_v26 = vadd.f32 1e-05, %v2832_v24 }
 0xfc2   : > { %3947 = vrsqrt.f32 %v2833_v26 }
 0xfcc   : > { %v3948_v46 = vpop.eup %3947 }
 0xfcd   : > { %v2835_v48 = vmul.f32 %v3948_v46, %v2827_v35 }
 0xfcf   : > { %v2842_v50 = vmul.f32 %v3360_v47, %v2835_v48 }
 0xfd1   : > { %v2849_v51 = vadd.f32 %v3361_v49, %v2842_v50 }
 0xfd3   : > { %v2850_v52 = vpack.c.bf16 %v2849_v51, %v2849_v51 }
 0xfd5   : > { %3657 = vmatmul.mubr.msk.bf16.vlgmr.msra.gmra.mrb[56].mxu0 %vm915_vm0, %v2850_v52 }
0x10a8   : > { %v2919_v57 = vpop.f32.mrb[56].mxu0 }
0x10a9   : > { %v2920_v58 = vadd.f32 %v3362_v27, %v2919_v57  ;;  %v3658_v59 = vpop.f32.mrb[57].mxu0 }
0x10aa   : > { %v2922_v60 = vpop.f32.mrb[58].mxu0 }
0x10ab   : > { %v2925_v61 = vmax.f32 %v2920_v58, 0.0  ;;  %v3659_v62 = vpop.f32.mrb[59].mxu0 }
0x10ad   : > { %v2926_v63 = vpack.c.bf16 %v2925_v61, %v2925_v61 }
0x10af   : > { %3669 = vmatmul.mubr.msk.bf16.vlgmr.msra.gmra.mrb[60].mxu1 %vm2966_vm2, %v2926_v63 }
0x1182   : > { %v3004_v0 = vpop.f32.mrb[60].mxu1 }
0x1183   : > { %v3005_v1 = vadd.f32 %v3367_v22, %v3004_v0  ;;  %v3670_v2 = vpop.f32.mrb[61].mxu1 }
0x1184   : > { %v3007_v3 = vpop.f32.mrb[62].mxu1 }
0x1185   : > { %v3671_v4 = vpop.f32.mrb[63].mxu1  ;;  %v3010_v5 = vadd.f32 %v3005_v1, %v2849_v51 }
0x1187   : > { %v3013_v6 = vsel %vm915_vm0, %v3010_v5, 0.0 }
0x1188   : > { %3014 = vadd.xlane.f32.xlu1 %v3013_v6 }
0x1215   : > { %v3015_v7 = vpop.xlane.xlu1 %3014 }
0x1216   : > { %v3016_v8 = vmul.f32 0.020833334, %v3015_v7 }
0x1218   : > { %v3017_v41 = vsub.f32 %v3010_v5, %v3016_v8 }
0x121a   : > { %v3018_v43 = vmul.f32 %v3017_v41, %v3017_v41 }
0x121c   : > { %v3019_v9 = vsel %vm915_vm0, %v3018_v43, 0.0 }
0x121d   : > { %3020 = vadd.xlane.f32.xlu1 %v3019_v9 }
0x12aa   : > { %v3021_v10 = vpop.xlane.xlu1 %3020 }
0x12ab   : > { %v3022_v11 = vmul.f32 0.020833334, %v3021_v10 }
0x12ad   : > { %v3023_v12 = vadd.f32 1e-05, %v3022_v11 }
0x12af   : > { %3949 = vrsqrt.f32 %v3023_v12 }
0x12b9   : > { %v3950_v13 = vpop.eup %3949 }
0x12ba   : > { %v3025_v15 = vmul.f32 %v3950_v13, %v3017_v41 }
0x12bc   : > { %v3032_v16 = vmul.f32 %v3373_v14, %v3025_v15 }
0x12be   : > { %v3039_v42 = vadd.f32 %v3374_v54, %v3032_v16 }
0x12c0   : > { %3040 = vst.msk [vmem:[%s855_s6] sm:$0xff] %vm915_vm0, %v3039_v42 }
0x12c1   : > { %4302 = shalt.err (!%p4299_p11)
}
0x12c2   : > { %s4303_s9 = scalar_lea.hbm %s5287_s12, 128  ;;  %s4307_s6 = scalar_lea.hbm %s5472_s11, 256 }
0x12c3   : > { %p4304_p13 = scmp.ne.s32.totalorder %s5287_s12, %s4303_s9  ;;  %p4308_p4 = scmp.lt.u32.totalorder %s5287_s12, %s5472_s11 }
0x12c4   : > { %p4309_p1 = scmp.lt.u32.totalorder %s4307_s6, %s4303_s9  ;;  %p4311_p9 = scmp.lt.u32.totalorder %s4303_s9, %s5287_s12 }
0x12c5   : > { %p4305_p5 = pnand %p4304_p13, %p5473_p6 }
0x12c6   : > { %p4310_p3 = por %p4309_p1, %p4308_p4 }
0x12c7   : > { %p4306_p7 = pneg %p4305_p5 }
0x12c8   : > { %p4312_p0 = por %p4311_p9, %p4310_p3 }
0x12ca   : > { %p4313_p2 = pnand %p4312_p0, %p4306_p7 }
0x12cc   : > { %4316 = shalt.err (!%p4313_p2)
}
0x12cd   : > { %3718 = dma.vmem_to_hbm [thread:$0]  (%p5473_p6), %s5289_s8, 128, %s5287_s12, %s3042_s1  }
0x12ce PF: > { %s3067_s0 = sand.u32 1, %s4367_s3   ;;  %p5474_p8 = scmp.ne.s32.totalorder %s5430_s19, 0 }
0x12cf   : > { %p5475_p10 = scmp.ge.s32.totalorder %s4379_s30, 2  ;;  %s3068_s5 = scalar_lea.sflag [#allocation8], %s3067_s0 }
0x12d1   : > { %p3759_p12 = pnand %p5475_p10, %p5474_p8 }
0x12d3   : > { %4362 = dma.done.wait (!%p3759_p12), %s3068_s5, 128  }
0x12d4   : > { %4364 = vsyncadd (!%p3759_p12), %s3068_s5, 4294967168  ;;  %p41_p11 = scmp.ge.s32.totalorder %s4795_s26, 4   ;;  %s5476_s3 = smov %s4371_s28 }
0x12d5   : > { %s5477_s28 = smov %s4375_s29  ;;  %s5478_s29 = smov %s4807_s4 }
0x12d6   : > { %s5479_s30 = smov %s4795_s26  ;;  %43 = sbr.rel (!%p41_p11) target bundleno = 32 (0x20), region = 200 }
0x12dd   :  { %3073 = vsyncpa [#allocation7], 1 }
0x12de   :  { %3075 = vsyncpa [#allocation7 + $0x1], 1 }
0x12df   :  { %3076 = vsyncpa [#allocation10], 1 }
0x12e0   :  { %3077 = vsyncpa [#allocation13], 1 }
0x12e1   :  { %3078 = vsyncpa [#allocation16], 1 }
0x12e2   :  { %3079 = vsyncpa [#allocation19], 1 }
0x12e3   :  { %3080 = vsyncpa [#allocation22], 1 }
0x12e4   :  { %3081 = vsyncpa [#allocation25], 1 }
0x12e5   :  { %3082 = vsyncpa [#allocation8], 1 }
0x12e6   :  { %3084 = vsyncpa [#allocation8 + $0x1], 1 }

</bundles_post_ra>
